<compile_context>
chip_gen: v7x
topology: tpu7x:2x2x1
jax: 0.10.0
libtpu: 0.0.40
codegen_flags: <defaults>
</compile_context>

<pallas_src>
import math
import functools

import jax
import jax.numpy as jnp
from jax import lax
from jax.experimental import pallas as pl
from jax.experimental.pallas import tpu as pltpu


def _round_up(x, m):
    return ((x + m - 1) // m) * m


def _gelu_exact(x):
    # torch ACT2FN["gelu"] == nn.GELU() == exact erf formulation
    return 0.5 * x * (1.0 + lax.erf(x * (1.0 / math.sqrt(2.0))))


def _pick_group_tile(G, Cg):
    """Smallest group count whose lane width is a multiple of 128, else all."""
    for gt in range(1, G + 1):
        if G % gt == 0 and (gt * Cg) % 128 == 0:
            return gt
    return G


def _pos_conv_kernel(x_cur_ref, x_halo_ref, w_ref, b_ref, o_ref,
                     acc_ref, xwin_ref, *,
                     Gt, Cg, Kt, nKt, Tm, Th, precision):
    # x_cur_ref:  (1, Tm, Gt*Cg)        current time tile, band of Gt groups
    # x_halo_ref: (1, Th, Gt*Cg)        K-1-row halo from the next tile
    # w_ref:      (1, Gt, Kp*Cg, Cg)    resident im2col weights for this band
    # b_ref:      (1, 1, Gt*Cg)         bias band (f32)
    # o_ref:      (1, Tm, Gt*Cg)        output tile (lane-dense store)
    # acc_ref:    (Tm, Gt*Cg) f32       accumulator scratch
    # xwin_ref:   (Tm+Th, Gt*Cg)        contiguous tile + halo window

    # Stage the tile plus its halo once so every tap is a static
    # sublane-shifted slice of one contiguous window.
    xwin_ref[0:Tm, :] = x_cur_ref[0]
    xwin_ref[Tm:Tm + Th, :] = x_halo_ref[0]

    for gi in range(Gt):                         # static unroll over groups
        lo = gi * Cg
        for jt in range(nKt):                    # static unroll over tap tiles
            base = jt * Kt
            # im2col: Kt shifted copies of this group's (Tm, Cg) band,
            # concatenated along lanes -> contraction dim Kt*Cg for one
            # MXU pass.
            lhs = jnp.concatenate(
                [xwin_ref[base + j: base + j + Tm, lo:lo + Cg]
                 for j in range(Kt)], axis=-1)                     # (Tm, Kt*Cg)
            rhs = w_ref[0, gi, base * Cg:(base + Kt) * Cg, :]      # (Kt*Cg, Cg)
            part = jnp.dot(lhs, rhs,
                           preferred_element_type=jnp.float32,
                           precision=precision)
            # Accumulate through VMEM per tap tile (no long register chain).
            if jt == 0:
                acc_ref[:, lo:lo + Cg] = part
            else:
                acc_ref[:, lo:lo + Cg] += part

    # Fused bias + exact GELU, single lane-dense store.
    y = acc_ref[...] + b_ref[0]                  # (Tm, Gt*Cg) f32
    o_ref[0] = _gelu_exact(y).astype(o_ref.dtype)


def positional_conv_embedding(hidden_states, weight_v, weight_g, bias, *,
                              num_conv_pos_embeddings, groups,
                              time_tile=None, tap_tile=None, group_tile=None,
                              compute_dtype=None, vmem_limit_bytes=None):
    """hidden_states: (B, T, H).  Returns (B, T, H).

    weight_v: (H, H//groups, K), weight_g: (1, 1, K)  (torch weight_norm, dim=2)
    bias: (H,)
    """
    B, T, H = hidden_states.shape
    K = int(num_conv_pos_embeddings)
    G = int(groups)
    assert H % G == 0, (H, G)
    Cg = H // G
    pad = K // 2

    if compute_dtype is None:
        # bf16 MXU path by default for f32 inputs; accumulation stays f32.
        compute_dtype = (jnp.bfloat16 if hidden_states.dtype == jnp.float32
                         else hidden_states.dtype)
    compute_dtype = jnp.dtype(compute_dtype)
    mxu_precision = (lax.Precision.HIGHEST if compute_dtype == jnp.float32
                     else lax.Precision.DEFAULT)

    # ---- tap tiling: aim for a contraction dim Kt*Cg of ~512
    if tap_tile is None:
        Kt = min(K, max(1, -(-512 // Cg)))
    else:
        Kt = max(1, min(int(tap_tile), K))
    nKt = -(-K // Kt)
    Kp = nKt * Kt                                     # zero taps contribute 0

    # ---- group banding: lane-dense blocks (multiple of 128 lanes, or full H)
    if group_tile is None:
        Gt = _pick_group_tile(G, Cg)
    else:
        Gt = int(group_tile)
        assert G % Gt == 0, (G, Gt)
    Gb = G // Gt
    band = Gt * Cg

    # ---- time tiling: halo of Th rows, Th | Tm so the halo block index is exact
    Th = max(8, _round_up(Kp - 1, 8))
    if time_tile is None:
        time_tile = 1024
    Tm = _round_up(min(int(time_tile), max(T, 1)), Th)
    nT = -(-T // Tm)

    # Zero-pad time: 'same' left pad + enough on the right for the last halo.
    L = nT * Tm + Th
    x = hidden_states.astype(compute_dtype)
    xpad = jnp.pad(x, ((0, 0), (pad, L - T - pad), (0, 0)))        # (B, L, H)

    # ---- weight_norm (dim=2) in f32, then im2col-ready grouped layout
    # wg[g, k*Cg + ci, co] = w[g*Cg + co, ci, k]
    wv = weight_v.astype(jnp.float32)                               # (H, Cg, K)
    # NOTE: no eps, matching torch weight_norm (all-zero tap -> NaN there too).
    norm = jnp.sqrt(jnp.sum(wv * wv, axis=(0, 1), keepdims=True))   # (1, 1, K)
    w = weight_g.astype(jnp.float32) * wv / norm                    # (H, Cg, K)
    wg = jnp.transpose(w.reshape(G, Cg, Cg, K), (0, 3, 2, 1))       # (G,K,ci,co)
    if Kp != K:
        wg = jnp.pad(wg, ((0, 0), (0, Kp - K), (0, 0), (0, 0)))
    wg = wg.reshape(Gb, Gt, Kp * Cg, Cg).astype(compute_dtype)

    b3 = bias.astype(jnp.float32).reshape(Gb, 1, band)

    ratio = Tm // Th                                                # Th | Tm
    kernel = functools.partial(_pos_conv_kernel, Gt=Gt, Cg=Cg, Kt=Kt, nKt=nKt,
                               Tm=Tm, Th=Th, precision=mxu_precision)

    itemsize_c = compute_dtype.itemsize
    itemsize_o = jnp.dtype(hidden_states.dtype).itemsize

    if vmem_limit_bytes is None:
        est = (2 * (Tm * band * itemsize_c          # x_cur (double-buffered)
                    + Th * band * itemsize_c        # halo
                    + Gt * Kp * Cg * Cg * itemsize_c  # weights
                    + band * 4                      # bias
                    + Tm * band * itemsize_o)       # output
               + Tm * band * 4                      # f32 accumulator scratch
               + (Tm + Th) * band * itemsize_c)     # window scratch
        vmem_limit_bytes = int(min(64 << 20,
                                   max(32 << 20, int(1.25 * est) + (1 << 20))))

    cost = pl.CostEstimate(
        flops=int(2 * B * nT * Tm * H * Kp * Cg),
        transcendentals=int(B * nT * Tm * H),
        bytes_accessed=int(B * L * H * itemsize_c * (1.0 + Th / Tm)
                           + wg.size * itemsize_c
                           + b3.size * 4
                           + B * nT * Tm * H * itemsize_o))

    out = pl.pallas_call(
        kernel,
        out_shape=jax.ShapeDtypeStruct((B, nT * Tm, H), hidden_states.dtype),
        grid_spec=pltpu.PrefetchScalarGridSpec(
            num_scalar_prefetch=0,
            grid=(Gb, B, nT),                       # group band outermost ->
            in_specs=[                              # weights DMA'd once per band
                pl.BlockSpec((1, Tm, band), lambda g, b, t: (b, t, g)),
                pl.BlockSpec((1, Th, band),
                             lambda g, b, t: (b, (t + 1) * ratio, g)),
                pl.BlockSpec((1, Gt, Kp * Cg, Cg), lambda g, b, t: (g, 0, 0, 0)),
                pl.BlockSpec((1, 1, band), lambda g, b, t: (g, 0, 0)),
            ],
            out_specs=pl.BlockSpec((1, Tm, band), lambda g, b, t: (b, t, g)),
            scratch_shapes=[
                pltpu.VMEM((Tm, band), jnp.float32),        # f32 accumulator
                pltpu.VMEM((Tm + Th, band), compute_dtype),  # tile + halo window
            ],
        ),
        compiler_params=pltpu.CompilerParams(
            dimension_semantics=("parallel", "parallel", "arbitrary"),
            vmem_limit_bytes=vmem_limit_bytes),
        cost_estimate=cost,
    )(xpad, xpad, wg, b3)

    return out[:, :T, :]                            # (B, T, H); no transposes


def _reference_forward(hidden_states, weight_v, weight_g, bias, K, groups):
    """Pure-JAX mirror of the PyTorch forward (NCW conv) for verification."""
    norm = jnp.sqrt(jnp.sum(weight_v * weight_v, axis=(0, 1), keepdims=True))
    w = weight_g * weight_v / norm                       # (H_out, H_in/G, K)
    x = jnp.transpose(hidden_states, (0, 2, 1))          # (B, H, T)  == NCW
    y = lax.conv_general_dilated(
        x, w, window_strides=(1,), padding=[(K // 2, K // 2)],
        feature_group_count=groups,
        dimension_numbers=("NCH", "OIH", "NCH"))
    y = y + bias[None, :, None]
    if K % 2 == 0:                                       # SamePadLayer
        y = y[:, :, :-1]
    y = 0.5 * y * (1.0 + lax.erf(y / jnp.sqrt(2.0)))     # exact GELU
    return jnp.transpose(y, (0, 2, 1))                   # back to (B, T, H)


if __name__ == "__main__":
    def run_case(key, B, T, H, K, G, compute_dtype, tol, time_tile, tap_tile):
        Cg = H // G
        k1, k2, k3, k4 = jax.random.split(key, 4)
        hs = jax.random.normal(k1, (B, T, H), jnp.float32)
        w_v = jax.random.normal(k2, (H, Cg, K), jnp.float32) * 0.1
        w_g = jax.random.uniform(k3, (1, 1, K), jnp.float32, minval=0.5, maxval=1.5)
        b = jax.random.normal(k4, (H,), jnp.float32) * 0.1

        out = positional_conv_embedding(
            hs, w_v, w_g, b,
            num_conv_pos_embeddings=K, groups=G,
            time_tile=time_tile, tap_tile=tap_tile,
            compute_dtype=compute_dtype)
        out = jax.block_until_ready(out)

        ref = _reference_forward(hs, w_v, w_g, b, K, G)
        assert out.shape == (B, T, H), out.shape
        err = float(jnp.max(jnp.abs(out.astype(jnp.float32) - ref)))
        assert err < tol, (err, tol)

    root = jax.random.PRNGKey(0)
    k_a, k_b = jax.random.split(root)

    # even K (SamePad trims one), multiple T tiles + partial last tile,
    # multiple tap tiles, full-H lane block (Gt == G), explicit f32 compute.
    run_case(k_a, B=2, T=19, H=32, K=16, G=4,
             compute_dtype=jnp.float32, tol=1e-3, time_tile=16, tap_tile=8)
    # odd K, Cg = 128 (lane-dense Gt < G band path), default bf16 MXU compute
    # with f32 accumulation, single T tile, defaults for tiles.
    run_case(k_b, B=1, T=24, H=256, K=7, G=2,
             compute_dtype=None, tol=7e-2, time_tile=None, tap_tile=None)

    print("KERNEL_OK")
</pallas_src>

<mosaic_0001>
module attributes {stable_mosaic.version = 11 : i64} {
  func.func @_pos_conv_kernel(%arg0: i32, %arg1: i32, %arg2: i32, %arg3: memref<1x16x32xf32, #tpu.memory_space<vmem>>, %arg4: memref<1x16x32xf32, #tpu.memory_space<vmem>>, %arg5: memref<1x4x128x8xf32, #tpu.memory_space<vmem>>, %arg6: memref<1x1x32xf32, #tpu.memory_space<vmem>>, %arg7: memref<1x16x32xf32, #tpu.memory_space<vmem>>, %arg8: memref<16x32xf32, #tpu.memory_space<vmem>>, %arg9: memref<32x32xf32, #tpu.memory_space<vmem>>) attributes {dimension_semantics = [#tpu.dimension_semantics<parallel>, #tpu.dimension_semantics<parallel>, #tpu.dimension_semantics<arbitrary>], iteration_bounds = array<i64: 1, 2, 2>, scalar_prefetch = 0 : i64, scratch_operands = 2 : i64, tpu.core_type = #tpu.core_type<tc>, window_params = [{transform_indices = @transform_0, window_bounds = array<i64: 1, 16, 32>}, {transform_indices = @transform_1, window_bounds = array<i64: 1, 16, 32>}, {transform_indices = @transform_2, window_bounds = array<i64: 1, 4, 128, 8>}, {transform_indices = @transform_3, window_bounds = array<i64: 1, 1, 32>}, {transform_indices = @transform_4, window_bounds = array<i64: 1, 16, 32>}]} {
    %c0 = arith.constant 0 : index
    %c0_0 = arith.constant 0 : index
    %c0_1 = arith.constant 0 : index
    %0 = vector.load %arg3[%c0, %c0_0, %c0_1] : memref<1x16x32xf32, #tpu.memory_space<vmem>>, vector<1x16x32xf32>
    %1 = vector.shape_cast %0 : vector<1x16x32xf32> to vector<16x32xf32>
    %c0_2 = arith.constant 0 : index
    %c0_3 = arith.constant 0 : index
    %2 = vector.load %arg9[%c0_2, %c0_3] : memref<32x32xf32, #tpu.memory_space<vmem>>, vector<16x32xf32>
    tpu.vector_store %arg9[%c0_2, %c0_3], %1 {strides = array<i32>} : memref<32x32xf32, #tpu.memory_space<vmem>>, vector<16x32xf32>,
    %c0_4 = arith.constant 0 : index
    %c0_5 = arith.constant 0 : index
    %c0_6 = arith.constant 0 : index
    %3 = vector.load %arg4[%c0_4, %c0_5, %c0_6] : memref<1x16x32xf32, #tpu.memory_space<vmem>>, vector<1x16x32xf32>
    %4 = vector.shape_cast %3 : vector<1x16x32xf32> to vector<16x32xf32>
    %c16 = arith.constant 16 : index
    %c0_7 = arith.constant 0 : index
    %5 = vector.load %arg9[%c16, %c0_7] : memref<32x32xf32, #tpu.memory_space<vmem>>, vector<16x32xf32>
    tpu.vector_store %arg9[%c16, %c0_7], %4 {strides = array<i32>} : memref<32x32xf32, #tpu.memory_space<vmem>>, vector<16x32xf32>,
    %c0_8 = arith.constant 0 : index
    %c0_9 = arith.constant 0 : index
    %6 = vector.load %arg9[%c0_8, %c0_9] : memref<32x32xf32, #tpu.memory_space<vmem>>, vector<16x8xf32>
    %c1 = arith.constant 1 : index
    %c0_10 = arith.constant 0 : index
    %7 = vector.load %arg9[%c1, %c0_10] : memref<32x32xf32, #tpu.memory_space<vmem>>, vector<16x8xf32>
    %c2 = arith.constant 2 : index
    %c0_11 = arith.constant 0 : index
    %8 = vector.load %arg9[%c2, %c0_11] : memref<32x32xf32, #tpu.memory_space<vmem>>, vector<16x8xf32>
    %c3 = arith.constant 3 : index
    %c0_12 = arith.constant 0 : index
    %9 = vector.load %arg9[%c3, %c0_12] : memref<32x32xf32, #tpu.memory_space<vmem>>, vector<16x8xf32>
    %c4 = arith.constant 4 : index
    %c0_13 = arith.constant 0 : index
    %10 = vector.load %arg9[%c4, %c0_13] : memref<32x32xf32, #tpu.memory_space<vmem>>, vector<16x8xf32>
    %c5 = arith.constant 5 : index
    %c0_14 = arith.constant 0 : index
    %11 = vector.load %arg9[%c5, %c0_14] : memref<32x32xf32, #tpu.memory_space<vmem>>, vector<16x8xf32>
    %c6 = arith.constant 6 : index
    %c0_15 = arith.constant 0 : index
    %12 = vector.load %arg9[%c6, %c0_15] : memref<32x32xf32, #tpu.memory_space<vmem>>, vector<16x8xf32>
    %c7 = arith.constant 7 : index
    %c0_16 = arith.constant 0 : index
    %13 = vector.load %arg9[%c7, %c0_16] : memref<32x32xf32, #tpu.memory_space<vmem>>, vector<16x8xf32>
    %14 = tpu.concatenate %6, %7, %8, %9, %10, %11, %12, %13 in 1 : vector<16x8xf32>, vector<16x8xf32>, vector<16x8xf32>, vector<16x8xf32>, vector<16x8xf32>, vector<16x8xf32>, vector<16x8xf32>, vector<16x8xf32> -> vector<16x64xf32>
    %c0_17 = arith.constant 0 : index
    %c0_18 = arith.constant 0 : index
    %c0_19 = arith.constant 0 : index
    %c0_20 = arith.constant 0 : index
    %15 = vector.load %arg5[%c0_17, %c0_18, %c0_19, %c0_20] : memref<1x4x128x8xf32, #tpu.memory_space<vmem>>, vector<1x1x64x8xf32>
    %16 = vector.shape_cast %15 : vector<1x1x64x8xf32> to vector<64x8xf32>
    %cst = arith.constant dense<0.000000e+00> : vector<16x8xf32>
    %17 = tpu.matmul %14, %16, %cst {dimension_numbers = #tpu.dot_dimension_numbers<[1], [0], [0], [1], [0, 0, 1, 1], [], []>, precision = #tpu.contract_precision<fp32>} : vector<16x64xf32>, vector<64x8xf32>, vector<16x8xf32> -> vector<16x8xf32>
    %c0_21 = arith.constant 0 : index
    %c0_22 = arith.constant 0 : index
    %18 = vector.load %arg8[%c0_21, %c0_22] : memref<16x32xf32, #tpu.memory_space<vmem>>, vector<16x8xf32>
    tpu.vector_store %arg8[%c0_21, %c0_22], %17 {strides = array<i32>} : memref<16x32xf32, #tpu.memory_space<vmem>>, vector<16x8xf32>,
    %c8 = arith.constant 8 : index
    %c0_23 = arith.constant 0 : index
    %19 = vector.load %arg9[%c8, %c0_23] : memref<32x32xf32, #tpu.memory_space<vmem>>, vector<16x8xf32>
    %c9 = arith.constant 9 : index
    %c0_24 = arith.constant 0 : index
    %20 = vector.load %arg9[%c9, %c0_24] : memref<32x32xf32, #tpu.memory_space<vmem>>, vector<16x8xf32>
    %c10 = arith.constant 10 : index
    %c0_25 = arith.constant 0 : index
    %21 = vector.load %arg9[%c10, %c0_25] : memref<32x32xf32, #tpu.memory_space<vmem>>, vector<16x8xf32>
    %c11 = arith.constant 11 : index
    %c0_26 = arith.constant 0 : index
    %22 = vector.load %arg9[%c11, %c0_26] : memref<32x32xf32, #tpu.memory_space<vmem>>, vector<16x8xf32>
    %c12 = arith.constant 12 : index
    %c0_27 = arith.constant 0 : index
    %23 = vector.load %arg9[%c12, %c0_27] : memref<32x32xf32, #tpu.memory_space<vmem>>, vector<16x8xf32>
    %c13 = arith.constant 13 : index
    %c0_28 = arith.constant 0 : index
    %24 = vector.load %arg9[%c13, %c0_28] : memref<32x32xf32, #tpu.memory_space<vmem>>, vector<16x8xf32>
    %c14 = arith.constant 14 : index
    %c0_29 = arith.constant 0 : index
    %25 = vector.load %arg9[%c14, %c0_29] : memref<32x32xf32, #tpu.memory_space<vmem>>, vector<16x8xf32>
    %c15 = arith.constant 15 : index
    %c0_30 = arith.constant 0 : index
    %26 = vector.load %arg9[%c15, %c0_30] : memref<32x32xf32, #tpu.memory_space<vmem>>, vector<16x8xf32>
    %27 = tpu.concatenate %19, %20, %21, %22, %23, %24, %25, %26 in 1 : vector<16x8xf32>, vector<16x8xf32>, vector<16x8xf32>, vector<16x8xf32>, vector<16x8xf32>, vector<16x8xf32>, vector<16x8xf32>, vector<16x8xf32> -> vector<16x64xf32>
    %c0_31 = arith.constant 0 : index
    %c0_32 = arith.constant 0 : index
    %c64 = arith.constant 64 : index
    %c0_33 = arith.constant 0 : index
    %28 = vector.load %arg5[%c0_31, %c0_32, %c64, %c0_33] : memref<1x4x128x8xf32, #tpu.memory_space<vmem>>, vector<1x1x64x8xf32>
    %29 = vector.shape_cast %28 : vector<1x1x64x8xf32> to vector<64x8xf32>
    %cst_34 = arith.constant dense<0.000000e+00> : vector<16x8xf32>
    %30 = tpu.matmul %27, %29, %cst_34 {dimension_numbers = #tpu.dot_dimension_numbers<[1], [0], [0], [1], [0, 0, 1, 1], [], []>, precision = #tpu.contract_precision<fp32>} : vector<16x64xf32>, vector<64x8xf32>, vector<16x8xf32> -> vector<16x8xf32>
    %c0_35 = arith.constant 0 : index
    %c0_36 = arith.constant 0 : index
    %31 = vector.load %arg8[%c0_35, %c0_36] : memref<16x32xf32, #tpu.memory_space<vmem>>, vector<16x8xf32>
    %32 = arith.addf %31, %30 : vector<16x8xf32>
    %c0_37 = arith.constant 0 : index
    %c0_38 = arith.constant 0 : index
    %33 = vector.load %arg8[%c0_37, %c0_38] : memref<16x32xf32, #tpu.memory_space<vmem>>, vector<16x8xf32>
    tpu.vector_store %arg8[%c0_37, %c0_38], %32 {strides = array<i32>} : memref<16x32xf32, #tpu.memory_space<vmem>>, vector<16x8xf32>,
    %c0_39 = arith.constant 0 : index
    %c8_40 = arith.constant 8 : index
    %34 = vector.load %arg9[%c0_39, %c8_40] : memref<32x32xf32, #tpu.memory_space<vmem>>, vector<16x8xf32>
    %c1_41 = arith.constant 1 : index
    %c8_42 = arith.constant 8 : index
    %35 = vector.load %arg9[%c1_41, %c8_42] : memref<32x32xf32, #tpu.memory_space<vmem>>, vector<16x8xf32>
    %c2_43 = arith.constant 2 : index
    %c8_44 = arith.constant 8 : index
    %36 = vector.load %arg9[%c2_43, %c8_44] : memref<32x32xf32, #tpu.memory_space<vmem>>, vector<16x8xf32>
    %c3_45 = arith.constant 3 : index
    %c8_46 = arith.constant 8 : index
    %37 = vector.load %arg9[%c3_45, %c8_46] : memref<32x32xf32, #tpu.memory_space<vmem>>, vector<16x8xf32>
    %c4_47 = arith.constant 4 : index
    %c8_48 = arith.constant 8 : index
    %38 = vector.load %arg9[%c4_47, %c8_48] : memref<32x32xf32, #tpu.memory_space<vmem>>, vector<16x8xf32>
    %c5_49 = arith.constant 5 : index
    %c8_50 = arith.constant 8 : index
    %39 = vector.load %arg9[%c5_49, %c8_50] : memref<32x32xf32, #tpu.memory_space<vmem>>, vector<16x8xf32>
    %c6_51 = arith.constant 6 : index
    %c8_52 = arith.constant 8 : index
    %40 = vector.load %arg9[%c6_51, %c8_52] : memref<32x32xf32, #tpu.memory_space<vmem>>, vector<16x8xf32>
    %c7_53 = arith.constant 7 : index
    %c8_54 = arith.constant 8 : index
    %41 = vector.load %arg9[%c7_53, %c8_54] : memref<32x32xf32, #tpu.memory_space<vmem>>, vector<16x8xf32>
    %42 = tpu.concatenate %34, %35, %36, %37, %38, %39, %40, %41 in 1 : vector<16x8xf32>, vector<16x8xf32>, vector<16x8xf32>, vector<16x8xf32>, vector<16x8xf32>, vector<16x8xf32>, vector<16x8xf32>, vector<16x8xf32> -> vector<16x64xf32>
    %c0_55 = arith.constant 0 : index
    %c1_56 = arith.constant 1 : index
    %c0_57 = arith.constant 0 : index
    %c0_58 = arith.constant 0 : index
    %43 = vector.load %arg5[%c0_55, %c1_56, %c0_57, %c0_58] : memref<1x4x128x8xf32, #tpu.memory_space<vmem>>, vector<1x1x64x8xf32>
    %44 = vector.shape_cast %43 : vector<1x1x64x8xf32> to vector<64x8xf32>
    %cst_59 = arith.constant dense<0.000000e+00> : vector<16x8xf32>
    %45 = tpu.matmul %42, %44, %cst_59 {dimension_numbers = #tpu.dot_dimension_numbers<[1], [0], [0], [1], [0, 0, 1, 1], [], []>, precision = #tpu.contract_precision<fp32>} : vector<16x64xf32>, vector<64x8xf32>, vector<16x8xf32> -> vector<16x8xf32>
    %c0_60 = arith.constant 0 : index
    %c8_61 = arith.constant 8 : index
    %46 = vector.load %arg8[%c0_60, %c8_61] : memref<16x32xf32, #tpu.memory_space<vmem>>, vector<16x8xf32>
    tpu.vector_store %arg8[%c0_60, %c8_61], %45 {strides = array<i32>} : memref<16x32xf32, #tpu.memory_space<vmem>>, vector<16x8xf32>,
    %c8_62 = arith.constant 8 : index
    %c8_63 = arith.constant 8 : index
    %47 = vector.load %arg9[%c8_62, %c8_63] : memref<32x32xf32, #tpu.memory_space<vmem>>, vector<16x8xf32>
    %c9_64 = arith.constant 9 : index
    %c8_65 = arith.constant 8 : index
    %48 = vector.load %arg9[%c9_64, %c8_65] : memref<32x32xf32, #tpu.memory_space<vmem>>, vector<16x8xf32>
    %c10_66 = arith.constant 10 : index
    %c8_67 = arith.constant 8 : index
    %49 = vector.load %arg9[%c10_66, %c8_67] : memref<32x32xf32, #tpu.memory_space<vmem>>, vector<16x8xf32>
    %c11_68 = arith.constant 11 : index
    %c8_69 = arith.constant 8 : index
    %50 = vector.load %arg9[%c11_68, %c8_69] : memref<32x32xf32, #tpu.memory_space<vmem>>, vector<16x8xf32>
    %c12_70 = arith.constant 12 : index
    %c8_71 = arith.constant 8 : index
    %51 = vector.load %arg9[%c12_70, %c8_71] : memref<32x32xf32, #tpu.memory_space<vmem>>, vector<16x8xf32>
    %c13_72 = arith.constant 13 : index
    %c8_73 = arith.constant 8 : index
    %52 = vector.load %arg9[%c13_72, %c8_73] : memref<32x32xf32, #tpu.memory_space<vmem>>, vector<16x8xf32>
    %c14_74 = arith.constant 14 : index
    %c8_75 = arith.constant 8 : index
    %53 = vector.load %arg9[%c14_74, %c8_75] : memref<32x32xf32, #tpu.memory_space<vmem>>, vector<16x8xf32>
    %c15_76 = arith.constant 15 : index
    %c8_77 = arith.constant 8 : index
    %54 = vector.load %arg9[%c15_76, %c8_77] : memref<32x32xf32, #tpu.memory_space<vmem>>, vector<16x8xf32>
    %55 = tpu.concatenate %47, %48, %49, %50, %51, %52, %53, %54 in 1 : vector<16x8xf32>, vector<16x8xf32>, vector<16x8xf32>, vector<16x8xf32>, vector<16x8xf32>, vector<16x8xf32>, vector<16x8xf32>, vector<16x8xf32> -> vector<16x64xf32>
    %c0_78 = arith.constant 0 : index
    %c1_79 = arith.constant 1 : index
    %c64_80 = arith.constant 64 : index
    %c0_81 = arith.constant 0 : index
    %56 = vector.load %arg5[%c0_78, %c1_79, %c64_80, %c0_81] : memref<1x4x128x8xf32, #tpu.memory_space<vmem>>, vector<1x1x64x8xf32>
    %57 = vector.shape_cast %56 : vector<1x1x64x8xf32> to vector<64x8xf32>
    %cst_82 = arith.constant dense<0.000000e+00> : vector<16x8xf32>
    %58 = tpu.matmul %55, %57, %cst_82 {dimension_numbers = #tpu.dot_dimension_numbers<[1], [0], [0], [1], [0, 0, 1, 1], [], []>, precision = #tpu.contract_precision<fp32>} : vector<16x64xf32>, vector<64x8xf32>, vector<16x8xf32> -> vector<16x8xf32>
    %c0_83 = arith.constant 0 : index
    %c8_84 = arith.constant 8 : index
    %59 = vector.load %arg8[%c0_83, %c8_84] : memref<16x32xf32, #tpu.memory_space<vmem>>, vector<16x8xf32>
    %60 = arith.addf %59, %58 : vector<16x8xf32>
    %c0_85 = arith.constant 0 : index
    %c8_86 = arith.constant 8 : index
    %61 = vector.load %arg8[%c0_85, %c8_86] : memref<16x32xf32, #tpu.memory_space<vmem>>, vector<16x8xf32>
    tpu.vector_store %arg8[%c0_85, %c8_86], %60 {strides = array<i32>} : memref<16x32xf32, #tpu.memory_space<vmem>>, vector<16x8xf32>,
    %c0_87 = arith.constant 0 : index
    %c16_88 = arith.constant 16 : index
    %62 = vector.load %arg9[%c0_87, %c16_88] : memref<32x32xf32, #tpu.memory_space<vmem>>, vector<16x8xf32>
    %c1_89 = arith.constant 1 : index
    %c16_90 = arith.constant 16 : index
    %63 = vector.load %arg9[%c1_89, %c16_90] : memref<32x32xf32, #tpu.memory_space<vmem>>, vector<16x8xf32>
    %c2_91 = arith.constant 2 : index
    %c16_92 = arith.constant 16 : index
    %64 = vector.load %arg9[%c2_91, %c16_92] : memref<32x32xf32, #tpu.memory_space<vmem>>, vector<16x8xf32>
    %c3_93 = arith.constant 3 : index
    %c16_94 = arith.constant 16 : index
    %65 = vector.load %arg9[%c3_93, %c16_94] : memref<32x32xf32, #tpu.memory_space<vmem>>, vector<16x8xf32>
    %c4_95 = arith.constant 4 : index
    %c16_96 = arith.constant 16 : index
    %66 = vector.load %arg9[%c4_95, %c16_96] : memref<32x32xf32, #tpu.memory_space<vmem>>, vector<16x8xf32>
    %c5_97 = arith.constant 5 : index
    %c16_98 = arith.constant 16 : index
    %67 = vector.load %arg9[%c5_97, %c16_98] : memref<32x32xf32, #tpu.memory_space<vmem>>, vector<16x8xf32>
    %c6_99 = arith.constant 6 : index
    %c16_100 = arith.constant 16 : index
    %68 = vector.load %arg9[%c6_99, %c16_100] : memref<32x32xf32, #tpu.memory_space<vmem>>, vector<16x8xf32>
    %c7_101 = arith.constant 7 : index
    %c16_102 = arith.constant 16 : index
    %69 = vector.load %arg9[%c7_101, %c16_102] : memref<32x32xf32, #tpu.memory_space<vmem>>, vector<16x8xf32>
    %70 = tpu.concatenate %62, %63, %64, %65, %66, %67, %68, %69 in 1 : vector<16x8xf32>, vector<16x8xf32>, vector<16x8xf32>, vector<16x8xf32>, vector<16x8xf32>, vector<16x8xf32>, vector<16x8xf32>, vector<16x8xf32> -> vector<16x64xf32>
    %c0_103 = arith.constant 0 : index
    %c2_104 = arith.constant 2 : index
    %c0_105 = arith.constant 0 : index
    %c0_106 = arith.constant 0 : index
    %71 = vector.load %arg5[%c0_103, %c2_104, %c0_105, %c0_106] : memref<1x4x128x8xf32, #tpu.memory_space<vmem>>, vector<1x1x64x8xf32>
    %72 = vector.shape_cast %71 : vector<1x1x64x8xf32> to vector<64x8xf32>
    %cst_107 = arith.constant dense<0.000000e+00> : vector<16x8xf32>
    %73 = tpu.matmul %70, %72, %cst_107 {dimension_numbers = #tpu.dot_dimension_numbers<[1], [0], [0], [1], [0, 0, 1, 1], [], []>, precision = #tpu.contract_precision<fp32>} : vector<16x64xf32>, vector<64x8xf32>, vector<16x8xf32> -> vector<16x8xf32>
    %c0_108 = arith.constant 0 : index
    %c16_109 = arith.constant 16 : index
    %74 = vector.load %arg8[%c0_108, %c16_109] : memref<16x32xf32, #tpu.memory_space<vmem>>, vector<16x8xf32>
    tpu.vector_store %arg8[%c0_108, %c16_109], %73 {strides = array<i32>} : memref<16x32xf32, #tpu.memory_space<vmem>>, vector<16x8xf32>,
    %c8_110 = arith.constant 8 : index
    %c16_111 = arith.constant 16 : index
    %75 = vector.load %arg9[%c8_110, %c16_111] : memref<32x32xf32, #tpu.memory_space<vmem>>, vector<16x8xf32>
    %c9_112 = arith.constant 9 : index
    %c16_113 = arith.constant 16 : index
    %76 = vector.load %arg9[%c9_112, %c16_113] : memref<32x32xf32, #tpu.memory_space<vmem>>, vector<16x8xf32>
    %c10_114 = arith.constant 10 : index
    %c16_115 = arith.constant 16 : index
    %77 = vector.load %arg9[%c10_114, %c16_115] : memref<32x32xf32, #tpu.memory_space<vmem>>, vector<16x8xf32>
    %c11_116 = arith.constant 11 : index
    %c16_117 = arith.constant 16 : index
    %78 = vector.load %arg9[%c11_116, %c16_117] : memref<32x32xf32, #tpu.memory_space<vmem>>, vector<16x8xf32>
    %c12_118 = arith.constant 12 : index
    %c16_119 = arith.constant 16 : index
    %79 = vector.load %arg9[%c12_118, %c16_119] : memref<32x32xf32, #tpu.memory_space<vmem>>, vector<16x8xf32>
    %c13_120 = arith.constant 13 : index
    %c16_121 = arith.constant 16 : index
    %80 = vector.load %arg9[%c13_120, %c16_121] : memref<32x32xf32, #tpu.memory_space<vmem>>, vector<16x8xf32>
    %c14_122 = arith.constant 14 : index
    %c16_123 = arith.constant 16 : index
    %81 = vector.load %arg9[%c14_122, %c16_123] : memref<32x32xf32, #tpu.memory_space<vmem>>, vector<16x8xf32>
    %c15_124 = arith.constant 15 : index
    %c16_125 = arith.constant 16 : index
    %82 = vector.load %arg9[%c15_124, %c16_125] : memref<32x32xf32, #tpu.memory_space<vmem>>, vector<16x8xf32>
    %83 = tpu.concatenate %75, %76, %77, %78, %79, %80, %81, %82 in 1 : vector<16x8xf32>, vector<16x8xf32>, vector<16x8xf32>, vector<16x8xf32>, vector<16x8xf32>, vector<16x8xf32>, vector<16x8xf32>, vector<16x8xf32> -> vector<16x64xf32>
    %c0_126 = arith.constant 0 : index
    %c2_127 = arith.constant 2 : index
    %c64_128 = arith.constant 64 : index
    %c0_129 = arith.constant 0 : index
    %84 = vector.load %arg5[%c0_126, %c2_127, %c64_128, %c0_129] : memref<1x4x128x8xf32, #tpu.memory_space<vmem>>, vector<1x1x64x8xf32>
    %85 = vector.shape_cast %84 : vector<1x1x64x8xf32> to vector<64x8xf32>
    %cst_130 = arith.constant dense<0.000000e+00> : vector<16x8xf32>
    %86 = tpu.matmul %83, %85, %cst_130 {dimension_numbers = #tpu.dot_dimension_numbers<[1], [0], [0], [1], [0, 0, 1, 1], [], []>, precision = #tpu.contract_precision<fp32>} : vector<16x64xf32>, vector<64x8xf32>, vector<16x8xf32> -> vector<16x8xf32>
    %c0_131 = arith.constant 0 : index
    %c16_132 = arith.constant 16 : index
    %87 = vector.load %arg8[%c0_131, %c16_132] : memref<16x32xf32, #tpu.memory_space<vmem>>, vector<16x8xf32>
    %88 = arith.addf %87, %86 : vector<16x8xf32>
    %c0_133 = arith.constant 0 : index
    %c16_134 = arith.constant 16 : index
    %89 = vector.load %arg8[%c0_133, %c16_134] : memref<16x32xf32, #tpu.memory_space<vmem>>, vector<16x8xf32>
    tpu.vector_store %arg8[%c0_133, %c16_134], %88 {strides = array<i32>} : memref<16x32xf32, #tpu.memory_space<vmem>>, vector<16x8xf32>,
    %c0_135 = arith.constant 0 : index
    %c24 = arith.constant 24 : index
    %90 = vector.load %arg9[%c0_135, %c24] : memref<32x32xf32, #tpu.memory_space<vmem>>, vector<16x8xf32>
    %c1_136 = arith.constant 1 : index
    %c24_137 = arith.constant 24 : index
    %91 = vector.load %arg9[%c1_136, %c24_137] : memref<32x32xf32, #tpu.memory_space<vmem>>, vector<16x8xf32>
    %c2_138 = arith.constant 2 : index
    %c24_139 = arith.constant 24 : index
    %92 = vector.load %arg9[%c2_138, %c24_139] : memref<32x32xf32, #tpu.memory_space<vmem>>, vector<16x8xf32>
    %c3_140 = arith.constant 3 : index
    %c24_141 = arith.constant 24 : index
    %93 = vector.load %arg9[%c3_140, %c24_141] : memref<32x32xf32, #tpu.memory_space<vmem>>, vector<16x8xf32>
    %c4_142 = arith.constant 4 : index
    %c24_143 = arith.constant 24 : index
    %94 = vector.load %arg9[%c4_142, %c24_143] : memref<32x32xf32, #tpu.memory_space<vmem>>, vector<16x8xf32>
    %c5_144 = arith.constant 5 : index
    %c24_145 = arith.constant 24 : index
    %95 = vector.load %arg9[%c5_144, %c24_145] : memref<32x32xf32, #tpu.memory_space<vmem>>, vector<16x8xf32>
    %c6_146 = arith.constant 6 : index
    %c24_147 = arith.constant 24 : index
    %96 = vector.load %arg9[%c6_146, %c24_147] : memref<32x32xf32, #tpu.memory_space<vmem>>, vector<16x8xf32>
    %c7_148 = arith.constant 7 : index
    %c24_149 = arith.constant 24 : index
    %97 = vector.load %arg9[%c7_148, %c24_149] : memref<32x32xf32, #tpu.memory_space<vmem>>, vector<16x8xf32>
    %98 = tpu.concatenate %90, %91, %92, %93, %94, %95, %96, %97 in 1 : vector<16x8xf32>, vector<16x8xf32>, vector<16x8xf32>, vector<16x8xf32>, vector<16x8xf32>, vector<16x8xf32>, vector<16x8xf32>, vector<16x8xf32> -> vector<16x64xf32>
    %c0_150 = arith.constant 0 : index
    %c3_151 = arith.constant 3 : index
    %c0_152 = arith.constant 0 : index
    %c0_153 = arith.constant 0 : index
    %99 = vector.load %arg5[%c0_150, %c3_151, %c0_152, %c0_153] : memref<1x4x128x8xf32, #tpu.memory_space<vmem>>, vector<1x1x64x8xf32>
    %100 = vector.shape_cast %99 : vector<1x1x64x8xf32> to vector<64x8xf32>
    %cst_154 = arith.constant dense<0.000000e+00> : vector<16x8xf32>
    %101 = tpu.matmul %98, %100, %cst_154 {dimension_numbers = #tpu.dot_dimension_numbers<[1], [0], [0], [1], [0, 0, 1, 1], [], []>, precision = #tpu.contract_precision<fp32>} : vector<16x64xf32>, vector<64x8xf32>, vector<16x8xf32> -> vector<16x8xf32>
    %c0_155 = arith.constant 0 : index
    %c24_156 = arith.constant 24 : index
    %102 = vector.load %arg8[%c0_155, %c24_156] : memref<16x32xf32, #tpu.memory_space<vmem>>, vector<16x8xf32>
    tpu.vector_store %arg8[%c0_155, %c24_156], %101 {strides = array<i32>} : memref<16x32xf32, #tpu.memory_space<vmem>>, vector<16x8xf32>,
    %c8_157 = arith.constant 8 : index
    %c24_158 = arith.constant 24 : index
    %103 = vector.load %arg9[%c8_157, %c24_158] : memref<32x32xf32, #tpu.memory_space<vmem>>, vector<16x8xf32>
    %c9_159 = arith.constant 9 : index
    %c24_160 = arith.constant 24 : index
    %104 = vector.load %arg9[%c9_159, %c24_160] : memref<32x32xf32, #tpu.memory_space<vmem>>, vector<16x8xf32>
    %c10_161 = arith.constant 10 : index
    %c24_162 = arith.constant 24 : index
    %105 = vector.load %arg9[%c10_161, %c24_162] : memref<32x32xf32, #tpu.memory_space<vmem>>, vector<16x8xf32>
    %c11_163 = arith.constant 11 : index
    %c24_164 = arith.constant 24 : index
    %106 = vector.load %arg9[%c11_163, %c24_164] : memref<32x32xf32, #tpu.memory_space<vmem>>, vector<16x8xf32>
    %c12_165 = arith.constant 12 : index
    %c24_166 = arith.constant 24 : index
    %107 = vector.load %arg9[%c12_165, %c24_166] : memref<32x32xf32, #tpu.memory_space<vmem>>, vector<16x8xf32>
    %c13_167 = arith.constant 13 : index
    %c24_168 = arith.constant 24 : index
    %108 = vector.load %arg9[%c13_167, %c24_168] : memref<32x32xf32, #tpu.memory_space<vmem>>, vector<16x8xf32>
    %c14_169 = arith.constant 14 : index
    %c24_170 = arith.constant 24 : index
    %109 = vector.load %arg9[%c14_169, %c24_170] : memref<32x32xf32, #tpu.memory_space<vmem>>, vector<16x8xf32>
    %c15_171 = arith.constant 15 : index
    %c24_172 = arith.constant 24 : index
    %110 = vector.load %arg9[%c15_171, %c24_172] : memref<32x32xf32, #tpu.memory_space<vmem>>, vector<16x8xf32>
    %111 = tpu.concatenate %103, %104, %105, %106, %107, %108, %109, %110 in 1 : vector<16x8xf32>, vector<16x8xf32>, vector<16x8xf32>, vector<16x8xf32>, vector<16x8xf32>, vector<16x8xf32>, vector<16x8xf32>, vector<16x8xf32> -> vector<16x64xf32>
    %c0_173 = arith.constant 0 : index
    %c3_174 = arith.constant 3 : index
    %c64_175 = arith.constant 64 : index
    %c0_176 = arith.constant 0 : index
    %112 = vector.load %arg5[%c0_173, %c3_174, %c64_175, %c0_176] : memref<1x4x128x8xf32, #tpu.memory_space<vmem>>, vector<1x1x64x8xf32>
    %113 = vector.shape_cast %112 : vector<1x1x64x8xf32> to vector<64x8xf32>
    %cst_177 = arith.constant dense<0.000000e+00> : vector<16x8xf32>
    %114 = tpu.matmul %111, %113, %cst_177 {dimension_numbers = #tpu.dot_dimension_numbers<[1], [0], [0], [1], [0, 0, 1, 1], [], []>, precision = #tpu.contract_precision<fp32>} : vector<16x64xf32>, vector<64x8xf32>, vector<16x8xf32> -> vector<16x8xf32>
    %c0_178 = arith.constant 0 : index
    %c24_179 = arith.constant 24 : index
    %115 = vector.load %arg8[%c0_178, %c24_179] : memref<16x32xf32, #tpu.memory_space<vmem>>, vector<16x8xf32>
    %116 = arith.addf %115, %114 : vector<16x8xf32>
    %c0_180 = arith.constant 0 : index
    %c24_181 = arith.constant 24 : index
    %117 = vector.load %arg8[%c0_180, %c24_181] : memref<16x32xf32, #tpu.memory_space<vmem>>, vector<16x8xf32>
    tpu.vector_store %arg8[%c0_180, %c24_181], %116 {strides = array<i32>} : memref<16x32xf32, #tpu.memory_space<vmem>>, vector<16x8xf32>,
    %c0_182 = arith.constant 0 : index
    %c0_183 = arith.constant 0 : index
    %118 = vector.load %arg8[%c0_182, %c0_183] : memref<16x32xf32, #tpu.memory_space<vmem>>, vector<16x32xf32>
    %c0_184 = arith.constant 0 : index
    %c0_185 = arith.constant 0 : index
    %c0_186 = arith.constant 0 : index
    %119 = vector.load %arg6[%c0_184, %c0_185, %c0_186] : memref<1x1x32xf32, #tpu.memory_space<vmem>>, vector<1x1x32xf32>
    %120 = vector.shape_cast %119 : vector<1x1x32xf32> to vector<1x32xf32>
    %121 = vector.broadcast %120 : vector<1x32xf32> to vector<16x32xf32>
    %122 = arith.addf %118, %121 : vector<16x32xf32>
    %cst_187 = arith.constant 5.000000e-01 : f32
    %123 = vector.broadcast %cst_187 : f32 to vector<16x32xf32>
    %124 = arith.mulf %123, %122 : vector<16x32xf32>
    %cst_188 = arith.constant 0.707106769 : f32
    %125 = vector.broadcast %cst_188 : f32 to vector<16x32xf32>
    %126 = arith.mulf %122, %125 : vector<16x32xf32>
    %127 = math.erf %126 : vector<16x32xf32>
    %cst_189 = arith.constant 1.000000e+00 : f32
    %128 = vector.broadcast %cst_189 : f32 to vector<16x32xf32>
    %129 = arith.addf %128, %127 : vector<16x32xf32>
    %130 = arith.mulf %124, %129 : vector<16x32xf32>
    %c0_190 = arith.constant 0 : index
    %c0_191 = arith.constant 0 : index
    %c0_192 = arith.constant 0 : index
    %131 = vector.load %arg7[%c0_190, %c0_191, %c0_192] : memref<1x16x32xf32, #tpu.memory_space<vmem>>, vector<1x16x32xf32>
    %132 = vector.shape_cast %131 : vector<1x16x32xf32> to vector<16x32xf32>
    %133 = vector.shape_cast %130 : vector<16x32xf32> to vector<1x16x32xf32>
    tpu.vector_store %arg7[%c0_190, %c0_191, %c0_192], %133 {strides = array<i32>} : memref<1x16x32xf32, #tpu.memory_space<vmem>>, vector<1x16x32xf32>,
    return
  }
  func.func @transform_0(%arg0: i32, %arg1: i32, %arg2: i32) -> (i32, i32, i32) {
    %c0_i32 = arith.constant 0 : i32
    return %arg1, %arg2, %arg0 : i32, i32, i32
  }
  func.func @transform_1(%arg0: i32, %arg1: i32, %arg2: i32) -> (i32, i32, i32) {
    %c1_i32 = arith.constant 1 : i32
    %0 = arith.addi %arg2, %c1_i32 : i32
    %c1_i32_0 = arith.constant 1 : i32
    %1 = arith.muli %0, %c1_i32_0 : i32
    %c0_i32 = arith.constant 0 : i32
    return %arg1, %1, %arg0 : i32, i32, i32
  }
  func.func @transform_2(%arg0: i32, %arg1: i32, %arg2: i32) -> (i32, i32, i32, i32) {
    %c0_i32 = arith.constant 0 : i32
    %c0_i32_0 = arith.constant 0 : i32
    %c0_i32_1 = arith.constant 0 : i32
    %c0_i32_2 = arith.constant 0 : i32
    return %arg0, %c0_i32, %c0_i32_0, %c0_i32_1 : i32, i32, i32, i32
  }
  func.func @transform_3(%arg0: i32, %arg1: i32, %arg2: i32) -> (i32, i32, i32) {
    %c0_i32 = arith.constant 0 : i32
    %c0_i32_0 = arith.constant 0 : i32
    %c0_i32_1 = arith.constant 0 : i32
    return %arg0, %c0_i32, %c0_i32_0 : i32, i32, i32
  }
  func.func @transform_4(%arg0: i32, %arg1: i32, %arg2: i32) -> (i32, i32, i32) {
    %c0_i32 = arith.constant 0 : i32
    return %arg1, %arg2, %arg0 : i32, i32, i32
  }
}

</mosaic_0001>

<bundles_post_ra>
// kernel: tpu_custom_call.1
= control target key start
LH: loop header
LB: loop body
LE: loop exit
PB: predicated region body
PF: predicated region fallthrough
CT: control target
= control target key end

     0   :  { %9 = vsyncpa [#allocation5], 0  ;;  %s10582_s0 = inlined_call_operand.vmem [shape: f32[2,48,32], index: 0, kind: input, shape index: {}]   ;;  %s10583_s1 = inlined_call_operand.vmem [shape: f32[2,48,32], index: 1, kind: input, shape index: {}]   ;;  %s10584_s2 = inlined_call_operand.vmem [shape: f32[1,4,128,8], index: 2, kind: input, shape index: {}]   ;;  %s10585_s3 = inlined_call_operand.vmem [shape: f32[1,1,32], index: 3, kind: input, shape index: {}]   ;;  %s10586_s4 = inlined_call_operand.hbm [shape: f32[2,32,32], index: 4, kind: output, shape index: {}]  }
   0x1   :  { %11 = vsyncpa [#allocation5 + $0x1], 0  ;;  %s8583_s15 = smov 0   ;;  %s8585_s16 = smov 0  }
   0x2   :  { %s8587_s17 = smov 0   ;;  %s8589_s18 = smov 0  }
   0x3   :  { %s8591_s19 = smov 0   ;;  %s8593_s20 = smov 0  }
   0x4   :  { %s8595_s21 = smov 0   ;;  %s8597_s22 = smov 0  }
   0x5 LB: > { %s6054_s23 = sadd.s32 4294967295, %s8544_s22   ;;  %s6055_s24 = sadd.s32 4294967294, %s8544_s22   ;;  %s8544_s22 = sphi %s8597_s22, %s17_s22   ;;  %s8540_s21 = sphi %s8595_s21, %s10697_s21   ;;  %s8536_s20 = sphi %s8593_s20, %s10696_s20   ;;  %s8532_s19 = sphi %s8591_s19, %s10695_s19   ;;  %s8528_s18 = sphi %s8589_s18, %s10694_s18   ;;  %s8524_s17 = sphi %s8587_s17, %s10693_s17   ;;  %s8520_s16 = sphi %s8585_s16, %s10692_s16   ;;  %s8516_s15 = sphi %s8583_s15, %s10691_s15  }
   0x6   : > { %s29_s25 = sadd.s32 1, %s8536_s20  ;;  %s32_s26 = sadd.s32 1, %s8540_s21 }
   0x7   : > { %p30_p0 = scmp.ge.s32.totalorder %s29_s25, 2  ;;  %p171_p1 = scmp.ne.s32.totalorder %s8524_s17, %s8520_s16 }
   0x8   : > { %p172_p2 = scmp.eq.s32.totalorder %s6054_s23, 3  ;;  %p177_p5 = scmp.ne.s32.totalorder %s8520_s16, %s8516_s15 }
   0x9   : > { %s10699_s25 = smov (%p30_p0, %s29_s25), 0  ;;  %s10701_s26 = smov (!%p30_p0, %s32_s26), %s8540_s21 }
   0xa   : > { %s155_s27 = ssub.s32 %s8536_s20, %s10699_s25  ;;  %p8634_p3 = por %p172_p2, %p171_p1 }
   0xb   : > { %p34_p4 = scmp.ge.s32.totalorder %s10701_s26, 2  ;;  %p178_p6 = scmp.eq.s32.totalorder %s6055_s24, 3 }
   0xc   : > { %p6060_p7 = scmp.ge.s32.totalorder %s8544_s22, 1  ;;  %p244_p9 = scmp.lt.s32.totalorder %s8544_s22, 5 }
   0xd   : > { %s10703_s26 = smov (%p34_p4, %s10701_s26), 0  ;;  %p8643_p8 = por %p178_p6, %p177_p5 }
   0xe   : > { %s154_s30 = ssub.s32 %s8540_s21, %s10703_s26  ;;  %s161_s5 = sadd.s32 1, %s8524_s17 }
   0xf   : > { %s156_s6 = sor.u32 %s155_s27, %s154_s30  ;;  %p245_p10 = pnand %p6060_p7, %p244_p9 }
  0x10   : > { %p159_p11 = scmp.eq.s32.totalorder %s156_s6, 0 }
  0x11   : > { %248 = sbr.rel (%p245_p10) target bundleno = 964 (0x3c4), region = 36 }
  0x12   : > { %s8652_s7 = scalar_select %p159_p11, %s8524_s17, %s161_s5  }
  0x18   : > { %s8655_s8 = sshll.u32 %s8528_s18, 1  ;;  %p299_p12 = scmp.lt.s32.totalorder %s8532_s19, 1  ;;  %vm337_vm0 = vcmask 261120   ;;  %v436_v6 = vld [vmem:[%s10584_s2] sm:$0xff]  ;;  %v437_v7 = vld [vmem:[%s10584_s2 + $0x8] sm:$0xff]  ;;  %v438_v15 = vld [vmem:[%s10584_s2 + $0x10] sm:$0xff] }
  0x19   : > { %p301_p13 = scmp.lt.s32.totalorder %s8655_s8, 5  ;;  %s6122_s12 = sadd.s32 2, %s8655_s8  ;;  %v452_v10 = vand.u32 4294901760, %v436_v6  ;;  %v455_v11 = vand.u32 4294901760, %v437_v7  ;;  %v439_v16 = vld [vmem:[%s10584_s2 + $0x18] sm:$0xff]  ;;  %v458_v19 = vand.u32 4294901760, %v438_v15 }
  0x1a   : > { %s300_s9 = scalar_select %p299_p12, %s8532_s19, 1  ;;  %v461_v20 = vand.u32 4294901760, %v439_v16  ;;  %v440_v21 = vld [vmem:[%s10584_s2 + $0x20] sm:$0xff]  ;;  %v441_v22 = vld [vmem:[%s10584_s2 + $0x28] sm:$0xff]  ;;  %v442_v31 = vld [vmem:[%s10584_s2 + $0x30] sm:$0xff]  ;;  %vm416_vm1 = vcmask 64512  }
  0x1b   : > { %s302_s10 = scalar_select %p301_p13, %s8655_s8, 5  ;;  %v8698_v14 = vpack.c.bf16 %v455_v11, %v452_v10  ;;  %v464_v24 = vand.u32 4294901760, %v440_v21  ;;  %v467_v25 = vand.u32 4294901760, %v441_v22  ;;  %v8735_v29 = vsub.f32 %v436_v6, %v452_v10  ;;  %v443_v32 = vld [vmem:[%s10584_s2 + $0x38] sm:$0xff] }
  0x1c   : > { %s8363_s11 = smul.u32 6, %s300_s9  ;;  %p315_p0 = scmp.lt.s32.totalorder %s6122_s12, 5  ;;  %v8722_v23 = vpack.c.bf16 %v461_v20, %v458_v19  ;;  %v8737_v30 = vsub.f32 %v437_v7, %v455_v11  ;;  %v470_v33 = vand.u32 4294901760, %v442_v31  ;;  %v473_v34 = vand.u32 4294901760, %v443_v32 }
  0x1d   : > { %10640 = vst [vmem:[#allocation7_spill] sm:$0xff] %v8698_v14  ;;  %7516 = vmatprep.subr.bf16.mxu0 %v8698_v14  ;;  %s8548_s24 = smov 24   ;;  %v8733_v28 = vpack.c.bf16 %v467_v25, %v464_v24  ;;  %v10594_v35 = vand.u32 4294901760, %v8735_v29  ;;  %s8550_s5 = smov 40   ;;  %v8766_v42 = vsub.f32 %v438_v15, %v458_v19  ;;  %v8768_v43 = vsub.f32 %v439_v16, %v461_v20  ;;  %v1119_v16 = vld [vmem:[%s10584_s2 + $0x40] sm:$0xff]  ;;  %v1120_v19 = vld [vmem:[%s10584_s2 + $0x48] sm:$0xff] }
  0x1e   : > { %s307_s13 = sadd.s32 %s8363_s11, %s302_s10  ;;  %s10705_s12 = smov (!%p315_p0, %s6122_s12), 5  ;;  %7518 = vmatpush3.bf16.msra.mxu0 %v8698_v14  ;;  %10641 = vst [vmem:[#allocation8_spill] sm:$0xff] %v8722_v23  ;;  %v10593_v36 = vand.u32 4294901760, %v8737_v30  ;;  %v8757_v39 = vpack.c.bf16 %v473_v34, %v470_v33  ;;  %v8790_v53 = vsub.f32 %v440_v21, %v464_v24  ;;  %v8792_v54 = vsub.f32 %v441_v22, %v467_v25 }
  0x1f   : > { %s6063_s14 = sshll.u32 %s307_s13, 3  ;;  %s321_s18 = sadd.s32 %s8363_s11, %s10705_s12  ;;  %7520 = vmatprep.subr.bf16.mxu0 %v8722_v23  ;;  %10642 = vst [vmem:[#allocation9_spill] sm:$0xff] %v8733_v28  ;;  %v548_v40 = vsub.f32 %v8735_v29, %v10594_v35  ;;  %v10592_v46 = vand.u32 4294901760, %v8766_v42  ;;  %v10591_v47 = vand.u32 4294901760, %v8768_v43  ;;  %v8811_v63 = vsub.f32 %v442_v31, %v470_v33  ;;  %v1121_v33 = vld [vmem:[%s10584_s2 + $0x50] sm:$0xff] }
  0x20   : > { %s309_s27 = scalar_lea.vmem %s10582_s0, %s6063_s14  ;;  %s6065_s30 = sshll.u32 %s321_s18, 3  ;;  %10643 = vst [vmem:[#allocation10_spill] sm:$0xff] %v8757_v39  ;;  %v555_v41 = vsub.f32 %v8737_v30, %v10593_v36  ;;  %v10590_v57 = vand.u32 4294901760, %v8790_v53  ;;  %v10589_v58 = vand.u32 4294901760, %v8792_v54  ;;  %v1134_v21 = vand.u32 4294901760, %v1119_v16 }
  0x21   : > { %v335_v0 = vld [vmem:[%s309_s27] sm:$0xff]  ;;  %v336_v1 = vld [vmem:[%s309_s27 + $0x8] sm:$0xff]  ;;  %s323_s9 = scalar_lea.vmem %s10583_s1, %s6065_s30  ;;  %s8546_s10 = smov 16   ;;  %v549_v44 = vand.u32 4294901760, %v548_v40  ;;  %v562_v51 = vsub.f32 %v8766_v42, %v10592_v46  ;;  %v569_v52 = vsub.f32 %v8768_v43, %v10591_v47  ;;  %v1137_v22 = vand.u32 4294901760, %v1120_v19 }
  0x22   : > { %338 = vst.msk [vmem:[#allocation3] sm:$0xff] %vm337_vm0, %v335_v0  ;;  %339 = vst.msk [vmem:[#allocation3 + $0x8] sm:$0xff] %vm337_vm0, %v336_v1  ;;  %v340_v2 = vld [vmem:[%s323_s9] sm:$0xff]  ;;  %v341_v3 = vld [vmem:[%s323_s9 + $0x8] sm:$0xff]  ;;  %s8547_s11 = smov 8   ;;  %s8549_s14 = smov 32   ;;  %7522 = vmatpush3.bf16.msra.mxu0 %v8722_v23  ;;  %v576_v61 = vsub.f32 %v8790_v53, %v10590_v57  ;;  %v583_v62 = vsub.f32 %v8792_v54, %v10589_v58  ;;  %v8813_v0 = vsub.f32 %v443_v32, %v473_v34 }
  0x23   : > { %342 = vst.msk [vmem:[#allocation3 + $0x10] sm:$0xff] %vm337_vm0, %v340_v2  ;;  %343 = vst.msk [vmem:[#allocation3 + $0x18] sm:$0xff] %vm337_vm0, %v341_v3  ;;  %7524 = vmatprep.subr.bf16.mxu0 %v8733_v28  ;;  %v556_v45 = vand.u32 4294901760, %v555_v41  ;;  %s8551_s6 = smov 48   ;;  %s8552_s9 = smov 56   ;;  %v563_v55 = vand.u32 4294901760, %v562_v51  ;;  %v8843_v31 = vpack.c.bf16 %v1137_v22, %v1134_v21 }
  0x24   : > { %v570_v56 = vand.u32 4294901760, %v569_v52  ;;  %v577_v1 = vand.u32 4294901760, %v576_v61  ;;  %v584_v2 = vand.u32 4294901760, %v583_v62  ;;  %v10588_v3 = vand.u32 4294901760, %v8811_v63  ;;  %v1122_v34 = vld [vmem:[%s10584_s2 + $0x58] sm:$0xff]  ;;  %v1123_v52 = vld [vmem:[%s10584_s2 + $0x60] sm:$0xff] }
  0x25   : > { %v8781_v50 = vpack.c.bf16 %v556_v45, %v549_v44  ;;  %v10587_v7 = vand.u32 4294901760, %v8813_v0  ;;  %10644 = vst [vmem:[#allocation11_spill] sm:$0xff] %v8843_v31  ;;  %v1140_v40 = vand.u32 4294901760, %v1121_v33  ;;  %v1143_v41 = vand.u32 4294901760, %v1122_v34  ;;  %7612 = vmatprep.subr.bf16.mxu1 %v8843_v31  ;;  %s8554_s18 = smov 112  }
  0x26   : > { %7526 = vmatpush3.bf16.msra.mxu0 %v8733_v28  ;;  %v8803_v60 = vpack.c.bf16 %v570_v56, %v563_v55  ;;  %v8823_v10 = vpack.c.bf16 %v584_v2, %v577_v1  ;;  %v590_v11 = vsub.f32 %v8811_v63, %v10588_v3  ;;  %7614 = vmatpush3.bf16.msra.mxu1 %v8843_v31  ;;  %v1124_v55 = vld [vmem:[%s10584_s2 + $0x68] sm:$0xff]  ;;  %v1146_v56 = vand.u32 4294901760, %v1123_v52 }
  0x27   : > { %7528 = vmatprep.subr.bf16.mxu0 %v8757_v39  ;;  %v597_v15 = vsub.f32 %v8813_v0, %v10587_v7  ;;  %v8863_v45 = vpack.c.bf16 %v8737_v30, %v8735_v29  ;;  %v8865_v51 = vpack.c.bf16 %v1143_v41, %v1140_v40  ;;  %v1149_v61 = vand.u32 4294901760, %v1124_v55 }
  0x28   : > { %v591_v20 = vand.u32 4294901760, %v590_v11  ;;  %v8883_v1 = vpack.c.bf16 %v8768_v43, %v8766_v42  ;;  %v8887_v11 = vsub.f32 %v1119_v16, %v1134_v21  ;;  %v8919_v46 = vsub.f32 %v1121_v33, %v1140_v40 }
  0x29   : > { %v8672_v4 = vld [vmem:[#allocation3 + $0x2] sm:$0xff]  ;;  %v598_v25 = vand.u32 4294901760, %v597_v15  ;;  %10645 = vst [vmem:[#allocation12_spill] sm:$0xff] %v8865_v51  ;;  %7616 = vmatprep.subr.bf16.mxu1 %v8865_v51  ;;  %v8885_v2 = vpack.c.bf16 %v1149_v61, %v1146_v56  ;;  %v8889_v15 = vsub.f32 %v1120_v19, %v1137_v22  ;;  %v8908_v22 = vpack.c.bf16 %v8792_v54, %v8790_v53 }
  0x2a   : > { %v8674_v5 = vld [vmem:[#allocation3 + $0x1] sm:$0xff]  ;;  %370 = vrot.lane.b32.xlu1 %v8672_v4, %s8546_s10  ;;  %v8686_v8 = vld [vmem:[#allocation3 + $0xa] sm:$0xff]  ;;  %7530 = vmatpush3.bf16.msra.mxu0 %v8757_v39  ;;  %v8820_v6 = vld [vmem:[#allocation3 + $0x12] sm:$0xff]  ;;  %v10602_v16 = vand.u32 4294901760, %v8887_v11  ;;  %v8921_v36 = vsub.f32 %v1122_v34, %v1143_v41  ;;  %v8933_v33 = vpack.c.bf16 %v8813_v0, %v8811_v63  ;;  %v8945_v41 = vsub.f32 %v1123_v52, %v1146_v56 }
  0x2b   : > { %362 = vrot.lane.b32.xlu0 %v8674_v5, %s8547_s11  ;;  %v8688_v9 = vld [vmem:[#allocation3 + $0x9] sm:$0xff]  ;;  %7532 = vmatprep.subr.bf16.mxu0 %v8781_v50  ;;  %v8801_v59 = vld [vmem:[#allocation3 + $0x11] sm:$0xff]  ;;  %v8845_v32 = vpack.c.bf16 %v598_v25, %v591_v20  ;;  %10646 = vst [vmem:[#allocation13_spill] sm:$0xff] %v8885_v2  ;;  %v1125_v20 = vld [vmem:[%s10584_s2 + $0x70] sm:$0xff]  ;;  %v10601_v19 = vand.u32 4294901760, %v8889_v15  ;;  %vm419_vm2 = vcmask 130048  }
  0x2c   : > { %v8694_v12 = vld [vmem:[#allocation3 + $0xb] sm:$0xff]  ;;  %v8696_v13 = vld [vmem:[#allocation3 + $0x3] sm:$0xff]  ;;  %v8841_v24 = vld [vmem:[#allocation3 + $0x13] sm:$0xff]  ;;  %7618 = vmatpush3.bf16.msra.mxu1 %v8865_v51  ;;  %v1152_v7 = vand.u32 4294901760, %v1125_v20  ;;  %v1230_v57 = vsub.f32 %v8887_v11, %v10602_v16  ;;  %v10603_v51 = vand.u32 4294901760, %v8919_v46  ;;  %v10604_v34 = vand.u32 4294901760, %v8921_v36 }
  0x2d   : > { %v8711_v17 = vld [vmem:[#allocation3 + $0xc] sm:$0xff]  ;;  %v8713_v18 = vld [vmem:[#allocation3 + $0x4] sm:$0xff]  ;;  %v8857_v44 = vld [vmem:[#allocation3 + $0x14] sm:$0xff]  ;;  %7620 = vmatprep.subr.bf16.mxu1 %v8885_v2  ;;  %v1237_v47 = vsub.f32 %v8889_v15, %v10601_v19  ;;  %v8947_v19 = vsub.f32 %v1124_v55, %v1149_v61  ;;  %vm422_vm3 = vcmask 195584   ;;  %vm427_vm4 = vcmask 326656  }
  0x2e   : > { %372 = vrot.lane.b32.xlu1 %v8686_v8, %s8546_s10  ;;  %v8728_v26 = vld [vmem:[#allocation3 + $0xd] sm:$0xff]  ;;  %v8730_v27 = vld [vmem:[#allocation3 + $0x5] sm:$0xff]  ;;  %v8877_v62 = vld [vmem:[#allocation3 + $0x15] sm:$0xff]  ;;  %v1231_v35 = vand.u32 4294901760, %v1230_v57  ;;  %v1251_v57 = vsub.f32 %v8921_v36, %v10604_v34  ;;  %v1257_v34 = vand.u32 4294901760, %v8945_v41  ;;  %vm430_vm5 = vcmask 392192  }
  0x2f   : > { %364 = vrot.lane.b32.xlu0 %v8688_v9, %s8547_s11  ;;  %v8753_v37 = vld [vmem:[#allocation3 + $0xe] sm:$0xff]  ;;  %v8755_v38 = vld [vmem:[#allocation3 + $0x6] sm:$0xff]  ;;  %v8903_v21 = vld [vmem:[#allocation3 + $0x16] sm:$0xff]  ;;  %v1264_v52 = vand.u32 4294901760, %v8947_v19  ;;  %vm433_vm6 = vcmask 457728   ;;  %vm444_vm7 = vcmask 523264  }
  0x30   : > { %v8777_v48 = vld [vmem:[#allocation3 + $0xf] sm:$0xff]  ;;  %v8779_v49 = vld [vmem:[#allocation3 + $0x7] sm:$0xff]  ;;  %7622 = vmatpush3.bf16.msra.mxu1 %v8885_v2  ;;  %v1238_v2 = vand.u32 4294901760, %v1237_v47  ;;  %v8928_v31 = vld [vmem:[#allocation3 + $0x17] sm:$0xff]  ;;  %v1244_v47 = vsub.f32 %v8919_v46, %v10603_v51  ;;  %v1252_v51 = vand.u32 4294901760, %v1251_v57  ;;  %v1258_v56 = vsub.f32 %v8945_v41, %v1257_v34 }
  0x31   : > { %v1126_v25 = vld [vmem:[%s10584_s2 + $0x78] sm:$0xff]  ;;  %v1265_v61 = vsub.f32 %v8947_v19, %v1264_v52  ;;  %vm2408_vm8 = vcmask 130112   ;;  %vm3794_vm9 = vcmask 195712   ;;  %vm5180_vm10 = vcmask 261312  }
  0x32   : > { %380 = vrot.lane.b32.xlu1 %v8694_v12, %s8548_s24  ;;  %v1155_v3 = vand.u32 4294901760, %v1126_v25  ;;  %v8937_v40 = vpack.c.bf16 %v1238_v2, %v1231_v35  ;;  %v1245_v35 = vand.u32 4294901760, %v1244_v47  ;;  %v8953_v2 = vld [vmem:[#allocation3] sm:$0xff]  ;;  %v8955_v16 = vld [vmem:[#allocation3 + $0x8] sm:$0xff]  ;;  %v1259_v57 = vand.u32 4294901760, %v1258_v56 }
  0x33   : > { %378 = vrot.lane.b32.xlu0 %v8696_v13, %s8548_s24  ;;  %v1266_v39 = vand.u32 4294901760, %v1265_v61  ;;  %v8996_v61 = vpack.c.bf16 %v8921_v36, %v8919_v46 }
  0x34   : > { %v8911_v58 = vpack.c.bf16 %v1155_v3, %v1152_v7  ;;  %v8960_v55 = vpack.c.bf16 %v1252_v51, %v1245_v35  ;;  %v1277_v47 = vsub.f32 %v1126_v25, %v1155_v3  ;;  %v10649_v25 = vand.u32 4294901760, %v8737_v30 }
  0x35   : > { %v8968_v14 = vpack.c.bf16 %v1266_v39, %v1259_v57  ;;  %v8982_v39 = vpack.c.bf16 %v8889_v15, %v8887_v11  ;;  %v10650_v57 = vand.u32 4294901760, %v8766_v42  ;;  %v10652_v30 = vand.u32 4294901760, %v8790_v53 }
  0x36   : > { %388 = vrot.lane.b32.xlu1 %v8711_v17, %s8549_s14  ;;  %10647 = vst [vmem:[#allocation14_spill] sm:$0xff] %v8911_v58  ;;  %7624 = vmatprep.subr.bf16.mxu1 %v8911_v58  ;;  %v1278_v23 = vand.u32 4294901760, %v1277_v47  ;;  %v10656_v53 = vand.u32 4294901760, %v8887_v11 }
  0x37   : > { %386 = vrot.lane.b32.xlu0 %v8713_v18, %s8549_s14  ;;  %7626 = vmatpush3.bf16.msra.mxu1 %v8911_v58  ;;  %v1270_v58 = vsub.f32 %v1125_v20, %v1152_v7 }
  0x38   : > { %7628 = vmatprep.subr.bf16.mxu1 %v8937_v40  ;;  %v1279_v7 = vsub.f32 %v1277_v47, %v1278_v23 }
  0x39   : > { %v1271_v28 = vand.u32 4294901760, %v1270_v58  ;;  %v9022_v42 = vpack.c.bf16 %v1277_v47, %v1270_v58 }
  0x3a   : > { %396 = vrot.lane.b32.xlu1 %v8728_v26, %s8550_s5  ;;  %v1280_v35 = vand.u32 4294901760, %v1279_v7 }
  0x3b   : > { %394 = vrot.lane.b32.xlu0 %v8730_v27, %s8550_s5  ;;  %v1272_v51 = vsub.f32 %v1270_v58, %v1271_v28  ;;  %v10658_v58 = vand.u32 4294901760, %v8919_v46  ;;  %v9078_v11 = vpack.c.bf16 %v1278_v23, %v1271_v28 }
  0x3d   : > { %v1273_v20 = vand.u32 4294901760, %v1272_v51  ;;  %v10651_v51 = vand.u32 4294901760, %v8768_v43  ;;  %v9028_v43 = vld [vmem:[#allocation3 + $0x10] sm:$0xff] }
  0x3e   : > { %404 = vrot.lane.b32.xlu1 %v8753_v37, %s8551_s6 }
  0x3f   : > { %402 = vrot.lane.b32.xlu0 %v8755_v38, %s8551_s6  ;;  %v8978_v3 = vpack.c.bf16 %v1280_v35, %v1273_v20  ;;  %v9006_v7 = vpack.c.bf16 %v10651_v51, %v10650_v57  ;;  %v10653_v20 = vand.u32 4294901760, %v8792_v54  ;;  %v10657_v54 = vand.u32 4294901760, %v8889_v15 }
  0x41   : > { %v9020_v35 = vpack.c.bf16 %v10653_v20, %v10652_v30 }
  0x42   : > { %412 = vrot.lane.b32.xlu1 %v8777_v48, %s8552_s9 }
  0x43   : > { %410 = vrot.lane.b32.xlu0 %v8779_v49, %s8552_s9 }
  0x46   : > { %1053 = vrot.lane.b32.xlu1 %v8801_v59, %s8547_s11 }
  0x47   : > { %1051 = vrot.lane.b32.xlu0 %v8688_v9, %s8547_s11 }
  0x4a   : > { %1061 = vrot.lane.b32.xlu1 %v8820_v6, %s8546_s10 }
  0x4b   : > { %1059 = vrot.lane.b32.xlu0 %v8686_v8, %s8546_s10 }
  0x4e   : > { %1069 = vrot.lane.b32.xlu1 %v8841_v24, %s8548_s24 }
  0x4f   : > { %1067 = vrot.lane.b32.xlu0 %v8694_v12, %s8548_s24 }
  0x52   : > { %1077 = vrot.lane.b32.xlu1 %v8857_v44, %s8549_s14 }
  0x53   : > { %1075 = vrot.lane.b32.xlu0 %v8711_v17, %s8549_s14 }
  0x56   : > { %1085 = vrot.lane.b32.xlu1 %v8877_v62, %s8550_s5 }
  0x57   : > { %1083 = vrot.lane.b32.xlu0 %v8728_v26, %s8550_s5 }
  0x5a   : > { %1093 = vrot.lane.b32.xlu1 %v8903_v21, %s8551_s6 }
  0x5b   : > { %1091 = vrot.lane.b32.xlu0 %v8753_v37, %s8551_s6 }
  0x5e   : > { %1101 = vrot.lane.b32.xlu1 %v8928_v31, %s8552_s9 }
  0x5f   : > { %1099 = vrot.lane.b32.xlu0 %v8777_v48, %s8552_s9  ;;  %s8553_s9 = smov 120  }
  0x62   : > { %1739 = vrot.lane.b32.xlu1 %v8955_v16, %s8553_s9 }
  0x63   : > { %1737 = vrot.lane.b32.xlu0 %v8953_v2, %s8553_s9 }
  0x66   : > { %1747 = vrot.lane.b32.xlu1 %v8686_v8, %s8547_s11 }
  0x67   : > { %1745 = vrot.lane.b32.xlu0 %v8672_v4, %s8547_s11  ;;  %v10648_v4 = vand.u32 4294901760, %v8735_v29  ;;  %v9010_v29 = vpack.c.bf16 %v8947_v19, %v8945_v41  ;;  %v10654_v19 = vand.u32 4294901760, %v8811_v63  ;;  %v10655_v41 = vand.u32 4294901760, %v8813_v0 }
  0x68   : > { %v10659_v63 = vand.u32 4294901760, %v8921_v36 }
  0x69   : > { %v8992_v56 = vpack.c.bf16 %v10649_v25, %v10648_v4  ;;  %v9034_v4 = vpack.c.bf16 %v10655_v41, %v10654_v19 }
  0x6a   : > { %1755 = vrot.lane.b32.xlu1 %v8694_v12, %s8546_s10  ;;  %v9066_v0 = vpack.c.bf16 %v10659_v63, %v10658_v58 }
  0x6b   : > { %1753 = vrot.lane.b32.xlu0 %v8696_v13, %s8546_s10 }
  0x6e   : > { %1763 = vrot.lane.b32.xlu1 %v8711_v17, %s8548_s24 }
  0x6f   : > { %1761 = vrot.lane.b32.xlu0 %v8713_v18, %s8548_s24 }
  0x72   : > { %1771 = vrot.lane.b32.xlu1 %v8728_v26, %s8549_s14 }
  0x73   : > { %1769 = vrot.lane.b32.xlu0 %v8730_v27, %s8549_s14 }
  0x76   : > { %1779 = vrot.lane.b32.xlu1 %v8753_v37, %s8550_s5 }
  0x77   : > { %1777 = vrot.lane.b32.xlu0 %v8755_v38, %s8550_s5 }
  0x7a   : > { %1787 = vrot.lane.b32.xlu1 %v8777_v48, %s8551_s6 }
  0x7b   : > { %1785 = vrot.lane.b32.xlu0 %v8779_v49, %s8551_s6 }
  0x7e   : > { %2431 = vrot.lane.b32.xlu1 %v9028_v43, %s8553_s9 }
  0x7f   : > { %2429 = vrot.lane.b32.xlu0 %v8955_v16, %s8553_s9 }
  0x82   : > { %2439 = vrot.lane.b32.xlu1 %v8820_v6, %s8547_s11  ;;  %v9072_v6 = vpack.c.bf16 %v1264_v52, %v1257_v34 }
  0x83   : > { %2437 = vrot.lane.b32.xlu0 %v8686_v8, %s8547_s11  ;;  %v9056_v8 = vpack.c.bf16 %v10657_v54, %v10656_v53 }
  0x86   : > { %2447 = vrot.lane.b32.xlu1 %v8841_v24, %s8546_s10 }
  0x87   : > { %2445 = vrot.lane.b32.xlu0 %v8694_v12, %s8546_s10 }
  0x8a   : > { %2455 = vrot.lane.b32.xlu1 %v8857_v44, %s8548_s24 }
  0x8b   : > { %2453 = vrot.lane.b32.xlu0 %v8711_v17, %s8548_s24 }
  0x8e   : > { %2463 = vrot.lane.b32.xlu1 %v8877_v62, %s8549_s14 }
  0x8f   : > { %2461 = vrot.lane.b32.xlu0 %v8728_v26, %s8549_s14 }
  0x92   : > { %2471 = vrot.lane.b32.xlu1 %v8903_v21, %s8550_s5 }
  0x93   : > { %2469 = vrot.lane.b32.xlu0 %v8753_v37, %s8550_s5 }
  0x96   : > { %2479 = vrot.lane.b32.xlu1 %v8928_v31, %s8551_s6 }
  0x97   : > { %2477 = vrot.lane.b32.xlu0 %v8777_v48, %s8551_s6  ;;  %s8555_s6 = smov 104  }
  0x9a   : > { %3131 = vrot.lane.b32.xlu1 %v8674_v5, %s8553_s9 }
  0x9b   : > { %3123 = vrot.lane.b32.xlu0 %v8953_v2, %s8554_s18 }
  0x9c   : > { %v371_v36 = vpop.permute.xlu1 %370 }
  0x9d   : > { %v363_v46 = vpop.permute.xlu0 %362 }
  0x9e   : > { %3133 = vrot.lane.b32.xlu1 %v8688_v9, %s8553_s9  ;;  %v417_v57 = vsel %vm416_vm1, %v8953_v2, %v363_v46 }
  0x9f   : > { %3125 = vrot.lane.b32.xlu0 %v8955_v16, %s8554_s18  ;;  %v420_v51 = vsel %vm419_vm2, %v417_v57, %v371_v36 }
  0xa0   : > { %v373_v15 = vpop.permute.xlu1 %372 }
  0xa1   : > { %v365_v34 = vpop.permute.xlu0 %364 }
  0xa2   : > { %3141 = vrot.lane.b32.xlu1 %v8694_v12, %s8547_s11 }
  0xa3   : > { %3139 = vrot.lane.b32.xlu0 %v8696_v13, %s8547_s11 }
  0xa4   : > { %v381_v23 = vpop.permute.xlu1 %380 }
  0xa5   : > { %v379_v28 = vpop.permute.xlu0 %378 }
  0xa6   : > { %3149 = vrot.lane.b32.xlu1 %v8711_v17, %s8546_s10  ;;  %v423_v19 = vsel %vm422_vm3, %v420_v51, %v379_v28 }
  0xa7   : > { %3147 = vrot.lane.b32.xlu0 %v8713_v18, %s8546_s10  ;;  %v418_v18 = vsel %vm416_vm1, %v8955_v16, %v365_v34 }
  0xa8   : > { %v389_v52 = vpop.permute.xlu1 %388 }
  0xa9   : > { %v387_v47 = vpop.permute.xlu0 %386 }
  0xaa   : > { %3157 = vrot.lane.b32.xlu1 %v8728_v26, %s8548_s24  ;;  %v425_v53 = vsel %vm337_vm0, %v423_v19, %v387_v47 }
  0xab   : > { %3155 = vrot.lane.b32.xlu0 %v8730_v27, %s8548_s24  ;;  %v421_v27 = vsel %vm419_vm2, %v418_v18, %v373_v15 }
  0xac   : > { %v397_v13 = vpop.permute.xlu1 %396  ;;  %v424_v2 = vsel %vm422_vm3, %v421_v27, %v381_v23 }
  0xad   : > { %v395_v25 = vpop.permute.xlu0 %394  ;;  %v426_v41 = vsel %vm337_vm0, %v424_v2, %v389_v52 }
  0xae   : > { %3165 = vrot.lane.b32.xlu1 %v8753_v37, %s8549_s14  ;;  %v428_v54 = vsel %vm427_vm4, %v425_v53, %v395_v25 }
  0xaf   : > { %3163 = vrot.lane.b32.xlu0 %v8755_v38, %s8549_s14  ;;  %v429_v38 = vsel %vm427_vm4, %v426_v41, %v397_v13 }
  0xb0   : > { %v405_v30 = vpop.permute.xlu1 %404 }
  0xb1   : > { %v403_v20 = vpop.permute.xlu0 %402  ;;  %v432_v58 = vsel %vm430_vm5, %v429_v38, %v405_v30 }
  0xb2   : > { %3173 = vrot.lane.b32.xlu1 %v8777_v48, %s8550_s5  ;;  %v431_v63 = vsel %vm430_vm5, %v428_v54, %v403_v20 }
  0xb3   : > { %3171 = vrot.lane.b32.xlu0 %v8779_v49, %s8550_s5 }
  0xb4   : > { %v413_v36 = vpop.permute.xlu1 %412 }
  0xb5   : > { %v411_v46 = vpop.permute.xlu0 %410  ;;  %v435_v15 = vsel %vm433_vm6, %v432_v58, %v413_v36 }
  0xb6   : > { %v434_v34 = vsel %vm433_vm6, %v431_v63, %v411_v46  ;;  %v449_v49 = vsel %vm444_vm7, %v435_v15, 0  ;;  %3823 = vrot.lane.b32.xlu1 %v8688_v9, %s8553_s9  ;;  %v4491_v46 = vld [vmem:[#allocation3] sm:$0xff] }
  0xb7   : > { %v446_v23 = vsel %vm444_vm7, %v434_v34, 0  ;;  %3815 = vrot.lane.b32.xlu0 %v8955_v16, %s8554_s18  ;;  %v9130_v28 = vand.u32 4294901760, %v449_v49 }
  0xb8   : > { %v9132_v52 = vand.u32 4294901760, %v446_v23  ;;  %v1054_v47 = vpop.permute.xlu1 %1053 }
  0xb9   : > { %v1052_v13 = vpop.permute.xlu0 %1051  ;;  %v9135_v25 = vsub.f32 %v449_v49, %v9130_v28 }
  0xba   : > { %v9138_v57 = vsub.f32 %v446_v23, %v9132_v52  ;;  %3825 = vrot.lane.b32.xlu1 %v8801_v59, %s8553_s9 }
  0xbb   : > { %3817 = vrot.lane.b32.xlu0 %v9028_v43, %s8554_s18  ;;  %v536_v27 = vand.u32 4294901760, %v9135_v25 }
  0xbc   : > { %v526_v18 = vand.u32 4294901760, %v9138_v57  ;;  %v1062_v51 = vpop.permute.xlu1 %1061 }
  0xbd   : > { %v1060_v30 = vpop.permute.xlu0 %1059  ;;  %v537_v2 = vsub.f32 %v9135_v25, %v536_v27 }
  0xbe   : > { %v527_v20 = vsub.f32 %v9138_v57, %v526_v18  ;;  %3833 = vrot.lane.b32.xlu1 %v8841_v24, %s8547_s11 }
  0xbf   : > { %3831 = vrot.lane.b32.xlu0 %v8694_v12, %s8547_s11  ;;  %v538_v41 = vand.u32 4294901760, %v537_v2 }
  0xc0   : > { %v528_v19 = vand.u32 4294901760, %v527_v20  ;;  %v1070_v53 = vpop.permute.xlu1 %1069 }
  0xc1   : > { %v1068_v38 = vpop.permute.xlu0 %1067 }
  0xc2   : > { %6619 = vmatprep.mubr.f32.mxu0 %v528_v19  ;;  %3841 = vrot.lane.b32.xlu1 %v8857_v44, %s8546_s10 }
  0xc3   : > { %6620 = vmatmul.mubr.f32.vlgmr.msra.gmra.mrb[0].mxu0 %v538_v41  ;;  %3839 = vrot.lane.b32.xlu0 %v8711_v17, %s8546_s10  ;;  %v1106_v17 = vsel %vm416_vm1, %v9028_v43, %v1054_v47  ;;  %v4493_v47 = vld [vmem:[#allocation3 + $0x1] sm:$0xff]  ;;  %v9217_v41 = vld [vmem:[#allocation3 + $0x9] sm:$0xff] }
  0xc4   : > { %7534 = vmatpush3.bf16.msra.mxu0 %v8781_v50  ;;  %6638 = vmatprep.mubr.f32.mxu0 %v9132_v52  ;;  %v1078_v54 = vpop.permute.xlu1 %1077  ;;  %v1105_v50 = vsel %vm416_vm1, %v8955_v16, %v1052_v13 }
  0xc5   : > { %v1076_v58 = vpop.permute.xlu0 %1075  ;;  %7536 = vmatprep.subr.bf16.mxu0 %v8803_v60 }
  0xc6   : > { %3849 = vrot.lane.b32.xlu1 %v8877_v62, %s8548_s24 }
  0xc7   : > { %3847 = vrot.lane.b32.xlu0 %v8728_v26, %s8548_s24  ;;  %v1108_v26 = vsel %vm419_vm2, %v1106_v17, %v1062_v51 }
  0xc8   : > { %7538 = vmatpush3.bf16.msra.mxu0 %v8803_v60  ;;  %v1086_v12 = vpop.permute.xlu1 %1085  ;;  %v1107_v60 = vsel %vm419_vm2, %v1105_v50, %v1060_v30 }
  0xc9   : > { %v1084_v24 = vpop.permute.xlu0 %1083  ;;  %7540 = vmatprep.subr.bf16.mxu0 %v8823_v10  ;;  %v1109_v62 = vsel %vm422_vm3, %v1107_v60, %v1068_v38 }
  0xca   : > { %3857 = vrot.lane.b32.xlu1 %v8903_v21, %s8549_s14  ;;  %v1111_v16 = vsel %vm337_vm0, %v1109_v62, %v1076_v58 }
  0xcb   : > { %3855 = vrot.lane.b32.xlu0 %v8753_v37, %s8549_s14  ;;  %v1110_v37 = vsel %vm422_vm3, %v1108_v26, %v1070_v53  ;;  %v1113_v36 = vsel %vm427_vm4, %v1111_v16, %v1084_v24  ;;  %v9237_v24 = vld [vmem:[#allocation3 + $0xa] sm:$0xff] }
  0xcc   : > { %7542 = vmatpush3.bf16.msra.mxu0 %v8823_v10  ;;  %v1094_v44 = vpop.permute.xlu1 %1093  ;;  %v1112_v43 = vsel %vm337_vm0, %v1110_v37, %v1078_v54  ;;  %v9226_v54 = vld [vmem:[#allocation3 + $0x2] sm:$0xff] }
  0xcd   : > { %v1092_v63 = vpop.permute.xlu0 %1091  ;;  %7544 = vmatprep.subr.bf16.mxu0 %v8845_v32  ;;  %v1114_v10 = vsel %vm427_vm4, %v1112_v43, %v1086_v12  ;;  %v4499_v26 = vld [vmem:[#allocation3 + $0x4] sm:$0xff] }
  0xce   : > { %v1116_v21 = vsel %vm430_vm5, %v1114_v10, %v1094_v44  ;;  %v1115_v15 = vsel %vm430_vm5, %v1113_v36, %v1092_v63  ;;  %3865 = vrot.lane.b32.xlu1 %v8928_v31, %s8550_s5  ;;  %v9207_v31 = vld [vmem:[#allocation3 + $0x8] sm:$0xff]  ;;  %v10660_v37 = vld [vmem:[#allocation7_spill] sm:$0xff] }
  0xcf   : > { %3863 = vrot.lane.b32.xlu0 %v8777_v48, %s8550_s5  ;;  %v9248_v63 = vld [vmem:[#allocation3 + $0xc] sm:$0xff] }
  0xd0   : > { %7546 = vmatpush3.bf16.msra.mxu0 %v8845_v32  ;;  %v1102_v34 = vpop.permute.xlu1 %1101  ;;  %v10661_v16 = vld [vmem:[#allocation8_spill] sm:$0xff] }
  0xd1   : > { %v1100_v49 = vpop.permute.xlu0 %1099  ;;  %7548 = vmatprep.subr.bf16.mxu0 %v8863_v45  ;;  %v1118_v48 = vsel %vm433_vm6, %v1116_v21, %v1102_v34  ;;  %v9272_v36 = vld [vmem:[#allocation3 + $0xe] sm:$0xff]  ;;  %v10663_v34 = vld [vmem:[#allocation10_spill] sm:$0xff] }
  0xd2   : > { %v1117_v23 = vsel %vm433_vm6, %v1115_v15, %v1100_v49  ;;  %v1131_v13 = vsel %vm444_vm7, %v1118_v48, 0  ;;  %4517 = vrot.lane.b32.xlu1 %v4493_v47, %s8554_s18  ;;  %v9285_v15 = vld [vmem:[#allocation3 + $0xf] sm:$0xff] }
  0xd3   : > { %v1128_v32 = vsel %vm444_vm7, %v1117_v23, 0  ;;  %6639 = vmatmul.mubr.f32.vlgmr.msra.gmra.mrb[0].mxu0 %v9130_v28  ;;  %4509 = vrot.lane.b32.xlu0 %v4491_v46, %s8555_s6  ;;  %v9201_v51 = vand.u32 4294901760, %v1131_v13  ;;  %v4505_v46 = vld [vmem:[#allocation3 + $0x7] sm:$0xff]  ;;  %v5186_v47 = vld [vmem:[#allocation3 + $0x11] sm:$0xff] }
  0xd4   : > { %v9203_v30 = vand.u32 4294901760, %v1128_v32  ;;  %7550 = vmatpush3.bf16.msra.mxu0 %v8863_v45  ;;  %6657 = vmatprep.mubr.f32.mxu0 %v9138_v57  ;;  %v9219_v53 = vpop.permute.xlu1 %1739  ;;  %v10662_v57 = vld [vmem:[#allocation9_spill] sm:$0xff] }
  0xd5   : > { %7552 = vmatprep.subr.bf16.mxu0 %v8883_v1  ;;  %v1738_v20 = vpop.permute.xlu0 %1737  ;;  %v9212_v2 = vsub.f32 %v1131_v13, %v9201_v51 }
  0xd6   : > { %v9215_v19 = vsub.f32 %v1128_v32, %v9203_v30  ;;  %4519 = vrot.lane.b32.xlu1 %v9217_v41, %s8554_s18  ;;  %v1791_v21 = vsel %vm416_vm1, %v1738_v20, %v8674_v5  ;;  %v5192_v20 = vld [vmem:[#allocation3 + $0x14] sm:$0xff] }
  0xd7   : > { %4511 = vrot.lane.b32.xlu0 %v9207_v31, %s8555_s6  ;;  %v1218_v38 = vand.u32 4294901760, %v9212_v2 }
  0xd8   : > { %7554 = vmatpush3.bf16.msra.mxu0 %v8883_v1  ;;  %v1208_v45 = vand.u32 4294901760, %v9215_v19  ;;  %v9243_v60 = vpop.permute.xlu1 %1747 }
  0xd9   : > { %7556 = vmatprep.subr.bf16.mxu0 %v8908_v22  ;;  %v1746_v58 = vpop.permute.xlu0 %1745  ;;  %v1219_v1 = vsub.f32 %v9212_v2, %v1218_v38 }
  0xda   : > { %v1209_v12 = vsub.f32 %v9215_v19, %v1208_v45  ;;  %4527 = vrot.lane.b32.xlu1 %v9237_v24, %s8553_s9 }
  0xdb   : > { %4525 = vrot.lane.b32.xlu0 %v9226_v54, %s8553_s9  ;;  %v1220_v50 = vand.u32 4294901760, %v1219_v1 }
  0xdc   : > { %7558 = vmatpush3.bf16.msra.mxu0 %v8908_v22  ;;  %v1210_v17 = vand.u32 4294901760, %v1209_v12  ;;  %v4501_v22 = vld [vmem:[#allocation3 + $0x5] sm:$0xff]  ;;  %v9258_v43 = vpop.permute.xlu1 %1755 }
  0xdd   : > { %7560 = vmatprep.subr.bf16.mxu0 %v8933_v33  ;;  %v1754_v44 = vpop.permute.xlu0 %1753 }
  0xde   : > { %6733 = vmatprep.mubr.f32.mxu1 %v1210_v17  ;;  %4535 = vrot.lane.b32.xlu1 %v9248_v63, %s8547_s11  ;;  %v10665_v17 = vld [vmem:[#allocation12_spill] sm:$0xff] }
  0xdf   : > { %6734 = vmatmul.mubr.f32.vlgmr.msra.gmra.mrb[0].mxu1 %v1220_v50  ;;  %4533 = vrot.lane.b32.xlu0 %v4499_v26, %s8547_s11  ;;  %v10666_v26 = vld [vmem:[#allocation13_spill] sm:$0xff] }
  0xe0   : > { %7562 = vmatpush3.bf16.msra.mxu0 %v8933_v33  ;;  %7630 = vmatpush3.bf16.msra.mxu1 %v8937_v40  ;;  %v9261_v33 = vld [vmem:[#allocation3 + $0xd] sm:$0xff] }
  0xe1   : > { %6752 = vmatprep.mubr.f32.mxu1 %v9203_v30  ;;  %7564 = vmatprep.subr.bf16.mxu0 %v10660_v37  ;;  %v1762_v62 = vpop.permute.xlu0 %1761  ;;  %v4503_v40 = vld [vmem:[#allocation3 + $0x6] sm:$0xff] }
  0xe2   : > { %7632 = vmatprep.subr.bf16.mxu1 %v8960_v55  ;;  %4543 = vrot.lane.b32.xlu1 %v9261_v33, %s8546_s10 }
  0xe3   : > { %6658 = vmatmul.mubr.f32.vlgmr.msra.gmra.mrb[0].mxu0 %v9135_v25  ;;  %4541 = vrot.lane.b32.xlu0 %v4501_v22, %s8546_s10  ;;  %v5196_v22 = vld [vmem:[#allocation3 + $0x16] sm:$0xff] }
  0xe4   : > { %7566 = vmatpush3.bf16.msra.mxu0 %v10660_v37  ;;  %6676 = vmatprep.mubr.f32.mxu0 %v526_v18 }
  0xe5   : > { %7634 = vmatpush3.bf16.msra.mxu1 %v8960_v55  ;;  %7568 = vmatprep.subr.bf16.mxu0 %v10661_v16  ;;  %v1770_v10 = vpop.permute.xlu0 %1769  ;;  %v9277_v55 = vpop.permute.xlu1 %1763 }
  0xe6   : > { %7636 = vmatprep.subr.bf16.mxu1 %v8968_v14  ;;  %4551 = vrot.lane.b32.xlu1 %v9272_v36, %s8548_s24 }
  0xe7   : > { %4549 = vrot.lane.b32.xlu0 %v4503_v40, %s8548_s24  ;;  %v10667_v40 = vld [vmem:[#allocation14_spill] sm:$0xff] }
  0xe8   : > { %7570 = vmatpush3.bf16.msra.mxu0 %v10661_v16 }
  0xe9   : > { %7638 = vmatpush3.bf16.msra.mxu1 %v8968_v14  ;;  %7572 = vmatprep.subr.bf16.mxu0 %v10662_v57  ;;  %v1778_v18 = vpop.permute.xlu0 %1777  ;;  %v1793_v14 = vsel %vm419_vm2, %v1791_v21, %v1746_v58  ;;  %v9294_v5 = vpop.permute.xlu1 %1771 }
  0xea   : > { %7640 = vmatprep.subr.bf16.mxu1 %v8978_v3  ;;  %4559 = vrot.lane.b32.xlu1 %v9285_v15, %s8549_s14  ;;  %v1795_v48 = vsel %vm422_vm3, %v1793_v14, %v1754_v44 }
  0xeb   : > { %4557 = vrot.lane.b32.xlu0 %v4505_v46, %s8549_s14  ;;  %v1797_v23 = vsel %vm337_vm0, %v1795_v48, %v1762_v62 }
  0xec   : > { %7574 = vmatpush3.bf16.msra.mxu0 %v10662_v57  ;;  %v1799_v25 = vsel %vm427_vm4, %v1797_v23, %v1770_v10 }
  0xed   : > { %7642 = vmatpush3.bf16.msra.mxu1 %v8978_v3  ;;  %7576 = vmatprep.subr.bf16.mxu0 %v10663_v34  ;;  %v1786_v49 = vpop.permute.xlu0 %1785  ;;  %v1780_v13 = vpop.permute.xlu1 %1779  ;;  %v1801_v32 = vsel %vm430_vm5, %v1799_v25, %v1778_v18 }
  0xee   : > { %7644 = vmatprep.subr.bf16.mxu1 %v8982_v39  ;;  %5209 = vrot.lane.b32.xlu1 %v9217_v41, %s8554_s18  ;;  %v10664_v41 = vld [vmem:[#allocation11_spill] sm:$0xff] }
  0xef   : > { %5201 = vrot.lane.b32.xlu0 %v9207_v31, %s8555_s6 }
  0xf0   : > { %6753 = vmatmul.mubr.f32.vlgmr.msra.gmra.mrb[0].mxu1 %v9201_v51  ;;  %7578 = vmatpush3.bf16.msra.mxu0 %v10663_v34 }
  0xf1   : > { %7646 = vmatpush3.bf16.msra.mxu1 %v8982_v39  ;;  %6771 = vmatprep.mubr.f32.mxu1 %v9215_v19  ;;  %v2430_v3 = vpop.permute.xlu0 %2429  ;;  %v5184_v39 = vld [vmem:[#allocation3 + $0x10] sm:$0xff]  ;;  %v1788_v31 = vpop.permute.xlu1 %1787 }
  0xf2   : > { %7580 = vmatprep.subr.bf16.mxu0 %v8992_v56  ;;  %7648 = vmatprep.subr.bf16.mxu1 %v8996_v61  ;;  %v2483_v44 = vsel %vm416_vm1, %v2430_v3, %v8688_v9  ;;  %v6071_v3 = vld [vmem:[%s10584_s2 + $0xa8] sm:$0xff] }
  0xf3   : > { %6677 = vmatmul.mubr.f32.vlgmr.msra.gmra.mrb[0].mxu0 %v536_v27  ;;  %5203 = vrot.lane.b32.xlu0 %v5184_v39, %s8555_s6  ;;  %v9319_v27 = vld [vmem:[#allocation3 + $0x12] sm:$0xff] }
  0xf4   : > { %7582 = vmatpush3.bf16.msra.mxu0 %v8992_v56  ;;  %6695 = vmatprep.mubr.f32.mxu0 %v9132_v52 }
  0xf5   : > { %7650 = vmatpush3.bf16.msra.mxu1 %v8996_v61  ;;  %7584 = vmatprep.subr.bf16.mxu0 %v9006_v7  ;;  %v2438_v56 = vpop.permute.xlu0 %2437  ;;  %v1792_v61 = vsel %vm416_vm1, %v9219_v53, %v8688_v9 }
  0xf6   : > { %7652 = vmatprep.subr.bf16.mxu1 %v9010_v29  ;;  %5211 = vrot.lane.b32.xlu1 %v5186_v47, %s8554_s18  ;;  %s6117_s18 = sshll.u32 %s8532_s19, 2 }
  0xf7   : > { %5217 = vrot.lane.b32.xlu0 %v9237_v24, %s8553_s9  ;;  %s5914_s5 = sadd.s32 %s6117_s18, %s8655_s8 }
  0xf8   : > { %7586 = vmatpush3.bf16.msra.mxu0 %v9006_v7  ;;  %v1794_v7 = vsel %vm419_vm2, %v1792_v61, %v9243_v60  ;;  %v6066_v60 = vld [vmem:[%s10584_s2 + $0x80] sm:$0xff]  ;;  %v6073_v61 = vld [vmem:[%s10584_s2 + $0xb8] sm:$0xff]  ;;  %s6118_s30 = sshll.u32 %s5914_s5, 7 }
  0xf9   : > { %7654 = vmatpush3.bf16.msra.mxu1 %v9010_v29  ;;  %7588 = vmatprep.subr.bf16.mxu0 %v9020_v35  ;;  %v1803_v29 = vsel %vm433_vm6, %v1801_v32, %v1786_v49  ;;  %v2446_v53 = vpop.permute.xlu0 %2445  ;;  %v1796_v58 = vsel %vm422_vm3, %v1794_v7, %v9258_v43  ;;  %v1821_v62 = vand.u32 4294901760, %v6066_v60 }
  0xfa   : > { %7656 = vmatprep.subr.bf16.mxu1 %v9022_v42  ;;  %5219 = vrot.lane.b32.xlu1 %v9319_v27, %s8553_s9  ;;  %v1815_v12 = vsel %vm444_vm7, %v1803_v29, 0  ;;  %s10523_s9 = scalar_lea.hbm %s10586_s4, %s6118_s30 }
  0xfb   : > { %5225 = vrot.lane.b32.xlu0 %v9248_v63, %s8547_s11  ;;  %v9354_v1 = vand.u32 4294901760, %v1815_v12  ;;  %v9420_v23 = vsub.f32 %v6066_v60, %v1821_v62 }
  0xfc   : > { %7590 = vmatpush3.bf16.msra.mxu0 %v9020_v35  ;;  %v9350_v35 = vpop.permute.xlu1 %2431 }
  0xfd   : > { %7658 = vmatpush3.bf16.msra.mxu1 %v9022_v42  ;;  %7592 = vmatprep.subr.bf16.mxu0 %v9034_v4  ;;  %v1798_v42 = vsel %vm337_vm0, %v1796_v58, %v9277_v55  ;;  %v2454_v19 = vpop.permute.xlu0 %2453  ;;  %v9368_v50 = vsub.f32 %v1815_v12, %v9354_v1  ;;  %v5198_v55 = vld [vmem:[#allocation3 + $0x17] sm:$0xff]  ;;  %v1916_v29 = vand.u32 4294901760, %v9420_v23  ;;  %v1842_v12 = vand.u32 4294901760, %v6073_v61 }
  0xfe   : > { %7660 = vmatprep.subr.bf16.mxu1 %v10664_v41  ;;  %5227 = vrot.lane.b32.xlu1 %v5192_v20, %s8547_s11 }
  0xff   : > { %5233 = vrot.lane.b32.xlu0 %v9261_v33, %s8546_s10  ;;  %v2485_v33 = vsel %vm419_vm2, %v2483_v44, %v2438_v56  ;;  %v1895_v10 = vand.u32 4294901760, %v9368_v50  ;;  %v6072_v56 = vld [vmem:[%s10584_s2 + $0xb0] sm:$0xff] }
 0x100   : > { %6772 = vmatmul.mubr.f32.vlgmr.msra.gmra.mrb[0].mxu1 %v9212_v2  ;;  %7594 = vmatpush3.bf16.msra.mxu0 %v9034_v4  ;;  %v5194_v4 = vld [vmem:[#allocation3 + $0x15] sm:$0xff]  ;;  %v9380_v63 = vpop.permute.xlu1 %2439  ;;  %v2487_v18 = vsel %vm422_vm3, %v2485_v33, %v2446_v53  ;;  %v1839_v58 = vand.u32 4294901760, %v6072_v56 }
 0x101   : > { %7662 = vmatpush3.bf16.msra.mxu1 %v10664_v41  ;;  %6790 = vmatprep.mubr.f32.mxu1 %v1208_v45  ;;  %v1800_v45 = vsel %vm427_vm4, %v1798_v42, %v9294_v5  ;;  %v2462_v9 = vpop.permute.xlu0 %2461 }
 0x102   : > { %7596 = vmatprep.subr.bf16.mxu0 %v10660_v37  ;;  %7664 = vmatprep.subr.bf16.mxu1 %v10665_v17 }
 0x103   : > { %6696 = vmatmul.mubr.f32.vlgmr.msra.gmra.mrb[0].mxu0 %v9130_v28  ;;  %5235 = vrot.lane.b32.xlu1 %v5194_v4, %s8546_s10 }
 0x104   : > { %7598 = vmatpush3.bf16.msra.mxu0 %v10660_v37  ;;  %6714 = vmatprep.mubr.f32.mxu0 %v9132_v52  ;;  %v6067_v52 = vld [vmem:[%s10584_s2 + $0x88] sm:$0xff]  ;;  %v1802_v37 = vsel %vm430_vm5, %v1800_v45, %v1780_v13  ;;  %v9404_v21 = vpop.permute.xlu1 %2447  ;;  %v2489_v13 = vsel %vm337_vm0, %v2487_v18, %v2454_v19  ;;  %v9495_v18 = vsub.f32 %v6073_v61, %v1842_v12 }
 0x105   : > { %7666 = vmatpush3.bf16.msra.mxu1 %v10665_v17  ;;  %7600 = vmatprep.subr.bf16.mxu0 %v10661_v16  ;;  %v1824_v43 = vand.u32 4294901760, %v6067_v52  ;;  %v1804_v46 = vsel %vm433_vm6, %v1802_v37, %v1788_v31  ;;  %v2470_v25 = vpop.permute.xlu0 %2469  ;;  %v1917_v37 = vsub.f32 %v9420_v23, %v1916_v29 }
 0x106   : > { %7668 = vmatprep.subr.bf16.mxu1 %v10666_v26  ;;  %5241 = vrot.lane.b32.xlu0 %v9272_v36, %s8548_s24  ;;  %v6068_v36 = vld [vmem:[%s10584_s2 + $0x90] sm:$0xff]  ;;  %v1818_v48 = vsel %vm444_vm7, %v1804_v46, 0 }
 0x107   : > { %5243 = vrot.lane.b32.xlu1 %v5196_v22, %s8548_s24  ;;  %v9407_v14 = vpack.c.bf16 %v1824_v43, %v1821_v62  ;;  %v1827_v49 = vand.u32 4294901760, %v6068_v36  ;;  %v9422_v39 = vsub.f32 %v6067_v52, %v1824_v43  ;;  %v9439_v31 = vand.u32 4294901760, %v1818_v48 }
 0x108   : > { %7602 = vmatpush3.bf16.msra.mxu0 %v10661_v16  ;;  %v6069_v16 = vld [vmem:[%s10584_s2 + $0x98] sm:$0xff]  ;;  %v2456_v53 = vpop.permute.xlu1 %2455  ;;  %v2484_v52 = vsel %vm416_vm1, %v9350_v35, %v8801_v59  ;;  %v9476_v62 = vpack.c.bf16 %v1842_v12, %v1839_v58 }
 0x109   : > { %7670 = vmatpush3.bf16.msra.mxu1 %v10666_v26  ;;  %7604 = vmatprep.subr.bf16.mxu0 %v10662_v57  ;;  %v1830_v5 = vand.u32 4294901760, %v6069_v16  ;;  %v9425_v47 = vsub.f32 %v6068_v36, %v1827_v49  ;;  %v1923_v20 = vand.u32 4294901760, %v9422_v39  ;;  %v9459_v60 = vsub.f32 %v1818_v48, %v9439_v31  ;;  %v2478_v22 = vpop.permute.xlu0 %2477 }
 0x10a   : > { %7672 = vmatprep.subr.bf16.mxu1 %v10667_v40  ;;  %5249 = vrot.lane.b32.xlu0 %v9285_v15, %s8549_s14  ;;  %v6070_v15 = vld [vmem:[%s10584_s2 + $0xa0] sm:$0xff] }
 0x10b   : > { %5251 = vrot.lane.b32.xlu1 %v5198_v55, %s8549_s14  ;;  %v9437_v32 = vsub.f32 %v6069_v16, %v1830_v5  ;;  %v9443_v2 = vpack.c.bf16 %v1830_v5, %v1827_v49  ;;  %v1930_v42 = vand.u32 4294901760, %v9425_v47  ;;  %v1905_v36 = vand.u32 4294901760, %v9459_v60  ;;  %s295_s14 = sand.u32 1, %s8520_s16  }
 0x10c   : > { %7606 = vmatpush3.bf16.msra.mxu0 %v10662_v57  ;;  %v1896_v57 = vsub.f32 %v9368_v50, %v1895_v10  ;;  %v2486_v16 = vsel %vm419_vm2, %v2484_v52, %v9380_v63  ;;  %v2464_v46 = vpop.permute.xlu1 %2463  ;;  %v1918_v49 = vand.u32 4294901760, %v1917_v37  ;;  %s6061_s6 = sshll.u32 %s295_s14, 4  ;;  %s10529_s19 = scalar_lea.sflag [#allocation5], %s295_s14 }
 0x10d   : > { %7674 = vmatpush3.bf16.msra.mxu1 %v10667_v40  ;;  %7608 = vmatprep.subr.bf16.mxu0 %v10663_v34  ;;  %v1937_v4 = vand.u32 4294901760, %v9437_v32  ;;  %v1931_v43 = vsub.f32 %v9425_v47, %v1930_v42  ;;  %s297_s12 = scalar_lea.vmem [#allocation4], %s6061_s6 }
 0x10e   : > { %7676 = vmatprep.subr.bf16.mxu1 %v9056_v8  ;;  %v1897_v7 = vand.u32 4294901760, %v1896_v57  ;;  %v2488_v57 = vsel %vm422_vm3, %v2486_v16, %v9404_v21  ;;  %s5917_s13 = sshll.u32 %s297_s12, 4  ;;  %s10525_s13 = int_to_ptr.vmem [resolvable:$true] %s5917_s13 }
 0x10f   : > { %v1938_v59 = vsub.f32 %v9437_v32, %v1937_v4  ;;  %v1932_v48 = vand.u32 4294901760, %v1931_v43  ;;  %v2490_v61 = vsel %vm337_vm0, %v2488_v57, %v2456_v53  ;;  %v9554_v57 = vpop.permute.xlu0 %3123  ;;  %s8450_s8 = scalar_lea.vmem %s10525_s13, 256 }
 0x110   : > { %6791 = vmatmul.mubr.f32.vlgmr.msra.gmra.mrb[0].mxu1 %v1218_v38  ;;  %7610 = vmatpush3.bf16.msra.mxu0 %v10663_v34  ;;  %v1833_v38 = vand.u32 4294901760, %v6070_v15  ;;  %v1836_v34 = vand.u32 4294901760, %v6071_v3  ;;  %v2492_v52 = vsel %vm427_vm4, %v2490_v61, %v2464_v46  ;;  %p8451_p1 = scmp.ne.s32.totalorder %s10525_s13, %s8450_s8 }
 0x111   : > { %7678 = vmatpush3.bf16.msra.mxu1 %v9056_v8  ;;  %6809 = vmatprep.mubr.f32.mxu1 %v9203_v30  ;;  %v2491_v8 = vsel %vm427_vm4, %v2489_v13, %v2462_v9  ;;  %v9487_v9 = vsub.f32 %v6072_v56, %v1839_v58  ;;  %v1939_v63 = vand.u32 4294901760, %v1938_v59 }
 0x112   : > { %7680 = vmatprep.subr.bf16.mxu1 %v9066_v0  ;;  %7708 = vmatprep.subr.bf16.mxu0 %v9407_v14  ;;  %v9454_v19 = vsub.f32 %v6070_v15, %v1833_v38  ;;  %v9456_v45 = vsub.f32 %v6071_v3, %v1836_v34  ;;  %v2493_v44 = vsel %vm430_vm5, %v2491_v8, %v2470_v25  ;;  %v10620_v25 = vand.u32 4294901760, %v9495_v18  ;;  %p8452_p2 = pnand %p8451_p1, %p8634_p3 }
 0x113   : > { %6715 = vmatmul.mubr.f32.vlgmr.msra.gmra.mrb[0].mxu0 %v9130_v28  ;;  %v9463_v28 = vpack.c.bf16 %v1836_v34, %v1833_v38  ;;  %v2495_v55 = vsel %vm433_vm6, %v2493_v44, %v2478_v22  ;;  %v1906_v3 = vsub.f32 %v9459_v60, %v1905_v36  ;;  %v10621_v13 = vand.u32 4294901760, %v9487_v9 }
 0x114   : > { %7710 = vmatpush3.bf16.msra.mxu0 %v9407_v14  ;;  %6847 = vmatprep.mubr.f32.mxu0 %v1897_v7  ;;  %v1944_v35 = vand.u32 4294901760, %v9454_v19  ;;  %v10622_v33 = vand.u32 4294901760, %v9456_v45  ;;  %v2506_v15 = vsel %vm444_vm7, %v2495_v55, 0  ;;  %v7727_v34 = vpack.c.bf16 %v1939_v63, %v1932_v48  ;;  %p8453_p4 = pneg %p8452_p2 }
 0x115   : > { %7682 = vmatpush3.bf16.msra.mxu1 %v9066_v0  ;;  %7712 = vmatprep.subr.bf16.mxu0 %v9443_v2  ;;  %v1924_v0 = vsub.f32 %v9422_v39, %v1923_v20  ;;  %v9517_v38 = vand.u32 4294901760, %v2506_v15  ;;  %v1907_v8 = vand.u32 4294901760, %v1906_v3  ;;  %v1959_v12 = vsub.f32 %v9487_v9, %v10621_v13 }
 0x116   : > { %7684 = vmatprep.subr.bf16.mxu1 %v9072_v6  ;;  %v1952_v21 = vsub.f32 %v9456_v45, %v10622_v33  ;;  %v1966_v53 = vsub.f32 %v9495_v18, %v10620_v25 }
 0x117   : > { %v1925_v5 = vand.u32 4294901760, %v1924_v0  ;;  %v9532_v44 = vsub.f32 %v2506_v15, %v9517_v38  ;;  %v1960_v43 = vand.u32 4294901760, %v1959_v12 }
 0x118   : > { %7714 = vmatpush3.bf16.msra.mxu0 %v9443_v2  ;;  %v1953_v58 = vand.u32 4294901760, %v1952_v21  ;;  %v1967_v59 = vand.u32 4294901760, %v1966_v53 }
 0x119   : > { %7686 = vmatpush3.bf16.msra.mxu1 %v9072_v6  ;;  %7716 = vmatprep.subr.bf16.mxu0 %v9463_v28  ;;  %v1945_v6 = vsub.f32 %v9454_v19, %v1944_v35  ;;  %v7723_v56 = vpack.c.bf16 %v1925_v5, %v1918_v49  ;;  %v10617_v55 = vand.u32 4294901760, %v9532_v44  ;;  %v6076_v49 = vld [vmem:[%s10584_s2 + $0xd0] sm:$0xff]  ;;  %v6077_v5 = vld [vmem:[%s10584_s2 + $0xd8] sm:$0xff] }
 0x11a   : > { %7688 = vmatprep.subr.bf16.mxu1 %v9078_v11  ;;  %v7735_v15 = vpack.c.bf16 %v1967_v59, %v1960_v43  ;;  %v2518_v3 = vand.u32 4294901760, %v6076_v49  ;;  %v2521_v21 = vand.u32 4294901760, %v6077_v5  ;;  %v7743_v43 = vpack.c.bf16 %v9437_v32, %v9425_v47 }
 0x11b   : > { %v1946_v7 = vand.u32 4294901760, %v1945_v6  ;;  %v2587_v61 = vsub.f32 %v9532_v44, %v10617_v55  ;;  %v10668_v47 = vand.u32 4294901760, %v9456_v45 }
 0x11c   : > { %7718 = vmatpush3.bf16.msra.mxu0 %v9463_v28  ;;  %v9583_v53 = vsub.f32 %v6076_v49, %v2518_v3 }
 0x11d   : > { %7690 = vmatpush3.bf16.msra.mxu1 %v9078_v11  ;;  %7720 = vmatprep.subr.bf16.mxu0 %v9476_v62  ;;  %v2472_v11 = vpop.permute.xlu1 %2471  ;;  %v7731_v0 = vpack.c.bf16 %v1953_v58, %v1946_v7  ;;  %v7739_v7 = vpack.c.bf16 %v9422_v39, %v9420_v23  ;;  %v6081_v58 = vld [vmem:[%s10584_s2 + $0xf8] sm:$0xff]  ;;  %v7779_v32 = vpack.c.bf16 %v10668_v47, %v1944_v35  ;;  %v10670_v35 = vand.u32 4294901760, %v9495_v18 }
 0x11e   : > { %7692 = vmatprep.subr.bf16.mxu1 %v10664_v41  ;;  %v2494_v22 = vsel %vm430_vm5, %v2492_v52, %v2472_v11  ;;  %v6079_v11 = vld [vmem:[%s10584_s2 + $0xe8] sm:$0xff]  ;;  %v9585_v52 = vsub.f32 %v6077_v5, %v2521_v21  ;;  %v10618_v5 = vand.u32 4294901760, %v9583_v53 }
 0x120   : > { %6810 = vmatmul.mubr.f32.vlgmr.msra.gmra.mrb[0].mxu1 %v9201_v51  ;;  %7722 = vmatpush3.bf16.msra.mxu0 %v9476_v62 }
 0x121   : > { %7694 = vmatpush3.bf16.msra.mxu1 %v10664_v41  ;;  %6828 = vmatprep.mubr.f32.mxu1 %v9203_v30  ;;  %v6074_v30 = vld [vmem:[%s10584_s2 + $0xc0] sm:$0xff]  ;;  %v6075_v41 = vld [vmem:[%s10584_s2 + $0xc8] sm:$0xff]  ;;  %v2480_v37 = vpop.permute.xlu1 %2479 }
 0x122   : > { %7696 = vmatprep.subr.bf16.mxu1 %v10665_v17  ;;  %7724 = vmatprep.subr.bf16.mxu0 %v7723_v56  ;;  %v2512_v16 = vand.u32 4294901760, %v6074_v30  ;;  %v2515_v46 = vand.u32 4294901760, %v6075_v41 }
 0x123   : > { %6848 = vmatmul.mubr.f32.vlgmr.msra.gmra.mrb[2].mxu0 %v1907_v8  ;;  %v6080_v8 = vld [vmem:[%s10584_s2 + $0xf0] sm:$0xff] }
 0x124   : > { %7726 = vmatpush3.bf16.msra.mxu0 %v7723_v56  ;;  %6866 = vmatprep.mubr.f32.mxu0 %v9354_v1  ;;  %v9552_v48 = vsub.f32 %v6074_v30, %v2512_v16  ;;  %v9557_v63 = vsub.f32 %v6075_v41, %v2515_v46  ;;  %v9560_v6 = vpack.c.bf16 %v2515_v46, %v2512_v16  ;;  %v2530_v59 = vand.u32 4294901760, %v6080_v8 }
 0x125   : > { %7698 = vmatpush3.bf16.msra.mxu1 %v10665_v17  ;;  %7728 = vmatprep.subr.bf16.mxu0 %v7727_v34  ;;  %v2496_v17 = vsel %vm433_vm6, %v2494_v22, %v2480_v37  ;;  %v2527_v22 = vand.u32 4294901760, %v6079_v11  ;;  %v9592_v37 = vpop.permute.xlu0 %3125  ;;  %v2533_v16 = vand.u32 4294901760, %v6081_v58 }
 0x126   : > { %7700 = vmatprep.subr.bf16.mxu1 %v10666_v26  ;;  %v2509_v56 = vsel %vm444_vm7, %v2496_v17, 0  ;;  %v10615_v12 = vand.u32 4294901760, %v9557_v63 }
 0x127   : > { %v9587_v30 = vand.u32 4294901760, %v2509_v56  ;;  %v9637_v55 = vsub.f32 %v6081_v58, %v2533_v16 }
 0x128   : > { %7730 = vmatpush3.bf16.msra.mxu0 %v7727_v34  ;;  %v10616_v34 = vand.u32 4294901760, %v9552_v48  ;;  %v2615_v49 = vsub.f32 %v9557_v63, %v10615_v12 }
 0x129   : > { %7702 = vmatpush3.bf16.msra.mxu1 %v10666_v26  ;;  %7732 = vmatprep.subr.bf16.mxu0 %v7731_v0  ;;  %v6078_v26 = vld [vmem:[%s10584_s2 + $0xe0] sm:$0xff] }
 0x12a   : > { %7704 = vmatprep.subr.bf16.mxu1 %v10667_v40  ;;  %v2524_v41 = vand.u32 4294901760, %v6078_v26  ;;  %v2608_v46 = vsub.f32 %v9552_v48, %v10616_v34  ;;  %v9635_v34 = vsub.f32 %v6080_v8, %v2530_v59 }
 0x12c   : > { %7734 = vmatpush3.bf16.msra.mxu0 %v7731_v0  ;;  %v2588_v0 = vand.u32 4294901760, %v2587_v61  ;;  %v9606_v17 = vsub.f32 %v6078_v26, %v2524_v41  ;;  %v7747_v61 = vpack.c.bf16 %v9456_v45, %v9454_v19  ;;  %v9620_v26 = vpack.c.bf16 %v2533_v16, %v2530_v59 }
 0x12d   : > { %7706 = vmatpush3.bf16.msra.mxu1 %v10667_v40  ;;  %7736 = vmatprep.subr.bf16.mxu0 %v7735_v15  ;;  %v9590_v40 = vpack.c.bf16 %v2521_v21, %v2518_v3  ;;  %v9612_v3 = vpack.c.bf16 %v2527_v22, %v2524_v41  ;;  %v9614_v21 = vsub.f32 %v6079_v11, %v2527_v22  ;;  %v2616_v41 = vand.u32 4294901760, %v2615_v49  ;;  %v3132_v49 = vpop.permute.xlu1 %3131 }
 0x12e   : > { %7804 = vmatprep.subr.bf16.mxu1 %v9560_v6  ;;  %v2622_v11 = vsub.f32 %v9583_v53, %v10618_v5  ;;  %v10623_v22 = vand.u32 4294901760, %v9606_v17  ;;  %v7751_v5 = vpack.c.bf16 %v9495_v18, %v9487_v9  ;;  %v2656_v59 = vand.u32 4294901760, %v9637_v55 }
 0x12f   : > { %v7843_v23 = vpack.c.bf16 %v9614_v21, %v9606_v17  ;;  %v10669_v45 = vand.u32 4294901760, %v9487_v9  ;;  %v10671_v18 = vand.u32 4294901760, %v9532_v44 }
 0x130   : > { %6829 = vmatmul.mubr.f32.vlgmr.msra.gmra.mrb[0].mxu1 %v9201_v51  ;;  %7738 = vmatpush3.bf16.msra.mxu0 %v7735_v15  ;;  %v10619_v51 = vand.u32 4294901760, %v9585_v52  ;;  %v9609_v15 = vsub.f32 %v2509_v56, %v9587_v30  ;;  %v9622_v56 = vpop.permute.xlu0 %3139  ;;  %v2623_v25 = vand.u32 4294901760, %v2622_v11  ;;  %v2636_v33 = vsub.f32 %v9606_v17, %v10623_v22 }
 0x131   : > { %7806 = vmatpush3.bf16.msra.mxu1 %v9560_v6  ;;  %6961 = vmatprep.mubr.f32.mxu1 %v2588_v0  ;;  %v2609_v0 = vand.u32 4294901760, %v2608_v46  ;;  %v10624_v46 = vand.u32 4294901760, %v9614_v21  ;;  %v9655_v11 = vpop.permute.xlu1 %3133 }
 0x132   : > { %7740 = vmatprep.subr.bf16.mxu0 %v7739_v7  ;;  %7808 = vmatprep.subr.bf16.mxu1 %v9590_v40  ;;  %v10625_v12 = vand.u32 4294901760, %v9609_v15 }
 0x133   : > { %6867 = vmatmul.mubr.f32.vlgmr.msra.gmra.mrb[2].mxu0 %v9439_v31  ;;  %v2643_v58 = vsub.f32 %v9614_v21, %v10624_v46 }
 0x134   : > { %7742 = vmatpush3.bf16.msra.mxu0 %v7739_v7  ;;  %6885 = vmatprep.mubr.f32.mxu0 %v9368_v50  ;;  %v2629_v7 = vsub.f32 %v9585_v52, %v10619_v51  ;;  %v7819_v51 = vpack.c.bf16 %v2616_v41, %v2609_v0  ;;  %v2597_v8 = vsub.f32 %v9609_v15, %v10625_v12  ;;  %v3148_v16 = vpop.permute.xlu0 %3147  ;;  %v2637_v41 = vand.u32 4294901760, %v2636_v33 }
 0x135   : > { %7810 = vmatpush3.bf16.msra.mxu1 %v9590_v40  ;;  %7744 = vmatprep.subr.bf16.mxu0 %v7743_v43  ;;  %v2644_v22 = vand.u32 4294901760, %v2643_v58  ;;  %v2657_v12 = vsub.f32 %v9637_v55, %v2656_v59  ;;  %v7835_v50 = vpack.c.bf16 %v9557_v63, %v9552_v48  ;;  %v7771_v58 = vpack.c.bf16 %v1923_v20, %v1916_v29 }
 0x136   : > { %7812 = vmatprep.subr.bf16.mxu1 %v9612_v3  ;;  %v2630_v13 = vand.u32 4294901760, %v2629_v7  ;;  %v2598_v7 = vand.u32 4294901760, %v2597_v8  ;;  %v3142_v8 = vpop.permute.xlu1 %3141 }
 0x137   : > { %v7827_v33 = vpack.c.bf16 %v2644_v22, %v2637_v41  ;;  %v3177_v22 = vsel %vm416_vm1, %v9554_v57, %v3132_v49  ;;  %v7839_v57 = vpack.c.bf16 %v9585_v52, %v9583_v53 }
 0x138   : > { %7746 = vmatpush3.bf16.msra.mxu0 %v7743_v43  ;;  %v2649_v43 = vand.u32 4294901760, %v9635_v34  ;;  %v7823_v0 = vpack.c.bf16 %v2630_v13, %v2623_v25  ;;  %v2658_v25 = vand.u32 4294901760, %v2657_v12 }
 0x139   : > { %7814 = vmatpush3.bf16.msra.mxu1 %v9612_v3  ;;  %7748 = vmatprep.subr.bf16.mxu0 %v7747_v61 }
 0x13a   : > { %7816 = vmatprep.subr.bf16.mxu1 %v9620_v26  ;;  %v2650_v46 = vsub.f32 %v9635_v34, %v2649_v43  ;;  %v3150_v12 = vpop.permute.xlu1 %3149 }
 0x13c   : > { %7750 = vmatpush3.bf16.msra.mxu0 %v7747_v61  ;;  %v3156_v61 = vpop.permute.xlu0 %3155  ;;  %v2651_v13 = vand.u32 4294901760, %v2650_v46  ;;  %v3179_v46 = vsel %vm419_vm2, %v3177_v22, %v9226_v54  ;;  %v7775_v54 = vpack.c.bf16 %v1937_v4, %v1930_v42  ;;  %v7847_v4 = vpack.c.bf16 %v9637_v55, %v9635_v34 }
 0x13d   : > { %7818 = vmatpush3.bf16.msra.mxu1 %v9620_v26  ;;  %7752 = vmatprep.subr.bf16.mxu0 %v7751_v5 }
 0x13e   : > { %7820 = vmatprep.subr.bf16.mxu1 %v7819_v51  ;;  %v3158_v49 = vpop.permute.xlu1 %3157 }
 0x140   : > { %6962 = vmatmul.mubr.f32.vlgmr.msra.gmra.mrb[2].mxu1 %v2598_v7  ;;  %7754 = vmatpush3.bf16.msra.mxu0 %v7751_v5  ;;  %v7831_v5 = vpack.c.bf16 %v2658_v25, %v2651_v13 }
 0x141   : > { %7822 = vmatpush3.bf16.msra.mxu1 %v7819_v51  ;;  %6980 = vmatprep.mubr.f32.mxu1 %v9517_v38  ;;  %v3164_v51 = vpop.permute.xlu0 %3163 }
 0x142   : > { %7756 = vmatprep.subr.bf16.mxu0 %v9407_v14  ;;  %7824 = vmatprep.subr.bf16.mxu1 %v7823_v0  ;;  %v3166_v20 = vpop.permute.xlu1 %3165 }
 0x143   : > { %6886 = vmatmul.mubr.f32.vlgmr.msra.gmra.mrb[2].mxu0 %v9459_v60 }
 0x144   : > { %7758 = vmatpush3.bf16.msra.mxu0 %v9407_v14  ;;  %6904 = vmatprep.mubr.f32.mxu0 %v1895_v10 }
 0x145   : > { %7826 = vmatpush3.bf16.msra.mxu1 %v7823_v0  ;;  %7760 = vmatprep.subr.bf16.mxu0 %v9443_v2  ;;  %v3172_v10 = vpop.permute.xlu0 %3171  ;;  %v3181_v0 = vsel %vm422_vm3, %v3179_v46, %v9622_v56  ;;  %v7783_v56 = vpack.c.bf16 %v10670_v35, %v10669_v45  ;;  %v10672_v46 = vand.u32 4294901760, %v9552_v48  ;;  %v10675_v48 = vand.u32 4294901760, %v9585_v52  ;;  %v6087_v52 = vld [vmem:[%s10584_s2 + $0x128] sm:$0xff] }
 0x146   : > { %7828 = vmatprep.subr.bf16.mxu1 %v7827_v33  ;;  %v3183_v29 = vsel %vm337_vm0, %v3181_v0, %v3148_v16  ;;  %v3174_v16 = vpop.permute.xlu1 %3173  ;;  %v10676_v45 = vand.u32 4294901760, %v9609_v15 }
 0x147   : > { %v3185_v42 = vsel %vm427_vm4, %v3183_v29, %v3156_v61 }
 0x148   : > { %7762 = vmatpush3.bf16.msra.mxu0 %v9443_v2  ;;  %v3187_v19 = vsel %vm430_vm5, %v3185_v42, %v3164_v51 }
 0x149   : > { %7830 = vmatpush3.bf16.msra.mxu1 %v7827_v33  ;;  %7764 = vmatprep.subr.bf16.mxu0 %v9463_v28  ;;  %v3816_v39 = vpop.permute.xlu0 %3815  ;;  %v3189_v7 = vsel %vm433_vm6, %v3187_v19, %v3172_v10 }
 0x14a   : > { %7832 = vmatprep.subr.bf16.mxu1 %v7831_v5  ;;  %v3201_v9 = vsel %vm444_vm7, %v3189_v7, 0  ;;  %v3824_v61 = vpop.permute.xlu1 %3823 }
 0x14b   : > { %v9729_v13 = vand.u32 4294901760, %v3201_v9 }
 0x14c   : > { %7766 = vmatpush3.bf16.msra.mxu0 %v9463_v28 }
 0x14d   : > { %7834 = vmatpush3.bf16.msra.mxu1 %v7831_v5  ;;  %7768 = vmatprep.subr.bf16.mxu0 %v9476_v62  ;;  %v9708_v60 = vpop.permute.xlu0 %3817  ;;  %v6082_v5 = vld [vmem:[%s10584_s2 + $0x100] sm:$0xff] }
 0x14e   : > { %7836 = vmatprep.subr.bf16.mxu1 %v7835_v50  ;;  %v9750_v51 = vpop.permute.xlu1 %3825  ;;  %v3207_v22 = vand.u32 4294901760, %v6082_v5 }
 0x150   : > { %6981 = vmatmul.mubr.f32.vlgmr.msra.gmra.mrb[2].mxu1 %v9587_v30  ;;  %7770 = vmatpush3.bf16.msra.mxu0 %v9476_v62 }
 0x151   : > { %7838 = vmatpush3.bf16.msra.mxu1 %v7835_v50  ;;  %6999 = vmatprep.mubr.f32.mxu1 %v9532_v44  ;;  %v9740_v44 = vsub.f32 %v3201_v9, %v9729_v13 }
 0x152   : > { %7772 = vmatprep.subr.bf16.mxu0 %v7771_v58  ;;  %7840 = vmatprep.subr.bf16.mxu1 %v7839_v57  ;;  %v9779_v29 = vpop.permute.xlu1 %3833 }
 0x153   : > { %6905 = vmatmul.mubr.f32.vlgmr.msra.gmra.mrb[2].mxu0 %v1905_v36  ;;  %v3178_v36 = vsel %vm416_vm1, %v9592_v37, %v9655_v11  ;;  %v3832_v37 = vpop.permute.xlu0 %3831  ;;  %v3281_v0 = vand.u32 4294901760, %v9740_v44 }
 0x154   : > { %7774 = vmatpush3.bf16.msra.mxu0 %v7771_v58  ;;  %6923 = vmatprep.mubr.f32.mxu0 %v9354_v1  ;;  %v3180_v41 = vsel %vm419_vm2, %v3178_v36, %v9237_v24  ;;  %v10673_v58 = vand.u32 4294901760, %v9557_v63 }
 0x155   : > { %7842 = vmatpush3.bf16.msra.mxu1 %v7839_v57  ;;  %7776 = vmatprep.subr.bf16.mxu0 %v7775_v54  ;;  %v3182_v11 = vsel %vm422_vm3, %v3180_v41, %v3142_v8  ;;  %v6089_v41 = vld [vmem:[%s10584_s2 + $0x138] sm:$0xff] }
 0x156   : > { %7844 = vmatprep.subr.bf16.mxu1 %v7843_v23  ;;  %v3184_v33 = vsel %vm337_vm0, %v3182_v11, %v3150_v12  ;;  %v7867_v57 = vpack.c.bf16 %v10673_v58, %v10672_v46  ;;  %v3870_v58 = vsel %vm416_vm1, %v9708_v60, %v9750_v51 }
 0x157   : > { %v3840_v25 = vpop.permute.xlu0 %3839  ;;  %v3186_v8 = vsel %vm427_vm4, %v3184_v33, %v3158_v49 }
 0x158   : > { %7778 = vmatpush3.bf16.msra.mxu0 %v7775_v54  ;;  %v3188_v12 = vsel %vm430_vm5, %v3186_v8, %v3166_v20  ;;  %v6085_v54 = vld [vmem:[%s10584_s2 + $0x118] sm:$0xff] }
 0x159   : > { %7846 = vmatpush3.bf16.msra.mxu1 %v7843_v23  ;;  %7780 = vmatprep.subr.bf16.mxu0 %v7779_v32  ;;  %v3190_v23 = vsel %vm433_vm6, %v3188_v12, %v3174_v16  ;;  %v3216_v20 = vand.u32 4294901760, %v6085_v54  ;;  %v6088_v16 = vld [vmem:[%s10584_s2 + $0x130] sm:$0xff]  ;;  %v3228_v12 = vand.u32 4294901760, %v6089_v41 }
 0x15a   : > { %7848 = vmatprep.subr.bf16.mxu1 %v7847_v4  ;;  %v3204_v42 = vsel %vm444_vm7, %v3190_v23, 0 }
 0x15b   : > { %v3848_v49 = vpop.permute.xlu0 %3847  ;;  %v9809_v7 = vsub.f32 %v6085_v54, %v3216_v20 }
 0x15c   : > { %7782 = vmatpush3.bf16.msra.mxu0 %v7779_v32 }
 0x15d   : > { %7850 = vmatpush3.bf16.msra.mxu1 %v7847_v4  ;;  %7784 = vmatprep.subr.bf16.mxu0 %v7783_v56  ;;  %v9793_v4 = vsub.f32 %v6082_v5, %v3207_v22  ;;  %v3842_v5 = vpop.permute.xlu1 %3841 }
 0x15e   : > { %7852 = vmatprep.subr.bf16.mxu1 %v9560_v6 }
 0x160   : > { %7000 = vmatmul.mubr.f32.vlgmr.msra.gmra.mrb[2].mxu1 %v9609_v15  ;;  %7786 = vmatpush3.bf16.msra.mxu0 %v7783_v56  ;;  %v3856_v56 = vpop.permute.xlu0 %3855 }
 0x161   : > { %7854 = vmatpush3.bf16.msra.mxu1 %v9560_v6  ;;  %7018 = vmatprep.mubr.f32.mxu1 %v10671_v18  ;;  %v10677_v18 = vand.u32 4294901760, %v9606_v17  ;;  %v3323_v17 = vand.u32 4294901760, %v9809_v7 }
 0x162   : > { %7788 = vmatprep.subr.bf16.mxu0 %v9407_v14  ;;  %7856 = vmatprep.subr.bf16.mxu1 %v9590_v40 }
 0x163   : > { %6924 = vmatmul.mubr.f32.vlgmr.msra.gmra.mrb[2].mxu0 %v9439_v31 }
 0x164   : > { %7790 = vmatpush3.bf16.msra.mxu0 %v9407_v14  ;;  %6942 = vmatprep.mubr.f32.mxu0 %v9354_v1  ;;  %v6083_v1 = vld [vmem:[%s10584_s2 + $0x108] sm:$0xff]  ;;  %v3869_v14 = vsel %vm416_vm1, %v3816_v39, %v3824_v61  ;;  %v10678_v61 = vand.u32 4294901760, %v9614_v21 }
 0x165   : > { %7858 = vmatpush3.bf16.msra.mxu1 %v9590_v40  ;;  %7792 = vmatprep.subr.bf16.mxu0 %v9443_v2  ;;  %v3210_v50 = vand.u32 4294901760, %v6083_v1  ;;  %v3871_v10 = vsel %vm419_vm2, %v3869_v14, %v9237_v24  ;;  %v10674_v24 = vand.u32 4294901760, %v9583_v53  ;;  %v6086_v53 = vld [vmem:[%s10584_s2 + $0x120] sm:$0xff]  ;;  %v3225_v14 = vand.u32 4294901760, %v6088_v16 }
 0x166   : > { %7860 = vmatprep.subr.bf16.mxu1 %v9612_v3  ;;  %v3873_v39 = vsel %vm422_vm3, %v3871_v10, %v3832_v37  ;;  %v9811_v37 = vand.u32 4294901760, %v3204_v42  ;;  %v3219_v11 = vand.u32 4294901760, %v6086_v53  ;;  %v7875_v33 = vpack.c.bf16 %v10678_v61, %v10677_v18 }
 0x167   : > { %v7871_v63 = vpack.c.bf16 %v10675_v48, %v10674_v24  ;;  %v9781_v47 = vpack.c.bf16 %v3210_v50, %v3207_v22  ;;  %v9795_v36 = vsub.f32 %v6083_v1, %v3210_v50  ;;  %v3875_v35 = vsel %vm337_vm0, %v3873_v39, %v3840_v25  ;;  %v3850_v48 = vpop.permute.xlu1 %3849 }
 0x168   : > { %7794 = vmatpush3.bf16.msra.mxu0 %v9443_v2  ;;  %v6084_v2 = vld [vmem:[%s10584_s2 + $0x110] sm:$0xff]  ;;  %v3302_v25 = vand.u32 4294901760, %v9793_v4  ;;  %v3877_v1 = vsel %vm427_vm4, %v3875_v35, %v3848_v49  ;;  %v9828_v21 = vsub.f32 %v6086_v53, %v3219_v11  ;;  %v9833_v10 = vsub.f32 %v3204_v42, %v9811_v37  ;;  %v3864_v49 = vpop.permute.xlu0 %3863 }
 0x169   : > { %7862 = vmatpush3.bf16.msra.mxu1 %v9612_v3  ;;  %7796 = vmatprep.subr.bf16.mxu0 %v9463_v28  ;;  %v3213_v32 = vand.u32 4294901760, %v6084_v2  ;;  %v3309_v8 = vand.u32 4294901760, %v9795_v36  ;;  %v9852_v55 = vpack.c.bf16 %v3228_v12, %v3225_v14  ;;  %v9863_v54 = vsub.f32 %v6088_v16, %v3225_v14 }
 0x16a   : > { %7864 = vmatprep.subr.bf16.mxu1 %v9620_v26  ;;  %v3330_v60 = vand.u32 4294901760, %v9828_v21  ;;  %v3291_v23 = vand.u32 4294901760, %v9833_v10  ;;  %v3872_v24 = vsel %vm419_vm2, %v3870_v58, %v9319_v27  ;;  %v9870_v39 = vsub.f32 %v6089_v41, %v3228_v12 }
 0x16b   : > { %v9797_v19 = vsub.f32 %v6084_v2, %v3213_v32  ;;  %v9814_v15 = vpack.c.bf16 %v3216_v20, %v3213_v32  ;;  %v3303_v2 = vsub.f32 %v9793_v4, %v3302_v25  ;;  %v3310_v34 = vsub.f32 %v9795_v36, %v3309_v8 }
 0x16c   : > { %7798 = vmatpush3.bf16.msra.mxu0 %v9463_v28  ;;  %v3282_v28 = vsub.f32 %v9740_v44, %v3281_v0  ;;  %v3344_v35 = vand.u32 4294901760, %v9863_v54 }
 0x16d   : > { %7866 = vmatpush3.bf16.msra.mxu1 %v9620_v26  ;;  %7800 = vmatprep.subr.bf16.mxu0 %v9476_v62  ;;  %v3316_v22 = vand.u32 4294901760, %v9797_v19  ;;  %v3304_v32 = vand.u32 4294901760, %v3303_v2  ;;  %v3311_v20 = vand.u32 4294901760, %v3310_v34 }
 0x16e   : > { %7868 = vmatprep.subr.bf16.mxu1 %v7867_v57  ;;  %v3283_v9 = vand.u32 4294901760, %v3282_v28  ;;  %v3874_v28 = vsel %vm422_vm3, %v3872_v24, %v9779_v29  ;;  %v6092_v24 = vld [vmem:[%s10584_s2 + $0x150] sm:$0xff] }
 0x16f   : > { %v7915_v16 = vpack.c.bf16 %v3311_v20, %v3304_v32  ;;  %v3876_v41 = vsel %vm337_vm0, %v3874_v28, %v3842_v5  ;;  %v9927_v32 = vpop.permute.xlu0 %4509 }
 0x170   : > { %7019 = vmatmul.mubr.f32.vlgmr.msra.gmra.mrb[2].mxu1 %v10676_v45  ;;  %7802 = vmatpush3.bf16.msra.mxu0 %v9476_v62  ;;  %v3222_v62 = vand.u32 4294901760, %v6087_v52  ;;  %v3292_v45 = vsub.f32 %v9833_v10, %v3291_v23  ;;  %v3878_v14 = vsel %vm427_vm4, %v3876_v41, %v3850_v48  ;;  %v6093_v48 = vld [vmem:[%s10584_s2 + $0x158] sm:$0xff]  ;;  %v7931_v41 = vpack.c.bf16 %v9795_v36, %v9793_v4 }
 0x171   : > { %7870 = vmatpush3.bf16.msra.mxu1 %v7867_v57  ;;  %7037 = vmatprep.mubr.f32.mxu1 %v9517_v38  ;;  %v3879_v57 = vsel %vm430_vm5, %v3877_v1, %v3856_v56  ;;  %v3351_v56 = vand.u32 4294901760, %v9870_v39  ;;  %v3345_v1 = vsub.f32 %v9863_v54, %v3344_v35  ;;  %v7967_v4 = vpack.c.bf16 %v3323_v17, %v3316_v22 }
 0x172   : > { %7872 = vmatprep.subr.bf16.mxu1 %v7871_v63  ;;  %7900 = vmatprep.subr.bf16.mxu0 %v9781_v47  ;;  %v9830_v50 = vsub.f32 %v6087_v52, %v3222_v62  ;;  %v9840_v46 = vpack.c.bf16 %v3222_v62, %v3219_v11  ;;  %v3331_v52 = vsub.f32 %v9828_v21, %v3330_v60  ;;  %v3858_v11 = vpop.permute.xlu1 %3857  ;;  %v3293_v61 = vand.u32 4294901760, %v3292_v45 }
 0x173   : > { %6943 = vmatmul.mubr.f32.vlgmr.msra.gmra.mrb[2].mxu0 %v9439_v31  ;;  %v7879_v31 = vpack.c.bf16 %v2656_v59, %v2649_v43  ;;  %v3317_v43 = vsub.f32 %v9797_v19, %v3316_v22  ;;  %v3324_v59 = vsub.f32 %v9809_v7, %v3323_v17  ;;  %v3352_v5 = vsub.f32 %v9870_v39, %v3351_v56 }
 0x174   : > { %7902 = vmatpush3.bf16.msra.mxu0 %v9781_v47  ;;  %7075 = vmatprep.mubr.f32.mxu0 %v3283_v9  ;;  %v3337_v51 = vand.u32 4294901760, %v9830_v50  ;;  %v3332_v18 = vand.u32 4294901760, %v3331_v52 }
 0x175   : > { %7874 = vmatpush3.bf16.msra.mxu1 %v7871_v63  ;;  %7904 = vmatprep.subr.bf16.mxu0 %v9814_v15  ;;  %v3881_v63 = vsel %vm433_vm6, %v3879_v57, %v3864_v49  ;;  %v3318_v42 = vand.u32 4294901760, %v3317_v43  ;;  %v3325_v27 = vand.u32 4294901760, %v3324_v59  ;;  %v3346_v49 = vand.u32 4294901760, %v3345_v1 }
 0x176   : > { %7876 = vmatprep.subr.bf16.mxu1 %v7875_v33  ;;  %v3892_v53 = vsel %vm444_vm7, %v3881_v63, 0  ;;  %v3338_v29 = vsub.f32 %v9830_v50, %v3337_v51  ;;  %v3866_v58 = vpop.permute.xlu1 %3865  ;;  %v3353_v2 = vand.u32 4294901760, %v3352_v5 }
 0x177   : > { %v9890_v62 = vand.u32 4294901760, %v3892_v53  ;;  %v7919_v9 = vpack.c.bf16 %v3325_v27, %v3318_v42  ;;  %v3907_v27 = vand.u32 4294901760, %v6093_v48 }
 0x178   : > { %7906 = vmatpush3.bf16.msra.mxu0 %v9814_v15  ;;  %v7927_v20 = vpack.c.bf16 %v3353_v2, %v3346_v49 }
 0x179   : > { %7878 = vmatpush3.bf16.msra.mxu1 %v7875_v33  ;;  %7908 = vmatprep.subr.bf16.mxu0 %v9840_v46  ;;  %v3339_v33 = vand.u32 4294901760, %v3338_v29  ;;  %v9905_v12 = vsub.f32 %v3892_v53, %v9890_v62  ;;  %v3904_v53 = vand.u32 4294901760, %v6092_v24  ;;  %v6095_v29 = vld [vmem:[%s10584_s2 + $0x168] sm:$0xff] }
 0x17a   : > { %7880 = vmatprep.subr.bf16.mxu1 %v7879_v31 }
 0x17b   : > { %v7923_v57 = vpack.c.bf16 %v3339_v33, %v3332_v18  ;;  %v10630_v59 = vand.u32 4294901760, %v9905_v12  ;;  %v9958_v33 = vsub.f32 %v6093_v48, %v3907_v27 }
 0x17c   : > { %7910 = vmatpush3.bf16.msra.mxu0 %v9840_v46 }
 0x17d   : > { %7882 = vmatpush3.bf16.msra.mxu1 %v7879_v31  ;;  %7912 = vmatprep.subr.bf16.mxu0 %v9852_v55  ;;  %v3880_v31 = vsel %vm430_vm5, %v3878_v14, %v3858_v11  ;;  %v3973_v45 = vsub.f32 %v9905_v12, %v10630_v59  ;;  %v6096_v11 = vld [vmem:[%s10584_s2 + $0x170] sm:$0xff]  ;;  %v3913_v14 = vand.u32 4294901760, %v6095_v29 }
 0x17e   : > { %7884 = vmatprep.subr.bf16.mxu1 %v9560_v6 }
 0x180   : > { %7038 = vmatmul.mubr.f32.vlgmr.msra.gmra.mrb[2].mxu1 %v9587_v30  ;;  %7914 = vmatpush3.bf16.msra.mxu0 %v9852_v55 }
 0x181   : > { %7886 = vmatpush3.bf16.msra.mxu1 %v9560_v6  ;;  %7056 = vmatprep.mubr.f32.mxu1 %v9517_v38  ;;  %v6090_v38 = vld [vmem:[%s10584_s2 + $0x140] sm:$0xff]  ;;  %v6091_v6 = vld [vmem:[%s10584_s2 + $0x148] sm:$0xff] }
 0x182   : > { %7888 = vmatprep.subr.bf16.mxu1 %v9590_v40  ;;  %7916 = vmatprep.subr.bf16.mxu0 %v7915_v16  ;;  %v3898_v34 = vand.u32 4294901760, %v6090_v38  ;;  %v3901_v43 = vand.u32 4294901760, %v6091_v6 }
 0x183   : > { %7076 = vmatmul.mubr.f32.vlgmr.msra.gmra.mrb[4].mxu0 %v3293_v61  ;;  %v9956_v61 = vsub.f32 %v6092_v24, %v3904_v53 }
 0x184   : > { %7918 = vmatpush3.bf16.msra.mxu0 %v7915_v16  ;;  %7094 = vmatprep.mubr.f32.mxu0 %v9729_v13  ;;  %v9925_v63 = vsub.f32 %v6090_v38, %v3898_v34  ;;  %v9930_v42 = vsub.f32 %v6091_v6, %v3901_v43  ;;  %v9933_v28 = vpack.c.bf16 %v3901_v43, %v3898_v34  ;;  %v9965_v38 = vpop.permute.xlu0 %4511  ;;  %v3974_v6 = vand.u32 4294901760, %v3973_v45 }
 0x185   : > { %7890 = vmatpush3.bf16.msra.mxu1 %v9590_v40  ;;  %7920 = vmatprep.subr.bf16.mxu0 %v7919_v9  ;;  %v3882_v40 = vsel %vm433_vm6, %v3880_v31, %v3866_v58  ;;  %v7935_v31 = vpack.c.bf16 %v9809_v7, %v9797_v19  ;;  %v3916_v58 = vand.u32 4294901760, %v6096_v11  ;;  %v10626_v34 = vand.u32 4294901760, %v9956_v61 }
 0x186   : > { %7892 = vmatprep.subr.bf16.mxu1 %v9612_v3  ;;  %v3895_v52 = vsel %vm444_vm7, %v3882_v40, 0  ;;  %v10629_v16 = vand.u32 4294901760, %v9925_v63  ;;  %v10628_v18 = vand.u32 4294901760, %v9930_v42  ;;  %v9987_v40 = vsub.f32 %v6095_v29, %v3913_v14 }
 0x187   : > { %v9960_v1 = vand.u32 4294901760, %v3895_v52  ;;  %v7971_v19 = vpack.c.bf16 %v3337_v51, %v3330_v60 }
 0x188   : > { %7922 = vmatpush3.bf16.msra.mxu0 %v7919_v9  ;;  %v6097_v9 = vld [vmem:[%s10584_s2 + $0x178] sm:$0xff]  ;;  %v3994_v49 = vsub.f32 %v9925_v63, %v10629_v16  ;;  %v4001_v2 = vsub.f32 %v9930_v42, %v10628_v18 }
 0x189   : > { %7894 = vmatpush3.bf16.msra.mxu1 %v9612_v3  ;;  %7924 = vmatprep.subr.bf16.mxu0 %v7923_v57  ;;  %v6094_v3 = vld [vmem:[%s10584_s2 + $0x160] sm:$0xff]  ;;  %v9982_v24 = vsub.f32 %v3895_v52, %v9960_v1  ;;  %v9995_v52 = vpop.permute.xlu0 %4525 }
 0x18a   : > { %7896 = vmatprep.subr.bf16.mxu1 %v9620_v26  ;;  %v3910_v5 = vand.u32 4294901760, %v6094_v3  ;;  %v4002_v45 = vand.u32 4294901760, %v4001_v2  ;;  %v4518_v2 = vpop.permute.xlu1 %4517 }
 0x18c   : > { %7926 = vmatpush3.bf16.msra.mxu0 %v7923_v57  ;;  %v3919_v57 = vand.u32 4294901760, %v6097_v9  ;;  %v9979_v43 = vsub.f32 %v6094_v3, %v3910_v5  ;;  %v9985_v48 = vpack.c.bf16 %v3913_v14, %v3910_v5  ;;  %v4008_v3 = vsub.f32 %v9956_v61, %v10626_v34 }
 0x18d   : > { %7898 = vmatpush3.bf16.msra.mxu1 %v9620_v26  ;;  %7928 = vmatprep.subr.bf16.mxu0 %v7927_v20  ;;  %v9963_v26 = vpack.c.bf16 %v3907_v27, %v3904_v53  ;;  %v3995_v27 = vand.u32 4294901760, %v3994_v49  ;;  %v10633_v5 = vand.u32 4294901760, %v9982_v24  ;;  %v10632_v14 = vand.u32 4294901760, %v9987_v40 }
 0x18e   : > { %7996 = vmatprep.subr.bf16.mxu1 %v9933_v28  ;;  %v9993_v53 = vpack.c.bf16 %v3919_v57, %v3916_v58  ;;  %v10010_v49 = vsub.f32 %v6097_v9, %v3919_v57  ;;  %v7943_v34 = vpack.c.bf16 %v9870_v39, %v9863_v54  ;;  %v4009_v18 = vand.u32 4294901760, %v4008_v3  ;;  %v4534_v57 = vpop.permute.xlu0 %4533  ;;  %v10028_v3 = vpop.permute.xlu1 %4519 }
 0x18f   : > { %v4029_v9 = vsub.f32 %v9987_v40, %v10632_v14  ;;  %v8035_v36 = vpack.c.bf16 %v9987_v40, %v9979_v43  ;;  %v10679_v39 = vand.u32 4294901760, %v9905_v12 }
 0x190   : > { %7057 = vmatmul.mubr.f32.vlgmr.msra.gmra.mrb[2].mxu1 %v9587_v30  ;;  %7930 = vmatpush3.bf16.msra.mxu0 %v7927_v20  ;;  %v10627_v30 = vand.u32 4294901760, %v9958_v33  ;;  %v7939_v20 = vpack.c.bf16 %v9830_v50, %v9828_v21  ;;  %v7975_v50 = vpack.c.bf16 %v3351_v56, %v3344_v35 }
 0x191   : > { %7998 = vmatpush3.bf16.msra.mxu1 %v9933_v28  ;;  %7189 = vmatprep.mubr.f32.mxu1 %v3974_v6  ;;  %v10008_v6 = vsub.f32 %v6096_v11, %v3916_v58  ;;  %v3983_v11 = vsub.f32 %v9982_v24, %v10633_v5  ;;  %v4042_v58 = vand.u32 4294901760, %v10010_v49 }
 0x192   : > { %7932 = vmatprep.subr.bf16.mxu0 %v7931_v41  ;;  %8000 = vmatprep.subr.bf16.mxu1 %v9963_v26  ;;  %v4015_v29 = vsub.f32 %v9958_v33, %v10627_v30  ;;  %v8011_v30 = vpack.c.bf16 %v4002_v45, %v3995_v27 }
 0x193   : > { %7095 = vmatmul.mubr.f32.vlgmr.msra.gmra.mrb[4].mxu0 %v9811_v37  ;;  %v4043_v5 = vsub.f32 %v10010_v49, %v4042_v58  ;;  %v8039_v17 = vpack.c.bf16 %v10010_v49, %v10008_v6 }
 0x194   : > { %7934 = vmatpush3.bf16.msra.mxu0 %v7931_v41  ;;  %7113 = vmatprep.mubr.f32.mxu0 %v9740_v44  ;;  %v10631_v41 = vand.u32 4294901760, %v9979_v43  ;;  %v4016_v16 = vand.u32 4294901760, %v4015_v29  ;;  %v3984_v29 = vand.u32 4294901760, %v3983_v11  ;;  %v4528_v11 = vpop.permute.xlu1 %4527  ;;  %v8027_v44 = vpack.c.bf16 %v9930_v42, %v9925_v63 }
 0x195   : > { %8002 = vmatpush3.bf16.msra.mxu1 %v9963_v26  ;;  %7936 = vmatprep.subr.bf16.mxu0 %v7935_v31 }
 0x196   : > { %8004 = vmatprep.subr.bf16.mxu1 %v9985_v48  ;;  %v4022_v59 = vsub.f32 %v9979_v43, %v10631_v41  ;;  %v8015_v27 = vpack.c.bf16 %v4016_v16, %v4009_v18  ;;  %v4030_v41 = vand.u32 4294901760, %v4029_v9  ;;  %v4044_v18 = vand.u32 4294901760, %v4043_v5  ;;  %v4497_v9 = vld [vmem:[#allocation3 + $0x3] sm:$0xff] }
 0x197   : > { %v4563_v5 = vsel %vm416_vm1, %v9927_v32, %v4518_v2  ;;  %v8031_v32 = vpack.c.bf16 %v9958_v33, %v9956_v61 }
 0x198   : > { %7938 = vmatpush3.bf16.msra.mxu0 %v7935_v31  ;;  %v4035_v31 = vand.u32 4294901760, %v10008_v6  ;;  %v4023_v45 = vand.u32 4294901760, %v4022_v59 }
 0x199   : > { %8006 = vmatpush3.bf16.msra.mxu1 %v9985_v48  ;;  %7940 = vmatprep.subr.bf16.mxu0 %v7939_v20 }
 0x19a   : > { %8008 = vmatprep.subr.bf16.mxu1 %v9993_v53  ;;  %v4036_v14 = vsub.f32 %v10008_v6, %v4035_v31  ;;  %v8019_v59 = vpack.c.bf16 %v4030_v41, %v4023_v45  ;;  %v4536_v41 = vpop.permute.xlu1 %4535 }
 0x19c   : > { %7942 = vmatpush3.bf16.msra.mxu0 %v7939_v20  ;;  %v4542_v20 = vpop.permute.xlu0 %4541  ;;  %v4037_v16 = vand.u32 4294901760, %v4036_v14  ;;  %v4565_v14 = vsel %vm419_vm2, %v4563_v5, %v9995_v52  ;;  %v4498_v52 = vld [vmem:[#allocation3 + $0xb] sm:$0xff]  ;;  %v10680_v5 = vand.u32 4294901760, %v9925_v63  ;;  %v10682_v63 = vand.u32 4294901760, %v9956_v61 }
 0x19d   : > { %8010 = vmatpush3.bf16.msra.mxu1 %v9993_v53  ;;  %7944 = vmatprep.subr.bf16.mxu0 %v7943_v34  ;;  %v4567_v45 = vsel %vm422_vm3, %v4565_v14, %v4497_v9  ;;  %v6102_v61 = vld [vmem:[%s10584_s2 + $0x1a0] sm:$0xff] }
 0x19e   : > { %8012 = vmatprep.subr.bf16.mxu1 %v8011_v30  ;;  %v4544_v2 = vpop.permute.xlu1 %4543 }
 0x1a0   : > { %7190 = vmatmul.mubr.f32.vlgmr.msra.gmra.mrb[4].mxu1 %v3984_v29  ;;  %7946 = vmatpush3.bf16.msra.mxu0 %v7943_v34  ;;  %v8023_v34 = vpack.c.bf16 %v4044_v18, %v4037_v16  ;;  %v6098_v16 = vld [vmem:[%s10584_s2 + $0x180] sm:$0xff] }
 0x1a1   : > { %8014 = vmatpush3.bf16.msra.mxu1 %v8011_v30  ;;  %7208 = vmatprep.mubr.f32.mxu1 %v9890_v62  ;;  %v4550_v30 = vpop.permute.xlu0 %4549 }
 0x1a2   : > { %7948 = vmatprep.subr.bf16.mxu0 %v9781_v47  ;;  %8016 = vmatprep.subr.bf16.mxu1 %v8015_v27  ;;  %v4552_v7 = vpop.permute.xlu1 %4551 }
 0x1a3   : > { %7114 = vmatmul.mubr.f32.vlgmr.msra.gmra.mrb[4].mxu0 %v9833_v10 }
 0x1a4   : > { %7950 = vmatpush3.bf16.msra.mxu0 %v9781_v47  ;;  %7132 = vmatprep.mubr.f32.mxu0 %v3281_v0 }
 0x1a5   : > { %8018 = vmatpush3.bf16.msra.mxu1 %v8015_v27  ;;  %7952 = vmatprep.subr.bf16.mxu0 %v9814_v15  ;;  %v4558_v0 = vpop.permute.xlu0 %4557  ;;  %v7963_v27 = vpack.c.bf16 %v3309_v8, %v3302_v25  ;;  %v4569_v8 = vsel %vm337_vm0, %v4567_v45, %v4534_v57 }
 0x1a6   : > { %8020 = vmatprep.subr.bf16.mxu1 %v8019_v59  ;;  %v4571_v22 = vsel %vm427_vm4, %v4569_v8, %v4542_v20  ;;  %v4560_v60 = vpop.permute.xlu1 %4559 }
 0x1a7   : > { %v4573_v21 = vsel %vm430_vm5, %v4571_v22, %v4550_v30 }
 0x1a8   : > { %7954 = vmatpush3.bf16.msra.mxu0 %v9814_v15  ;;  %v4575_v57 = vsel %vm433_vm6, %v4573_v21, %v4558_v0 }
 0x1a9   : > { %8022 = vmatpush3.bf16.msra.mxu1 %v8019_v59  ;;  %7956 = vmatprep.subr.bf16.mxu0 %v9840_v46  ;;  %v5202_v25 = vpop.permute.xlu0 %5201  ;;  %v4587_v54 = vsel %vm444_vm7, %v4575_v57, 0 }
 0x1aa   : > { %8024 = vmatprep.subr.bf16.mxu1 %v8023_v34  ;;  %v5210_v35 = vpop.permute.xlu1 %5209  ;;  %v10100_v29 = vand.u32 4294901760, %v4587_v54 }
 0x1ac   : > { %7958 = vmatpush3.bf16.msra.mxu0 %v9840_v46 }
 0x1ad   : > { %8026 = vmatpush3.bf16.msra.mxu1 %v8023_v34  ;;  %7960 = vmatprep.subr.bf16.mxu0 %v9852_v55  ;;  %v10080_v10 = vpop.permute.xlu0 %5203  ;;  %v4593_v34 = vand.u32 4294901760, %v6098_v16 }
 0x1ae   : > { %8028 = vmatprep.subr.bf16.mxu1 %v8027_v44  ;;  %v10121_v18 = vpop.permute.xlu1 %5211 }
 0x1b0   : > { %7209 = vmatmul.mubr.f32.vlgmr.msra.gmra.mrb[4].mxu1 %v9960_v1  ;;  %7962 = vmatpush3.bf16.msra.mxu0 %v9852_v55 }
 0x1b1   : > { %8030 = vmatpush3.bf16.msra.mxu1 %v8027_v44  ;;  %7227 = vmatprep.mubr.f32.mxu1 %v9905_v12  ;;  %v10111_v12 = vsub.f32 %v4587_v54, %v10100_v29  ;;  %v10681_v44 = vand.u32 4294901760, %v9930_v42  ;;  %v10683_v42 = vand.u32 4294901760, %v9958_v33  ;;  %v6103_v33 = vld [vmem:[%s10584_s2 + $0x1a8] sm:$0xff]  ;;  %v10685_v54 = vand.u32 4294901760, %v9979_v43 }
 0x1b2   : > { %7964 = vmatprep.subr.bf16.mxu0 %v7963_v27  ;;  %8032 = vmatprep.subr.bf16.mxu1 %v8031_v32  ;;  %v10148_v45 = vpop.permute.xlu1 %5219 }
 0x1b3   : > { %7133 = vmatmul.mubr.f32.vlgmr.msra.gmra.mrb[4].mxu0 %v3291_v23  ;;  %v4564_v23 = vsel %vm416_vm1, %v9965_v38, %v10028_v3  ;;  %v5218_v38 = vpop.permute.xlu0 %5217  ;;  %v8059_v0 = vpack.c.bf16 %v10681_v44, %v10680_v5  ;;  %v4667_v9 = vand.u32 4294901760, %v10111_v12  ;;  %v5256_v5 = vsel %vm416_vm1, %v10080_v10, %v10121_v18 }
 0x1b4   : > { %7966 = vmatpush3.bf16.msra.mxu0 %v7963_v27  ;;  %7151 = vmatprep.mubr.f32.mxu0 %v9729_v13  ;;  %v4566_v51 = vsel %vm419_vm2, %v4564_v23, %v4528_v11  ;;  %v6101_v27 = vld [vmem:[%s10584_s2 + $0x198] sm:$0xff]  ;;  %v10684_v23 = vand.u32 4294901760, %v9982_v24 }
 0x1b5   : > { %8034 = vmatpush3.bf16.msra.mxu1 %v8031_v32  ;;  %7968 = vmatprep.subr.bf16.mxu0 %v7967_v4  ;;  %v4568_v3 = vsel %vm422_vm3, %v4566_v51, %v4498_v52  ;;  %v4602_v8 = vand.u32 4294901760, %v6101_v27  ;;  %v6105_v51 = vld [vmem:[%s10584_s2 + $0x1b8] sm:$0xff] }
 0x1b6   : > { %8036 = vmatprep.subr.bf16.mxu1 %v8035_v36  ;;  %v4570_v56 = vsel %vm337_vm0, %v4568_v3, %v4536_v41 }
 0x1b7   : > { %v5226_v20 = vpop.permute.xlu0 %5225  ;;  %v4572_v59 = vsel %vm427_vm4, %v4570_v56, %v4544_v2  ;;  %v8063_v2 = vpack.c.bf16 %v10683_v42, %v10682_v63  ;;  %v5190_v63 = vld [vmem:[#allocation3 + $0x13] sm:$0xff] }
 0x1b8   : > { %7970 = vmatpush3.bf16.msra.mxu0 %v7967_v4  ;;  %v4574_v11 = vsel %vm430_vm5, %v4572_v59, %v4552_v7  ;;  %v10163_v7 = vsub.f32 %v6098_v16, %v4593_v34  ;;  %v5228_v59 = vpop.permute.xlu1 %5227 }
 0x1b9   : > { %8038 = vmatpush3.bf16.msra.mxu1 %v8035_v36  ;;  %7972 = vmatprep.subr.bf16.mxu0 %v7971_v19  ;;  %v4576_v32 = vsel %vm433_vm6, %v4574_v11, %v4560_v60  ;;  %v6104_v60 = vld [vmem:[%s10584_s2 + $0x1b0] sm:$0xff] }
 0x1ba   : > { %8040 = vmatprep.subr.bf16.mxu1 %v8039_v17  ;;  %v4688_v56 = vand.u32 4294901760, %v10163_v7 }
 0x1bb   : > { %v5234_v14 = vpop.permute.xlu0 %5233 }
 0x1bc   : > { %7974 = vmatpush3.bf16.msra.mxu0 %v7971_v19  ;;  %v4590_v19 = vsel %vm444_vm7, %v4576_v32, 0  ;;  %v5258_v32 = vsel %vm419_vm2, %v5256_v5, %v10148_v45  ;;  %v5236_v42 = vpop.permute.xlu1 %5235 }
 0x1bd   : > { %8042 = vmatpush3.bf16.msra.mxu1 %v8039_v17  ;;  %7976 = vmatprep.subr.bf16.mxu0 %v7975_v50  ;;  %v10181_v57 = vand.u32 4294901760, %v4590_v19 }
 0x1be   : > { %8044 = vmatprep.subr.bf16.mxu1 %v9933_v28 }
 0x1c0   : > { %7228 = vmatmul.mubr.f32.vlgmr.msra.gmra.mrb[4].mxu1 %v9982_v24  ;;  %7978 = vmatpush3.bf16.msra.mxu0 %v7975_v50  ;;  %v5242_v50 = vpop.permute.xlu0 %5241 }
 0x1c1   : > { %8046 = vmatpush3.bf16.msra.mxu1 %v9933_v28  ;;  %7246 = vmatprep.mubr.f32.mxu1 %v10679_v39  ;;  %v10686_v39 = vand.u32 4294901760, %v9987_v40 }
 0x1c2   : > { %7980 = vmatprep.subr.bf16.mxu0 %v9781_v47  ;;  %8048 = vmatprep.subr.bf16.mxu1 %v9963_v26 }
 0x1c3   : > { %7152 = vmatmul.mubr.f32.vlgmr.msra.gmra.mrb[4].mxu0 %v9811_v37 }
 0x1c4   : > { %7982 = vmatpush3.bf16.msra.mxu0 %v9781_v47  ;;  %7170 = vmatprep.mubr.f32.mxu0 %v9729_v13  ;;  %v6099_v13 = vld [vmem:[%s10584_s2 + $0x188] sm:$0xff]  ;;  %v5255_v47 = vsel %vm416_vm1, %v5202_v25, %v5210_v35  ;;  %v8067_v35 = vpack.c.bf16 %v10686_v39, %v10685_v54 }
 0x1c5   : > { %8050 = vmatpush3.bf16.msra.mxu1 %v9963_v26  ;;  %7984 = vmatprep.subr.bf16.mxu0 %v9814_v15  ;;  %v4596_v30 = vand.u32 4294901760, %v6099_v13  ;;  %v5257_v41 = vsel %vm419_vm2, %v5255_v47, %v5218_v38  ;;  %v4605_v38 = vand.u32 4294901760, %v6102_v61  ;;  %v4614_v47 = vand.u32 4294901760, %v6105_v51 }
 0x1c6   : > { %8052 = vmatprep.subr.bf16.mxu1 %v9985_v48  ;;  %v5259_v4 = vsel %vm422_vm3, %v5257_v41, %v4498_v52  ;;  %v10179_v52 = vsub.f32 %v6101_v27, %v4602_v8 }
 0x1c7   : > { %v10151_v36 = vpack.c.bf16 %v4596_v30, %v4593_v34  ;;  %v10165_v22 = vsub.f32 %v6099_v13, %v4596_v30  ;;  %v5261_v21 = vsel %vm337_vm0, %v5259_v4, %v5226_v20  ;;  %v4611_v13 = vand.u32 4294901760, %v6104_v60 }
 0x1c8   : > { %7986 = vmatpush3.bf16.msra.mxu0 %v9814_v15  ;;  %v6100_v15 = vld [vmem:[%s10584_s2 + $0x190] sm:$0xff]  ;;  %v5263_v16 = vsel %vm427_vm4, %v5261_v21, %v5234_v14  ;;  %v4709_v43 = vand.u32 4294901760, %v10179_v52  ;;  %v10198_v40 = vsub.f32 %v6102_v61, %v4605_v38  ;;  %v10203_v30 = vsub.f32 %v4590_v19, %v10181_v57 }
 0x1c9   : > { %8054 = vmatpush3.bf16.msra.mxu1 %v9985_v48  ;;  %7988 = vmatprep.subr.bf16.mxu0 %v9840_v46  ;;  %v4599_v25 = vand.u32 4294901760, %v6100_v15  ;;  %v4695_v20 = vand.u32 4294901760, %v10165_v22  ;;  %v5265_v44 = vsel %vm430_vm5, %v5263_v16, %v5242_v50  ;;  %v4689_v14 = vsub.f32 %v10163_v7, %v4688_v56 }
 0x1ca   : > { %8056 = vmatprep.subr.bf16.mxu1 %v9993_v53  ;;  %v10222_v49 = vpack.c.bf16 %v4614_v47, %v4611_v13  ;;  %v4716_v10 = vand.u32 4294901760, %v10198_v40  ;;  %v4677_v27 = vand.u32 4294901760, %v10203_v30  ;;  %v10240_v4 = vsub.f32 %v6105_v51, %v4614_v47 }
 0x1cb   : > { %v10167_v17 = vsub.f32 %v6100_v15, %v4599_v25  ;;  %v10184_v24 = vpack.c.bf16 %v4602_v8, %v4599_v25  ;;  %v4696_v6 = vsub.f32 %v10165_v22, %v4695_v20  ;;  %v10233_v15 = vsub.f32 %v6104_v60, %v4611_v13 }
 0x1cc   : > { %7990 = vmatpush3.bf16.msra.mxu0 %v9840_v46  ;;  %v4668_v46 = vsub.f32 %v10111_v12, %v4667_v9  ;;  %v4690_v25 = vand.u32 4294901760, %v4689_v14  ;;  %v4737_v60 = vand.u32 4294901760, %v10240_v4 }
 0x1cd   : > { %8058 = vmatpush3.bf16.msra.mxu1 %v9993_v53  ;;  %7992 = vmatprep.subr.bf16.mxu0 %v9852_v55  ;;  %v4702_v11 = vand.u32 4294901760, %v10167_v17  ;;  %v4697_v8 = vand.u32 4294901760, %v4696_v6  ;;  %v4730_v50 = vand.u32 4294901760, %v10233_v15 }
 0x1ce   : > { %8060 = vmatprep.subr.bf16.mxu1 %v8059_v0  ;;  %v4669_v3 = vand.u32 4294901760, %v4668_v46  ;;  %v5260_v46 = vsel %vm422_vm3, %v5258_v32, %v5190_v63 }
 0x1cf   : > { %v8107_v51 = vpack.c.bf16 %v4697_v8, %v4690_v25  ;;  %v4731_v13 = vsub.f32 %v10233_v15, %v4730_v50 }
 0x1d0   : > { %7247 = vmatmul.mubr.f32.vlgmr.msra.gmra.mrb[4].mxu1 %v10684_v23  ;;  %7994 = vmatpush3.bf16.msra.mxu0 %v9852_v55  ;;  %v4608_v55 = vand.u32 4294901760, %v6103_v33  ;;  %v4678_v23 = vsub.f32 %v10203_v30, %v4677_v27 }
 0x1d1   : > { %8062 = vmatpush3.bf16.msra.mxu1 %v8059_v0  ;;  %7265 = vmatprep.mubr.f32.mxu1 %v9890_v62  ;;  %v5250_v0 = vpop.permute.xlu0 %5249  ;;  %v4732_v14 = vand.u32 4294901760, %v4731_v13 }
 0x1d2   : > { %8064 = vmatprep.subr.bf16.mxu1 %v8063_v2  ;;  %8092 = vmatprep.subr.bf16.mxu0 %v10151_v36  ;;  %v10200_v34 = vsub.f32 %v6103_v33, %v4608_v55  ;;  %v10210_v41 = vpack.c.bf16 %v4608_v55, %v4605_v38  ;;  %v4717_v33 = vsub.f32 %v10198_v40, %v4716_v10  ;;  %v5244_v55 = vpop.permute.xlu1 %5243 }
 0x1d3   : > { %7171 = vmatmul.mubr.f32.vlgmr.msra.gmra.mrb[4].mxu0 %v9811_v37  ;;  %v8071_v37 = vpack.c.bf16 %v4042_v58, %v4035_v31  ;;  %v4703_v31 = vsub.f32 %v10167_v17, %v4702_v11  ;;  %v4710_v58 = vsub.f32 %v10179_v52, %v4709_v43  ;;  %v5262_v38 = vsel %vm337_vm0, %v5260_v46, %v5228_v59 }
 0x1d4   : > { %8094 = vmatpush3.bf16.msra.mxu0 %v10151_v36  ;;  %7303 = vmatprep.mubr.f32.mxu0 %v4669_v3  ;;  %v4723_v18 = vand.u32 4294901760, %v10200_v34  ;;  %v4718_v39 = vand.u32 4294901760, %v4717_v33  ;;  %v4738_v59 = vsub.f32 %v10240_v4, %v4737_v60  ;;  %v5264_v47 = vsel %vm427_vm4, %v5262_v38, %v5236_v42 }
 0x1d5   : > { %8066 = vmatpush3.bf16.msra.mxu1 %v8063_v2  ;;  %8096 = vmatprep.subr.bf16.mxu0 %v10184_v24  ;;  %v5267_v2 = vsel %vm433_vm6, %v5265_v44, %v5250_v0  ;;  %v4704_v19 = vand.u32 4294901760, %v4703_v31  ;;  %v4711_v45 = vand.u32 4294901760, %v4710_v58  ;;  %v5266_v5 = vsel %vm430_vm5, %v5264_v47, %v5244_v55 }
 0x1d6   : > { %8068 = vmatprep.subr.bf16.mxu1 %v8067_v35  ;;  %v5278_v61 = vsel %vm444_vm7, %v5267_v2, 0  ;;  %v4724_v21 = vsub.f32 %v10200_v34, %v4723_v18  ;;  %v5252_v44 = vpop.permute.xlu1 %5251  ;;  %v4739_v6 = vand.u32 4294901760, %v4738_v59  ;;  %v6108_v2 = vld [vmem:[%s10584_s2 + $0x1d0] sm:$0xff]  ;;  %v8123_v55 = vpack.c.bf16 %v10165_v22, %v10163_v7 }
 0x1d7   : > { %v10259_v3 = vand.u32 4294901760, %v5278_v61  ;;  %v8111_v54 = vpack.c.bf16 %v4711_v45, %v4704_v19  ;;  %v5268_v25 = vsel %vm433_vm6, %v5266_v5, %v5252_v44  ;;  %v5290_v45 = vand.u32 4294901760, %v6108_v2 }
 0x1d8   : > { %8098 = vmatpush3.bf16.msra.mxu0 %v10184_v24  ;;  %v4725_v16 = vand.u32 4294901760, %v4724_v21  ;;  %v8119_v19 = vpack.c.bf16 %v4739_v6, %v4732_v14  ;;  %v8127_v5 = vpack.c.bf16 %v10179_v52, %v10167_v17  ;;  %v8163_v22 = vpack.c.bf16 %v4723_v18, %v4716_v10 }
 0x1d9   : > { %8070 = vmatpush3.bf16.msra.mxu1 %v8067_v35  ;;  %8100 = vmatprep.subr.bf16.mxu0 %v10210_v41  ;;  %v4679_v35 = vand.u32 4294901760, %v4678_v23  ;;  %v5281_v23 = vsel %vm444_vm7, %v5268_v25, 0  ;;  %v8167_v52 = vpack.c.bf16 %v4737_v60, %v4730_v50 }
 0x1da   : > { %8072 = vmatprep.subr.bf16.mxu1 %v8071_v37  ;;  %v8115_v0 = vpack.c.bf16 %v4725_v16, %v4718_v39  ;;  %v6113_v39 = vld [vmem:[%s10584_s2 + $0x1f8] sm:$0xff]  ;;  %v10325_v16 = vsub.f32 %v6108_v2, %v5290_v45  ;;  %v10329_v59 = vand.u32 4294901760, %v5281_v23 }
 0x1dc   : > { %8102 = vmatpush3.bf16.msra.mxu0 %v10210_v41 }
 0x1dd   : > { %8074 = vmatpush3.bf16.msra.mxu1 %v8071_v37  ;;  %8104 = vmatprep.subr.bf16.mxu0 %v10222_v49  ;;  %v10274_v37 = vsub.f32 %v5278_v61, %v10259_v3 }
 0x1de   : > { %8076 = vmatprep.subr.bf16.mxu1 %v9933_v28 }
 0x1df   : > { %v5358_v42 = vand.u32 4294901760, %v10274_v37 }
 0x1e0   : > { %7266 = vmatmul.mubr.f32.vlgmr.msra.gmra.mrb[4].mxu1 %v9960_v1  ;;  %8106 = vmatpush3.bf16.msra.mxu0 %v10222_v49 }
 0x1e1   : > { %8078 = vmatpush3.bf16.msra.mxu1 %v9933_v28  ;;  %7284 = vmatprep.mubr.f32.mxu1 %v9890_v62  ;;  %v6106_v62 = vld [vmem:[%s10584_s2 + $0x1c0] sm:$0xff]  ;;  %v6107_v28 = vld [vmem:[%s10584_s2 + $0x1c8] sm:$0xff]  ;;  %v5359_v21 = vsub.f32 %v10274_v37, %v5358_v42 }
 0x1e2   : > { %8080 = vmatprep.subr.bf16.mxu1 %v9963_v26  ;;  %8108 = vmatprep.subr.bf16.mxu0 %v8107_v51  ;;  %v5284_v58 = vand.u32 4294901760, %v6106_v62  ;;  %v5287_v32 = vand.u32 4294901760, %v6107_v28 }
 0x1e3   : > { %7304 = vmatmul.mubr.f32.vlgmr.msra.gmra.mrb[6].mxu0 %v4679_v35 }
 0x1e4   : > { %8110 = vmatpush3.bf16.msra.mxu0 %v8107_v51  ;;  %7322 = vmatprep.mubr.f32.mxu0 %v10100_v29  ;;  %v10296_v8 = vsub.f32 %v6106_v62, %v5284_v58  ;;  %v10299_v46 = vsub.f32 %v6107_v28, %v5287_v32  ;;  %v10302_v61 = vpack.c.bf16 %v5287_v32, %v5284_v58  ;;  %v6111_v51 = vld [vmem:[%s10584_s2 + $0x1e8] sm:$0xff]  ;;  %v5360_v28 = vand.u32 4294901760, %v5359_v21 }
 0x1e5   : > { %8082 = vmatpush3.bf16.msra.mxu1 %v9963_v26  ;;  %8112 = vmatprep.subr.bf16.mxu0 %v8111_v54  ;;  %v6109_v26 = vld [vmem:[%s10584_s2 + $0x1d8] sm:$0xff]  ;;  %v5299_v62 = vand.u32 4294901760, %v6111_v51  ;;  %v10349_v32 = vsub.f32 %v5281_v23, %v10329_v59 }
 0x1e6   : > { %v6716_v31 = vpop.f32.mrb[0].mxu0  ;;  %8084 = vmatprep.subr.bf16.mxu1 %v9985_v48  ;;  %v5293_v33 = vand.u32 4294901760, %v6109_v26  ;;  %v5379_v38 = vand.u32 4294901760, %v10296_v8  ;;  %v5386_v35 = vand.u32 4294901760, %v10299_v46 }
 0x1e7   : > { %1032 = vst.msk [vmem:[#allocation2 + $0x8] sm:$0xff] %vm416_vm1, %v6716_v31  ;;  %v1021_v63 = vpop.f32.mrb[1].mxu0  ;;  %v5393_v31 = vand.u32 4294901760, %v10325_v16  ;;  %v10354_v2 = vsub.f32 %v6111_v51, %v5299_v62 }
 0x1e8   : > { %1031 = vst.msk [vmem:[#allocation2] sm:$0xff] %vm416_vm1, %v1021_v63  ;;  %8114 = vmatpush3.bf16.msra.mxu0 %v8111_v54  ;;  %v6112_v54 = vld [vmem:[%s10584_s2 + $0x1f0] sm:$0xff]  ;;  %v10327_v13 = vsub.f32 %v6109_v26, %v5293_v33  ;;  %v5380_v14 = vsub.f32 %v10296_v8, %v5379_v38  ;;  %v5387_v6 = vsub.f32 %v10299_v46, %v5386_v35 }
 0x1e9   : > { %8086 = vmatpush3.bf16.msra.mxu1 %v9985_v48  ;;  %8116 = vmatprep.subr.bf16.mxu0 %v8115_v0  ;;  %v6110_v48 = vld [vmem:[%s10584_s2 + $0x1e0] sm:$0xff]  ;;  %v5302_v44 = vand.u32 4294901760, %v6112_v54  ;;  %v8131_v26 = vpack.c.bf16 %v10200_v34, %v10198_v40  ;;  %v10635_v51 = vand.u32 4294901760, %v10354_v2 }
 0x1ea   : > { %8088 = vmatprep.subr.bf16.mxu1 %v9993_v53  ;;  %v5296_v47 = vand.u32 4294901760, %v6110_v48 }
 0x1ec   : > { %8118 = vmatpush3.bf16.msra.mxu0 %v8115_v0  ;;  %v5305_v0 = vand.u32 4294901760, %v6113_v39  ;;  %v10346_v58 = vsub.f32 %v6110_v48, %v5296_v47  ;;  %v10352_v63 = vpack.c.bf16 %v5299_v62, %v5296_v47  ;;  %v5368_v48 = vand.u32 4294901760, %v10349_v32 }
 0x1ed   : > { %8090 = vmatpush3.bf16.msra.mxu1 %v9993_v53  ;;  %8120 = vmatprep.subr.bf16.mxu0 %v8119_v19  ;;  %v10332_v53 = vpack.c.bf16 %v5293_v33, %v5290_v45  ;;  %v5388_v45 = vand.u32 4294901760, %v5387_v6  ;;  %v5394_v33 = vsub.f32 %v10325_v16, %v5393_v31  ;;  %v8135_v62 = vpack.c.bf16 %v10240_v4, %v10233_v15 }
 0x1ee   : > { %8188 = vmatprep.subr.bf16.mxu1 %v10302_v61  ;;  %v10360_v25 = vpack.c.bf16 %v5305_v0, %v5302_v44  ;;  %v10637_v21 = vand.u32 4294901760, %v10346_v58  ;;  %v10375_v47 = vsub.f32 %v6113_v39, %v5305_v0  ;;  %v5415_v39 = vsub.f32 %v10354_v2, %v10635_v51 }
 0x1ef   : > { %v8227_v7 = vpack.c.bf16 %v10354_v2, %v10346_v58 }
 0x1f0   : > { %7285 = vmatmul.mubr.f32.vlgmr.msra.gmra.mrb[4].mxu1 %v9960_v1  ;;  %8122 = vmatpush3.bf16.msra.mxu0 %v8119_v19  ;;  %v10634_v1 = vand.u32 4294901760, %v10327_v13  ;;  %v5381_v19 = vand.u32 4294901760, %v5380_v14  ;;  %v5395_v14 = vand.u32 4294901760, %v5394_v33  ;;  %v5416_v33 = vand.u32 4294901760, %v5415_v39 }
 0x1f1   : > { %8190 = vmatpush3.bf16.msra.mxu1 %v10302_v61  ;;  %7417 = vmatprep.mubr.f32.mxu1 %v5360_v28 }
 0x1f2   : > { %8124 = vmatprep.subr.bf16.mxu0 %v8123_v55  ;;  %8192 = vmatprep.subr.bf16.mxu1 %v10332_v53  ;;  %v5401_v23 = vsub.f32 %v10327_v13, %v10634_v1  ;;  %v8203_v28 = vpack.c.bf16 %v5388_v45, %v5381_v19  ;;  %v5408_v1 = vsub.f32 %v10346_v58, %v10637_v21  ;;  %v1713_v21 = vld [vmem:[#allocation2] sm:$0xff] }
 0x1f3   : > { %7323 = vmatmul.mubr.f32.vlgmr.msra.gmra.mrb[6].mxu0 %v10181_v57 }
 0x1f4   : > { %8126 = vmatpush3.bf16.msra.mxu0 %v8123_v55  ;;  %7341 = vmatprep.mubr.f32.mxu0 %v10111_v12  ;;  %v10373_v55 = vsub.f32 %v6112_v54, %v5302_v44  ;;  %v5402_v6 = vand.u32 4294901760, %v5401_v23  ;;  %v5369_v54 = vsub.f32 %v10349_v32, %v5368_v48  ;;  %v5428_v44 = vand.u32 4294901760, %v10375_v47 }
 0x1f5   : > { %8194 = vmatpush3.bf16.msra.mxu1 %v10332_v53  ;;  %8128 = vmatprep.subr.bf16.mxu0 %v8127_v5  ;;  %v5409_v19 = vand.u32 4294901760, %v5408_v1  ;;  %v8219_v12 = vpack.c.bf16 %v10299_v46, %v10296_v8 }
 0x1f6   : > { %8196 = vmatprep.subr.bf16.mxu1 %v10352_v63  ;;  %v8207_v0 = vpack.c.bf16 %v5402_v6, %v5395_v14  ;;  %v5370_v45 = vand.u32 4294901760, %v5369_v54  ;;  %v5429_v51 = vsub.f32 %v10375_v47, %v5428_v44  ;;  %v1714_v54 = vld [vmem:[#allocation2 + $0x8] sm:$0xff]  ;;  %v8231_v17 = vpack.c.bf16 %v10375_v47, %v10373_v55 }
 0x1f7   : > { %v8211_v1 = vpack.c.bf16 %v5416_v33, %v5409_v19  ;;  %v6114_v19 = vld [vmem:[%s10585_s3] ss:$0 sm:$0xff] }
 0x1f8   : > { %8130 = vmatpush3.bf16.msra.mxu0 %v8127_v5  ;;  %v10636_v5 = vand.u32 4294901760, %v10373_v55  ;;  %v5430_v14 = vand.u32 4294901760, %v5429_v51 }
 0x1f9   : > { %8198 = vmatpush3.bf16.msra.mxu1 %v10352_v63  ;;  %8132 = vmatprep.subr.bf16.mxu0 %v8131_v26 }
 0x1fa   : > { %8200 = vmatprep.subr.bf16.mxu1 %v10360_v25  ;;  %v5422_v23 = vsub.f32 %v10373_v55, %v10636_v5 }
 0x1fc   : > { %8134 = vmatpush3.bf16.msra.mxu0 %v8131_v26  ;;  %v5423_v26 = vand.u32 4294901760, %v5422_v23 }
 0x1fd   : > { %8202 = vmatpush3.bf16.msra.mxu1 %v10360_v25  ;;  %8136 = vmatprep.subr.bf16.mxu0 %v8135_v62 }
 0x1fe   : > { %8204 = vmatprep.subr.bf16.mxu1 %v8203_v28  ;;  %v8215_v51 = vpack.c.bf16 %v5430_v14, %v5423_v26 }
 0x200   : > { %7418 = vmatmul.mubr.f32.vlgmr.msra.gmra.mrb[6].mxu1 %v5370_v45  ;;  %8138 = vmatpush3.bf16.msra.mxu0 %v8135_v62 }
 0x201   : > { %8206 = vmatpush3.bf16.msra.mxu1 %v8203_v28  ;;  %7436 = vmatprep.mubr.f32.mxu1 %v10259_v3  ;;  %v8159_v28 = vpack.c.bf16 %v4709_v43, %v4702_v11  ;;  %v10690_v43 = vand.u32 4294901760, %v10373_v55 }
 0x202   : > { %8140 = vmatprep.subr.bf16.mxu0 %v10151_v36  ;;  %8208 = vmatprep.subr.bf16.mxu1 %v8207_v0 }
 0x203   : > { %v6830_v6 = vpop.f32.mrb[0].mxu1  ;;  %7342 = vmatmul.mubr.f32.vlgmr.msra.gmra.mrb[6].mxu0 %v10203_v30  ;;  %v8263_v40 = vpack.c.bf16 %v5428_v44, %v10690_v43 }
 0x204   : > { %v1716_v39 = vadd.f32 %v6830_v6, %v1714_v54  ;;  %v1703_v5 = vpop.f32.mrb[1].mxu1  ;;  %8142 = vmatpush3.bf16.msra.mxu0 %v10151_v36  ;;  %7360 = vmatprep.mubr.f32.mxu0 %v4667_v9  ;;  %v8155_v9 = vpack.c.bf16 %v4695_v20, %v4688_v56  ;;  %v10688_v56 = vand.u32 4294901760, %v10346_v58  ;;  %v10689_v20 = vand.u32 4294901760, %v10354_v2 }
 0x205   : > { %v1715_v62 = vadd.f32 %v1713_v21, %v1703_v5  ;;  %8210 = vmatpush3.bf16.msra.mxu1 %v8207_v0  ;;  %8144 = vmatprep.subr.bf16.mxu0 %v10184_v24  ;;  %v8223_v21 = vpack.c.bf16 %v10327_v13, %v10325_v16 }
 0x206   : > { %1718 = vst.msk [vmem:[#allocation2 + $0x8] sm:$0xff] %vm416_vm1, %v1716_v39  ;;  %8212 = vmatprep.subr.bf16.mxu1 %v8211_v1  ;;  %v8259_v11 = vpack.c.bf16 %v10689_v20, %v10688_v56 }
 0x207   : > { %1717 = vst.msk [vmem:[#allocation2] sm:$0xff] %vm416_vm1, %v1715_v62 }
 0x208   : > { %8146 = vmatpush3.bf16.msra.mxu0 %v10184_v24 }
 0x209   : > { %8214 = vmatpush3.bf16.msra.mxu1 %v8211_v1  ;;  %8148 = vmatprep.subr.bf16.mxu0 %v10210_v41 }
 0x20a   : > { %8216 = vmatprep.subr.bf16.mxu1 %v8215_v51 }
 0x20c   : > { %8150 = vmatpush3.bf16.msra.mxu0 %v10210_v41 }
 0x20d   : > { %8218 = vmatpush3.bf16.msra.mxu1 %v8215_v51  ;;  %8152 = vmatprep.subr.bf16.mxu0 %v10222_v49 }
 0x20e   : > { %8220 = vmatprep.subr.bf16.mxu1 %v8219_v12 }
 0x210   : > { %7437 = vmatmul.mubr.f32.vlgmr.msra.gmra.mrb[6].mxu1 %v10329_v59  ;;  %8154 = vmatpush3.bf16.msra.mxu0 %v10222_v49 }
 0x211   : > { %8222 = vmatpush3.bf16.msra.mxu1 %v8219_v12  ;;  %7455 = vmatprep.mubr.f32.mxu1 %v10274_v37 }
 0x212   : > { %8156 = vmatprep.subr.bf16.mxu0 %v8155_v9  ;;  %8224 = vmatprep.subr.bf16.mxu1 %v8223_v21 }
 0x213   : > { %7361 = vmatmul.mubr.f32.vlgmr.msra.gmra.mrb[6].mxu0 %v4677_v27 }
 0x214   : > { %8158 = vmatpush3.bf16.msra.mxu0 %v8155_v9  ;;  %7379 = vmatprep.mubr.f32.mxu0 %v10100_v29 }
 0x215   : > { %8226 = vmatpush3.bf16.msra.mxu1 %v8223_v21  ;;  %8160 = vmatprep.subr.bf16.mxu0 %v8159_v28 }
 0x216   : > { %8228 = vmatprep.subr.bf16.mxu1 %v8227_v7 }
 0x218   : > { %8162 = vmatpush3.bf16.msra.mxu0 %v8159_v28 }
 0x219   : > { %8230 = vmatpush3.bf16.msra.mxu1 %v8227_v7  ;;  %8164 = vmatprep.subr.bf16.mxu0 %v8163_v22 }
 0x21a   : > { %8232 = vmatprep.subr.bf16.mxu1 %v8231_v17 }
 0x21c   : > { %8166 = vmatpush3.bf16.msra.mxu0 %v8163_v22 }
 0x21d   : > { %8234 = vmatpush3.bf16.msra.mxu1 %v8231_v17  ;;  %8168 = vmatprep.subr.bf16.mxu0 %v8167_v52 }
 0x21e   : > { %8236 = vmatprep.subr.bf16.mxu1 %v10302_v61 }
 0x220   : > { %7456 = vmatmul.mubr.f32.vlgmr.msra.gmra.mrb[6].mxu1 %v10349_v32  ;;  %8170 = vmatpush3.bf16.msra.mxu0 %v8167_v52 }
 0x221   : > { %8238 = vmatpush3.bf16.msra.mxu1 %v10302_v61  ;;  %7474 = vmatprep.mubr.f32.mxu1 %v5358_v42 }
 0x222   : > { %8172 = vmatprep.subr.bf16.mxu0 %v10151_v36  ;;  %8240 = vmatprep.subr.bf16.mxu1 %v10332_v53 }
 0x223   : > { %7380 = vmatmul.mubr.f32.vlgmr.msra.gmra.mrb[6].mxu0 %v10181_v57 }
 0x224   : > { %8174 = vmatpush3.bf16.msra.mxu0 %v10151_v36  ;;  %7398 = vmatprep.mubr.f32.mxu0 %v10100_v29  ;;  %v8251_v36 = vpack.c.bf16 %v5386_v35, %v5379_v38  ;;  %v10687_v29 = vand.u32 4294901760, %v10327_v13 }
 0x225   : > { %8242 = vmatpush3.bf16.msra.mxu1 %v10332_v53  ;;  %8176 = vmatprep.subr.bf16.mxu0 %v10184_v24 }
 0x226   : > { %8244 = vmatprep.subr.bf16.mxu1 %v10352_v63 }
 0x228   : > { %8178 = vmatpush3.bf16.msra.mxu0 %v10184_v24  ;;  %v8255_v24 = vpack.c.bf16 %v10687_v29, %v5393_v31 }
 0x229   : > { %8246 = vmatpush3.bf16.msra.mxu1 %v10352_v63  ;;  %8180 = vmatprep.subr.bf16.mxu0 %v10210_v41 }
 0x22a   : > { %8248 = vmatprep.subr.bf16.mxu1 %v10360_v25 }
 0x22c   : > { %8182 = vmatpush3.bf16.msra.mxu0 %v10210_v41 }
 0x22d   : > { %8250 = vmatpush3.bf16.msra.mxu1 %v10360_v25  ;;  %8184 = vmatprep.subr.bf16.mxu0 %v10222_v49 }
 0x22e   : > { %8252 = vmatprep.subr.bf16.mxu1 %v8251_v36 }
 0x230   : > { %7475 = vmatmul.mubr.f32.vlgmr.msra.gmra.mrb[6].mxu1 %v5368_v48  ;;  %8186 = vmatpush3.bf16.msra.mxu0 %v10222_v49 }
 0x231   : > { %8254 = vmatpush3.bf16.msra.mxu1 %v8251_v36  ;;  %7493 = vmatprep.mubr.f32.mxu1 %v10259_v3 }
 0x232   : > { %8256 = vmatprep.subr.bf16.mxu1 %v8255_v24 }
 0x233   : > { %7399 = vmatmul.mubr.f32.vlgmr.msra.gmra.mrb[6].mxu0 %v10181_v57 }
 0x235   : > { %8258 = vmatpush3.bf16.msra.mxu1 %v8255_v24 }
 0x236   : > { %8260 = vmatprep.subr.bf16.mxu1 %v8259_v11 }
 0x239   : > { %8262 = vmatpush3.bf16.msra.mxu1 %v8259_v11 }
 0x23a   : > { %8264 = vmatprep.subr.bf16.mxu1 %v8263_v40 }
 0x23d   : > { %8266 = vmatpush3.bf16.msra.mxu1 %v8263_v40 }
 0x23e   : > { %8268 = vmatprep.subr.bf16.mxu1 %v10302_v61 }
 0x240   : > { %7494 = vmatmul.mubr.f32.vlgmr.msra.gmra.mrb[6].mxu1 %v10329_v59 }
 0x241   : > { %8270 = vmatpush3.bf16.msra.mxu1 %v10302_v61  ;;  %7512 = vmatprep.mubr.f32.mxu1 %v10259_v3 }
 0x242   : > { %8272 = vmatprep.subr.bf16.mxu1 %v10332_v53 }
 0x245   : > { %8274 = vmatpush3.bf16.msra.mxu1 %v10332_v53 }
 0x246   : > { %v6944_v57 = vpop.f32.mrb[2].mxu0  ;;  %8276 = vmatprep.subr.bf16.mxu1 %v10352_v63 }
 0x247   : > { %2404 = vrot.lane.b32.xlu1 %v6944_v57, %s8547_s11  ;;  %v2390_v34 = vpop.f32.mrb[3].mxu0 }
 0x248   : > { %2402 = vrot.lane.b32.xlu0 %v2390_v34, %s8547_s11 }
 0x249   : > { %8278 = vmatpush3.bf16.msra.mxu1 %v10352_v63 }
 0x24a   : > { %8280 = vmatprep.subr.bf16.mxu1 %v10360_v25 }
 0x24d   : > { %8282 = vmatpush3.bf16.msra.mxu1 %v10360_v25 }
 0x250   : > { %7513 = vmatmul.mubr.f32.vlgmr.msra.gmra.mrb[6].mxu1 %v10329_v59 }
 0x263   : > { %v7058_v30 = vpop.f32.mrb[2].mxu1 }
 0x264   : > { %v3081_v41 = vpop.f32.mrb[3].mxu1  ;;  %3097 = vrot.lane.b32.xlu1 %v7058_v30, %s8547_s11 }
 0x265   : > { %3095 = vrot.lane.b32.xlu0 %v3081_v41, %s8547_s11 }
 0x2a6   : > { %v7172_v49 = vpop.f32.mrb[4].mxu0 }
 0x2a7   : > { %3790 = vrot.lane.b32.xlu1 %v7172_v49, %s8546_s10  ;;  %v3776_v10 = vpop.f32.mrb[5].mxu0 }
 0x2a8   : > { %3788 = vrot.lane.b32.xlu0 %v3776_v10, %s8546_s10 }
 0x2b9   : > { %v2405_v18 = vpop.permute.xlu1 %2404 }
 0x2ba   : > { %2410 = vst.msk [vmem:[#allocation2 + $0x8] sm:$0xff] %vm2408_vm8, %v2405_v18  ;;  %v2403_v15 = vpop.permute.xlu0 %2402 }
 0x2bb   : > { %2409 = vst.msk [vmem:[#allocation2] sm:$0xff] %vm2408_vm8, %v2403_v15 }
 0x2c1   : > { %v3092_v50 = vld [vmem:[#allocation2 + $0x8] sm:$0xff] }
 0x2c2   : > { %v3091_v42 = vld [vmem:[#allocation2] sm:$0xff] }
 0x2c3   : > { %v7286_v27 = vpop.f32.mrb[4].mxu1 }
 0x2c4   : > { %v4467_v4 = vpop.f32.mrb[5].mxu1  ;;  %4483 = vrot.lane.b32.xlu1 %v7286_v27, %s8546_s10 }
 0x2c5   : > { %4481 = vrot.lane.b32.xlu0 %v4467_v4, %s8546_s10  ;;  %s8556_s10 = smov [#allocation4]  }
 0x2d6   : > { %v3098_v60 = vpop.permute.xlu1 %3097 }
 0x2d7   : > { %v3102_v3 = vadd.f32 %v3098_v60, %v3092_v50  ;;  %v3096_v37 = vpop.permute.xlu0 %3095 }
 0x2d8   : > { %v3101_v8 = vadd.f32 %v3096_v37, %v3091_v42 }
 0x2d9   : > { %3104 = vst.msk [vmem:[#allocation2 + $0x8] sm:$0xff] %vm2408_vm8, %v3102_v3 }
 0x2da   : > { %3103 = vst.msk [vmem:[#allocation2] sm:$0xff] %vm2408_vm8, %v3101_v8 }
 0x306   : > { %v7400_v46 = vpop.f32.mrb[6].mxu0 }
 0x307   : > { %5176 = vrot.lane.b32.xlu1 %v7400_v46, %s8548_s24  ;;  %v5162_v61 = vpop.f32.mrb[7].mxu0 }
 0x308   : > { %5174 = vrot.lane.b32.xlu0 %v5162_v61, %s8548_s24 }
 0x319   : > { %v3791_v38 = vpop.permute.xlu1 %3790 }
 0x31a   : > { %3796 = vst.msk [vmem:[#allocation2 + $0x8] sm:$0xff] %vm3794_vm9, %v3791_v38  ;;  %v3789_v35 = vpop.permute.xlu0 %3788 }
 0x31b   : > { %3795 = vst.msk [vmem:[#allocation2] sm:$0xff] %vm3794_vm9, %v3789_v35 }
 0x321   : > { %v4478_v59 = vld [vmem:[#allocation2 + $0x8] sm:$0xff] }
 0x322   : > { %v4477_v32 = vld [vmem:[#allocation2] sm:$0xff] }
 0x323   : > { %v7514_v16 = vpop.f32.mrb[6].mxu1 }
 0x324   : > { %v5853_v13 = vpop.f32.mrb[7].mxu1  ;;  %5869 = vrot.lane.b32.xlu1 %v7514_v16, %s8548_s24 }
 0x325   : > { %5867 = vrot.lane.b32.xlu0 %v5853_v13, %s8548_s24  ;;  %s8454_s24 = sshll.u32 %s8556_s10, 4  ;;  %s8455_s24 = int_to_ptr.vmem [resolvable:$false] %s8454_s24 }
 0x326   : > { %s8456_s18 = scalar_lea.vmem %s8455_s24, 512  ;;  %p8457_p5 = scmp.lt.s32.totalorder %s10525_s13, %s8455_s24 }
 0x327   : > { %p8458_p6 = scmp.lt.s32.totalorder %s8456_s18, %s8450_s8 }
 0x329   : > { %p8459_p7 = por %p8458_p6, %p8457_p5 }
 0x32b   : > { %p8460_p9 = pnand %p8459_p7, %p8453_p4 }
 0x336   : > { %v4484_v53 = vpop.permute.xlu1 %4483 }
 0x337   : > { %v4488_v31 = vadd.f32 %v4484_v53, %v4478_v59  ;;  %v4482_v58 = vpop.permute.xlu0 %4481 }
 0x338   : > { %v4487_v63 = vadd.f32 %v4482_v58, %v4477_v32 }
 0x339   : > { %4490 = vst.msk [vmem:[#allocation2 + $0x8] sm:$0xff] %vm3794_vm9, %v4488_v31 }
 0x33a   : > { %4489 = vst.msk [vmem:[#allocation2] sm:$0xff] %vm3794_vm9, %v4487_v63 }
 0x379   : > { %v5177_v2 = vpop.permute.xlu1 %5176 }
 0x37a   : > { %5182 = vst.msk [vmem:[#allocation2 + $0x8] sm:$0xff] %vm5180_vm10, %v5177_v2  ;;  %v5175_v25 = vpop.permute.xlu0 %5174 }
 0x37b   : > { %5181 = vst.msk [vmem:[#allocation2] sm:$0xff] %vm5180_vm10, %v5175_v25 }
 0x381   : > { %v5864_v48 = vld [vmem:[#allocation2 + $0x8] sm:$0xff] }
 0x382   : > { %v5863_v44 = vld [vmem:[#allocation2] sm:$0xff] }
 0x396   : > { %v5870_v55 = vpop.permute.xlu1 %5869 }
 0x397   : > { %v5874_v47 = vadd.f32 %v5870_v55, %v5864_v48  ;;  %v5868_v5 = vpop.permute.xlu0 %5867 }
 0x398   : > { %v5873_v0 = vadd.f32 %v5868_v5, %v5863_v44 }
 0x399   : > { %5876 = vst.msk [vmem:[#allocation2 + $0x8] sm:$0xff] %vm5180_vm10, %v5874_v47 }
 0x39a   : > { %5875 = vst.msk [vmem:[#allocation2] sm:$0xff] %vm5180_vm10, %v5873_v0 }
 0x3a0   : > { %v5878_v45 = vld [vmem:[#allocation2 + $0x8] sm:$0xff] }
 0x3a1   : > { %v5877_v33 = vld [vmem:[#allocation2] sm:$0xff]  ;;  %v5887_v23 = vadd.f32 %v6114_v19, %v5878_v45 }
 0x3a2   : > { %v5886_v1 = vadd.f32 %v6114_v19, %v5877_v33 }
 0x3a3   : > { %v5891_v26 = vmul.f32 0.70710677, %v5887_v23  ;;  %v5889_v39 = vmul.f32 0.5, %v5887_v23 }
 0x3a4   : > { %v5890_v14 = vmul.f32 0.70710677, %v5886_v1  ;;  %v5888_v51 = vmul.f32 0.5, %v5886_v1 }
 0x3a5   : > { %8446 = verf.f32 %v5891_v26 }
 0x3a6   : > { %8448 = verf.f32 %v5890_v14 }
 0x3af   : > { %v8447_v6 = vpop.eup %8446 }
 0x3b0   : > { %v8449_v54 = vpop.eup %8448  ;;  %v5895_v62 = vadd.f32 1.0, %v8447_v6 }
 0x3b1   : > { %v5894_v12 = vadd.f32 1.0, %v8449_v54 }
 0x3b2   : > { %v5897_v9 = vmul.f32 %v5895_v62, %v5889_v39 }
 0x3b3   : > { %v5896_v21 = vmul.f32 %v5894_v12, %v5888_v51 }
 0x3b4   : > { %5899 = vst.msk [vmem:[%s297_s12 + $0x8] sm:$0xff] %vm337_vm0, %v5897_v9 }
 0x3b5   : > { %5898 = vst.msk [vmem:[%s297_s12] sm:$0xff] %vm337_vm0, %v5896_v21 }
 0x3b6   : > { %8463 = shalt.err (!%p8460_p9)
}
 0x3b7   : > { %s8464_s14 = scalar_lea.hbm %s10523_s9, 256  ;;  %s8468_s30 = scalar_lea.hbm %s10586_s4, 1024 }
 0x3b8   : > { %p8465_p10 = scmp.ne.s32.totalorder %s10523_s9, %s8464_s14  ;;  %p8469_p13 = scmp.lt.u32.totalorder %s10523_s9, %s10586_s4 }
 0x3b9   : > { %p8470_p0 = scmp.lt.u32.totalorder %s8468_s30, %s8464_s14  ;;  %p8472_p2 = scmp.lt.u32.totalorder %s8464_s14, %s10523_s9 }
 0x3ba   : > { %p8466_p11 = pnand %p8465_p10, %p8634_p3 }
 0x3bb   : > { %p8471_p1 = por %p8470_p0, %p8469_p13 }
 0x3bc   : > { %p8467_p12 = pneg %p8466_p11 }
 0x3bd   : > { %p8473_p4 = por %p8472_p2, %p8471_p1 }
 0x3bf   : > { %p8474_p5 = pnand %p8473_p4, %p8467_p12 }
 0x3c1   : > { %8477 = shalt.err (!%p8474_p5)
}
 0x3c2   : > { %s8557_s27 = smov 128  }
 0x3c3   : > { %8364 = dma.vmem_to_hbm [thread:$0]  (%p8634_p3), %s10525_s13, 256, %s10523_s9, %s10529_s19, %s8557_s27, %s8557_s27, %s8547_s11  }
 0x3c4 PF: > { %p8370_p6 = scmp.ge.s32.totalorder %s8544_s22, 2  ;;  %s5932_s8 = sand.u32 1, %s8516_s15  }
 0x3c5   : > { %s5933_s10 = scalar_lea.sflag [#allocation5], %s5932_s8 }
 0x3c6   : > { %p8367_p7 = pnand %p8370_p6, %p8643_p8 }
 0x3c8   : > { %8511 = dma.done.wait (!%p8367_p7), %s5933_s10, 256  }
 0x3c9   : > { %8513 = vsyncadd (!%p8367_p7), %s5933_s10, 4294967040  ;;  %s17_s22 = sadd.s32 1, %s8544_s22   ;;  %s10691_s15 = smov %s8520_s16 }
 0x3ca   : > { %p14_p9 = scmp.ge.s32.totalorder %s17_s22, 6   ;;  %s10692_s16 = smov %s8524_s17 }
 0x3cb   : > { %s10693_s17 = smov %s8652_s7  ;;  %s10694_s18 = smov %s8536_s20 }
 0x3cc   : > { %s10695_s19 = smov %s8540_s21  ;;  %s10696_s20 = smov %s10699_s25 }
 0x3cd   : > { %s10697_s21 = smov %s10703_s26  ;;  %16 = sbr.rel (!%p14_p9) target bundleno = 5 (0x5), region = 83 }
 0x3d4   :  { %5938 = vsyncpa [#allocation5], 1 }
 0x3d5   :  { %5940 = vsyncpa [#allocation5 + $0x1], 1 }

</bundles_post_ra>
